<compile_context>
chip_gen: v6e
topology: v6e:2x2x1
jax: 0.10.0
libtpu: 0.0.40
codegen_flags: <defaults>
</compile_context>

<pallas_src>
import numpy as np

import jax
import jax.numpy as jnp
from jax import lax
from jax.experimental import pallas as pl
from jax.experimental.pallas import tpu as pltpu

N_CHANNELS = 3
ENCODED_DIM = 16
L_IN = 153
BN_EPS = 1e-5
K = 3
STRIDE = 2

# Encoder Conv1d schedule: L_out = (L_in - K)//2 + 1
ENC_CH = (3, 24, 48, 96)
ENC_L = (153, 76, 37, 18)
# Decoder ConvTranspose1d schedule: L_out = (L_in - 1)*2 + K
DEC_CH = (96, 48, 24, 3)
DEC_L = (18, 37, 75, 151)
FLAT_DIM = ENC_CH[3] * ENC_L[3]          # 1728


# ---------------------------------------------------------------------------
# Pallas kernels (one invocation each, no grid, everything VMEM resident)
# ---------------------------------------------------------------------------
def _vmem():
    return pl.BlockSpec(memory_space=pltpu.MemorySpace.VMEM)


def _conv_tap_sum(a, m_ref, s_ref):
    """Grouped strided Conv1d:  sum_k  M_k @ (a @ S_k).

    a:    (B*Cin, Lin)   activation, channels on sublanes, length on lanes
    S_k:  (Lin, Lout)    0/1 stride-2 selection matrix for tap k
    M_k:  (B*Cout,B*Cin) channel mixer (BN scale pre-folded), block-diag over
                         batch and groups
    """
    y = None
    for k in range(K):
        d = jnp.dot(a, s_ref[k], preferred_element_type=jnp.float32)
        t = jnp.dot(m_ref[k], d, preferred_element_type=jnp.float32)
        y = t if y is None else y + t
    return y


def _convT_tap_sum(a, m_ref, u_ref):
    """Grouped strided ConvTranspose1d (no zero-dilated input):
    sum_k  (M_k @ a) @ U_k   with U_k[o, 2o+k] = 1."""
    y = None
    for k in range(K):
        z = jnp.dot(m_ref[k], a, preferred_element_type=jnp.float32)
        t = jnp.dot(z, u_ref[k], preferred_element_type=jnp.float32)
        y = t if y is None else y + t
    return y


def _encoder_conv_kernel(x_ref,
                         s1_ref, m1_ref, b1_ref,
                         s2_ref, m2_ref, b2_ref,
                         s3_ref, m3_ref, b3_ref,
                         o_ref):
    # b*_ref: (B*Cout, 1) shift (bias / folded BatchNorm shift); BN scale is
    # already folded into m*_ref.
    a = x_ref[...]
    a = jnp.maximum(_conv_tap_sum(a, m1_ref, s1_ref) + b1_ref[...], 0.0)
    a = jnp.maximum(_conv_tap_sum(a, m2_ref, s2_ref) + b2_ref[...], 0.0)
    a = jnp.maximum(_conv_tap_sum(a, m3_ref, s3_ref) + b3_ref[...], 0.0)
    o_ref[...] = a


def _mlp_kernel(x_ref, w1_ref, b1_ref, w2_ref, b2_ref,
                w3_ref, b3_ref, w4_ref, b4_ref, o_ref):
    # encoder_lin (1728->64->16) and decoder_lin (16->64->1728) fused.
    h = jnp.dot(x_ref[...], w1_ref[...], preferred_element_type=jnp.float32) + b1_ref[...]
    h = jnp.maximum(h, 0.0)
    z = jnp.dot(h, w2_ref[...], preferred_element_type=jnp.float32) + b2_ref[...]
    g = jnp.dot(z, w3_ref[...], preferred_element_type=jnp.float32) + b3_ref[...]
    g = jnp.maximum(g, 0.0)
    r = jnp.dot(g, w4_ref[...], preferred_element_type=jnp.float32) + b4_ref[...]
    o_ref[...] = jnp.maximum(r, 0.0)


def _decoder_conv_kernel(x_ref,
                         m1_ref, u1_ref, b1_ref,
                         m2_ref, u2_ref, b2_ref,
                         m3_ref, u3_ref, b3_ref,
                         o_ref):
    a = x_ref[...]
    a = jnp.maximum(_convT_tap_sum(a, m1_ref, u1_ref) + b1_ref[...], 0.0)
    a = jnp.maximum(_convT_tap_sum(a, m2_ref, u2_ref) + b2_ref[...], 0.0)
    a = _convT_tap_sum(a, m3_ref, u3_ref) + b3_ref[...]     # no ReLU on last layer
    o_ref[...] = a


# ---------------------------------------------------------------------------
# Cost estimates (advisory hints for the XLA scheduler)
# ---------------------------------------------------------------------------
def _nbytes(arrs, out_shape):
    n = sum(int(np.prod(a.shape)) * 4 for a in arrs)
    return n + int(np.prod(out_shape)) * 4


def _conv_stack_flops(batch, transposed):
    chs, ls = (DEC_CH, DEC_L) if transposed else (ENC_CH, ENC_L)
    f = 0
    for i in range(3):
        cin, cout, lin, lout = chs[i], chs[i + 1], ls[i], ls[i + 1]
        if transposed:
            f += K * (2 * (batch * cout) * (batch * cin) * lin
                      + 2 * batch * cout * lin * lout)
        else:
            f += K * (2 * batch * cin * lin * lout
                      + 2 * (batch * cout) * (batch * cin) * lout)
    return f


def _mlp_flops(batch):
    return 2 * batch * (FLAT_DIM * 64 + 64 * ENCODED_DIM
                        + ENCODED_DIM * 64 + 64 * FLAT_DIM)


# ---------------------------------------------------------------------------
# pallas_call wrappers
# ---------------------------------------------------------------------------
def _encoder_conv_call(prep, x2):
    batch = x2.shape[0] // ENC_CH[0]
    out_shape = (batch * ENC_CH[3], ENC_L[3])
    args = (x2,
            prep["enc_S1"], prep["enc_M1"], prep["enc_b1"],
            prep["enc_S2"], prep["enc_M2"], prep["enc_b2"],
            prep["enc_S3"], prep["enc_M3"], prep["enc_b3"])
    return pl.pallas_call(
        _encoder_conv_kernel,
        out_shape=jax.ShapeDtypeStruct(out_shape, jnp.float32),
        in_specs=[_vmem() for _ in args],
        out_specs=_vmem(),
        cost_estimate=pl.CostEstimate(
            flops=_conv_stack_flops(batch, transposed=False),
            transcendentals=0,
            bytes_accessed=_nbytes(args, out_shape)),
    )(*args)


def _mlp_call(prep, flat):
    batch = flat.shape[0]
    out_shape = (batch, FLAT_DIM)
    args = (flat,
            prep["lin_W1"], prep["lin_b1"], prep["lin_W2"], prep["lin_b2"],
            prep["lin_W3"], prep["lin_b3"], prep["lin_W4"], prep["lin_b4"])
    return pl.pallas_call(
        _mlp_kernel,
        out_shape=jax.ShapeDtypeStruct(out_shape, jnp.float32),
        in_specs=[_vmem() for _ in args],
        out_specs=_vmem(),
        cost_estimate=pl.CostEstimate(
            flops=_mlp_flops(batch), transcendentals=0,
            bytes_accessed=_nbytes(args, out_shape)),
    )(*args)


def _decoder_conv_call(prep, h):
    batch = h.shape[0] // DEC_CH[0]
    out_shape = (batch * DEC_CH[3], DEC_L[3])
    args = (h,
            prep["dec_M1"], prep["dec_U1"], prep["dec_b1"],
            prep["dec_M2"], prep["dec_U2"], prep["dec_b2"],
            prep["dec_M3"], prep["dec_U3"], prep["dec_b3"])
    return pl.pallas_call(
        _decoder_conv_kernel,
        out_shape=jax.ShapeDtypeStruct(out_shape, jnp.float32),
        in_specs=[_vmem() for _ in args],
        out_specs=_vmem(),
        cost_estimate=pl.CostEstimate(
            flops=_conv_stack_flops(batch, transposed=True),
            transcendentals=0,
            bytes_accessed=_nbytes(args, out_shape)),
    )(*args)


# ---------------------------------------------------------------------------
# One-time host-side parameter preparation (all transposes / folds / BN-scale
# folding / bias tiling hoisted out of the hot path)
# ---------------------------------------------------------------------------
def _sel_dn(lin, lout, k):
    s = np.zeros((lin, lout), np.float32)
    o = np.arange(lout)
    s[STRIDE * o + k, o] = 1.0
    return s


def _sel_up(lin, lout, k):
    u = np.zeros((lin, lout), np.float32)
    o = np.arange(lin)
    u[o, STRIDE * o + k] = 1.0
    return u


def _sel_stack_dn(lin, lout):
    return np.stack([_sel_dn(lin, lout, k) for k in range(K)])


def _sel_stack_up(lin, lout):
    return np.stack([_sel_up(lin, lout, k) for k in range(K)])


def _mix_conv(w, groups, batch, scale=None):
    """Conv1d weight (Cout, Cin_g, K) -> (K, B*Cout, B*Cin) block-diag mixer.
    Optional per-output-channel `scale` (folded BatchNorm) is baked in."""
    cout, cin_g, _ = w.shape
    cout_g = cout // groups
    cin = cin_g * groups
    eye_b = np.eye(batch, dtype=np.float32)
    out = np.zeros((K, batch * cout, batch * cin), np.float32)
    for k in range(K):
        m = np.zeros((cout, cin), np.float32)
        for g in range(groups):
            m[g * cout_g:(g + 1) * cout_g, g * cin_g:(g + 1) * cin_g] = \
                w[g * cout_g:(g + 1) * cout_g, :, k]
        if scale is not None:
            m = m * scale[:, None]
        out[k] = np.kron(eye_b, m)
    return out


def _mix_convT(wt, groups, batch, scale=None):
    """ConvTranspose1d weight (Cin, Cout_g, K) -> (K, B*Cout, B*Cin) mixer,
    with optional folded BatchNorm scale per output channel."""
    cin, cout_g, _ = wt.shape
    cin_g = cin // groups
    cout = cout_g * groups
    eye_b = np.eye(batch, dtype=np.float32)
    out = np.zeros((K, batch * cout, batch * cin), np.float32)
    for k in range(K):
        m = np.zeros((cout, cin), np.float32)
        for g in range(groups):
            m[g * cout_g:(g + 1) * cout_g, g * cin_g:(g + 1) * cin_g] = \
                wt[g * cin_g:(g + 1) * cin_g, :, k].T
        if scale is not None:
            m = m * scale[:, None]
        out[k] = np.kron(eye_b, m)
    return out


def _shift(shift, batch):
    """Per-channel shift, tiled over batch -> (B*C, 1)."""
    return np.tile(np.asarray(shift, np.float32), batch)[:, None]


def _fold_bn(bias, gamma, beta, mean, var):
    s = gamma / np.sqrt(var + BN_EPS)
    return s, (bias - mean) * s + beta


def prepare_params(p, batch):
    pn = {k: np.asarray(v, np.float32) for k, v in p.items()}
    prep = {}
    # ---- encoder conv stack ----
    prep["enc_S1"] = _sel_stack_dn(ENC_L[0], ENC_L[1])
    prep["enc_M1"] = _mix_conv(pn["ec1_w"], N_CHANNELS, batch)
    prep["enc_b1"] = _shift(pn["ec1_b"], batch)
    s, t = _fold_bn(pn["ec2_b"], pn["bn1_g"], pn["bn1_b"], pn["bn1_m"], pn["bn1_v"])
    prep["enc_S2"] = _sel_stack_dn(ENC_L[1], ENC_L[2])
    prep["enc_M2"] = _mix_conv(pn["ec2_w"], N_CHANNELS, batch, scale=s)
    prep["enc_b2"] = _shift(t, batch)
    prep["enc_S3"] = _sel_stack_dn(ENC_L[2], ENC_L[3])
    prep["enc_M3"] = _mix_conv(pn["ec3_w"], N_CHANNELS, batch)
    prep["enc_b3"] = _shift(pn["ec3_b"], batch)
    # ---- linear stack (weights pre-transposed to (Din, Dout), biases as rows)
    prep["lin_W1"] = pn["el1_w"].T.copy(); prep["lin_b1"] = pn["el1_b"][None, :]
    prep["lin_W2"] = pn["el2_w"].T.copy(); prep["lin_b2"] = pn["el2_b"][None, :]
    prep["lin_W3"] = pn["dl1_w"].T.copy(); prep["lin_b3"] = pn["dl1_b"][None, :]
    prep["lin_W4"] = pn["dl2_w"].T.copy(); prep["lin_b4"] = pn["dl2_b"][None, :]
    # ---- decoder conv-transpose stack ----
    s, t = _fold_bn(pn["dc1_b"], pn["bn2_g"], pn["bn2_b"], pn["bn2_m"], pn["bn2_v"])
    prep["dec_M1"] = _mix_convT(pn["dc1_w"], N_CHANNELS, batch, scale=s)
    prep["dec_U1"] = _sel_stack_up(DEC_L[0], DEC_L[1])
    prep["dec_b1"] = _shift(t, batch)
    s, t = _fold_bn(pn["dc2_b"], pn["bn3_g"], pn["bn3_b"], pn["bn3_m"], pn["bn3_v"])
    prep["dec_M2"] = _mix_convT(pn["dc2_w"], N_CHANNELS, batch, scale=s)
    prep["dec_U2"] = _sel_stack_up(DEC_L[1], DEC_L[2])
    prep["dec_b2"] = _shift(t, batch)
    prep["dec_M3"] = _mix_convT(pn["dc3_w"], N_CHANNELS, batch)
    prep["dec_U3"] = _sel_stack_up(DEC_L[2], DEC_L[3])
    prep["dec_b3"] = _shift(pn["dc3_b"], batch)
    return jax.tree_util.tree_map(jnp.asarray, prep)


# ---------------------------------------------------------------------------
# Forward pass (AEconv.forward with noisify=False)
# ---------------------------------------------------------------------------
def ae_forward(prep, x):
    # TODO(synk): noisify() (torch.randn + F.dropout) is training-only noise and
    # is skipped (forward default noisify=False).
    batch = x.shape[0]
    x2 = x.reshape(batch * N_CHANNELS, L_IN)                 # (B*3, 153), free
    enc = _encoder_conv_call(prep, x2)                       # (B*96, 18)
    flat = enc.reshape(batch, FLAT_DIM)                      # (B, 1728) == PyTorch flatten
    lin = _mlp_call(prep, flat)                              # (B, 1728)
    dec_in = lin.reshape(batch * DEC_CH[0], DEC_L[0])        # (B*96, 18) == PyTorch unflatten
    dec = _decoder_conv_call(prep, dec_in)                   # (B*3, 151)
    return dec.reshape(batch, N_CHANNELS, DEC_L[3])          # (B, 3, 151)


# ---------------------------------------------------------------------------
# Deterministic synthetic parameters (no checkpoint load)
# ---------------------------------------------------------------------------
def init_params(key):
    keys = iter(jax.random.split(key, 48))

    def nrm(shape, scale=0.05):
        return scale * jax.random.normal(next(keys), shape, jnp.float32)

    def pos(shape):
        return 1.0 + 0.1 * jnp.abs(jax.random.normal(next(keys), shape, jnp.float32))

    p = {}
    p["ec1_w"] = nrm((24, 1, 3));   p["ec1_b"] = nrm((24,))
    p["ec2_w"] = nrm((48, 8, 3));   p["ec2_b"] = nrm((48,))
    p["bn1_g"] = pos((48,));        p["bn1_b"] = nrm((48,))
    p["bn1_m"] = nrm((48,));        p["bn1_v"] = pos((48,))
    p["ec3_w"] = nrm((96, 16, 3));  p["ec3_b"] = nrm((96,))
    p["el1_w"] = nrm((64, FLAT_DIM)); p["el1_b"] = nrm((64,))
    p["el2_w"] = nrm((ENCODED_DIM, 64)); p["el2_b"] = nrm((ENCODED_DIM,))
    p["dl1_w"] = nrm((64, ENCODED_DIM)); p["dl1_b"] = nrm((64,))
    p["dl2_w"] = nrm((FLAT_DIM, 64)); p["dl2_b"] = nrm((FLAT_DIM,))
    p["dc1_w"] = nrm((96, 16, 3));  p["dc1_b"] = nrm((48,))
    p["bn2_g"] = pos((48,));        p["bn2_b"] = nrm((48,))
    p["bn2_m"] = nrm((48,));        p["bn2_v"] = pos((48,))
    p["dc2_w"] = nrm((48, 8, 3));   p["dc2_b"] = nrm((24,))
    p["bn3_g"] = pos((24,));        p["bn3_b"] = nrm((24,))
    p["bn3_m"] = nrm((24,));        p["bn3_v"] = pos((24,))
    p["dc3_w"] = nrm((24, 1, 3));   p["dc3_b"] = nrm((3,))
    return p


# ---------------------------------------------------------------------------
# Pure-JAX reference (lax.conv) of the PyTorch forward, for a numerical check
# ---------------------------------------------------------------------------
_HI = lax.Precision.HIGHEST


def _ref_conv1d(x, w, b, stride, groups):
    y = lax.conv_general_dilated(
        x, w, window_strides=(stride,), padding="VALID",
        dimension_numbers=("NCH", "OIH", "NCH"),
        feature_group_count=groups, precision=_HI)
    return y + b[None, :, None]


def _ref_convT1d(x, w_t, b, stride, groups):
    cin, cout_g, k = w_t.shape
    cin_g = cin // groups
    w = w_t.reshape(groups, cin_g, cout_g, k)[..., ::-1]
    w = jnp.transpose(w, (0, 2, 1, 3)).reshape(groups * cout_g, cin_g, k)
    y = lax.conv_general_dilated(
        x, w, window_strides=(1,), padding=[(k - 1, k - 1)],
        lhs_dilation=(stride,), dimension_numbers=("NCH", "OIH", "NCH"),
        feature_group_count=groups, precision=_HI)
    return y + b[None, :, None]


def _ref_bn(x, g, b, m, v):
    return (x - m[None, :, None]) / jnp.sqrt(v[None, :, None] + BN_EPS) \
        * g[None, :, None] + b[None, :, None]


def ae_reference(p, x):
    h = jax.nn.relu(_ref_conv1d(x, p["ec1_w"], p["ec1_b"], 2, 3))
    h = _ref_conv1d(h, p["ec2_w"], p["ec2_b"], 2, 3)
    h = jax.nn.relu(_ref_bn(h, p["bn1_g"], p["bn1_b"], p["bn1_m"], p["bn1_v"]))
    h = jax.nn.relu(_ref_conv1d(h, p["ec3_w"], p["ec3_b"], 2, 3))
    batch = h.shape[0]
    h = h.reshape(batch, -1)
    h = jax.nn.relu(jnp.dot(h, p["el1_w"].T, precision=_HI) + p["el1_b"])
    z = jnp.dot(h, p["el2_w"].T, precision=_HI) + p["el2_b"]
    h = jax.nn.relu(jnp.dot(z, p["dl1_w"].T, precision=_HI) + p["dl1_b"])
    h = jax.nn.relu(jnp.dot(h, p["dl2_w"].T, precision=_HI) + p["dl2_b"])
    h = h.reshape(batch, DEC_CH[0], DEC_L[0])
    h = _ref_convT1d(h, p["dc1_w"], p["dc1_b"], 2, 3)
    h = jax.nn.relu(_ref_bn(h, p["bn2_g"], p["bn2_b"], p["bn2_m"], p["bn2_v"]))
    h = _ref_convT1d(h, p["dc2_w"], p["dc2_b"], 2, 3)
    h = jax.nn.relu(_ref_bn(h, p["bn3_g"], p["bn3_b"], p["bn3_m"], p["bn3_v"]))
    return _ref_convT1d(h, p["dc3_w"], p["dc3_b"], 2, 3)


if __name__ == "__main__":
    key = jax.random.PRNGKey(0)
    k_param, k_x = jax.random.split(key)
    params = init_params(k_param)

    B = 2
    x = jax.random.normal(k_x, (B, N_CHANNELS, L_IN), jnp.float32)

    prep = prepare_params(params, B)                 # one-time weight folding
    fwd = jax.jit(ae_forward)
    y = fwd(prep, x)
    jax.block_until_ready(y)

    assert y.shape == (B, N_CHANNELS, DEC_L[3]), y.shape
    assert y.dtype == jnp.float32
    assert bool(jnp.all(jnp.isfinite(y)))

    # Numerical cross-check against a pure-JAX reference of the PyTorch forward.
    y_ref = ae_reference(params, x)
    err = float(jnp.max(jnp.abs(y - y_ref)))
    assert err < 5e-3, f"max abs err vs reference: {err}"

    print("KERNEL_OK")
</pallas_src>

<mosaic_0001>
module attributes {stable_mosaic.version = 11 : i64} {
  func.func @_encoder_conv_kernel(%arg0: memref<6x153xf32, #tpu.memory_space<vmem>>, %arg1: memref<3x153x76xf32, #tpu.memory_space<vmem>>, %arg2: memref<3x48x6xf32, #tpu.memory_space<vmem>>, %arg3: memref<48x1xf32, #tpu.memory_space<vmem>>, %arg4: memref<3x76x37xf32, #tpu.memory_space<vmem>>, %arg5: memref<3x96x48xf32, #tpu.memory_space<vmem>>, %arg6: memref<96x1xf32, #tpu.memory_space<vmem>>, %arg7: memref<3x37x18xf32, #tpu.memory_space<vmem>>, %arg8: memref<3x192x96xf32, #tpu.memory_space<vmem>>, %arg9: memref<192x1xf32, #tpu.memory_space<vmem>>, %arg10: memref<192x18xf32, #tpu.memory_space<vmem>>) attributes {dimension_semantics = [], scalar_prefetch = 0 : i64, scratch_operands = 0 : i64, tpu.core_type = #tpu.core_type<tc>} {
    %c0 = arith.constant 0 : index
    %c0_0 = arith.constant 0 : index
    %0 = vector.load %arg0[%c0, %c0_0] : memref<6x153xf32, #tpu.memory_space<vmem>>, vector<6x153xf32>
    %c0_1 = arith.constant 0 : index
    %c0_2 = arith.constant 0 : index
    %c0_3 = arith.constant 0 : index
    %1 = vector.load %arg1[%c0_1, %c0_2, %c0_3] : memref<3x153x76xf32, #tpu.memory_space<vmem>>, vector<1x153x76xf32>
    %2 = vector.shape_cast %1 : vector<1x153x76xf32> to vector<153x76xf32>
    %cst = arith.constant dense<0.000000e+00> : vector<6x76xf32>
    %3 = tpu.matmul %0, %2, %cst {dimension_numbers = #tpu.dot_dimension_numbers<[1], [0], [0], [1], [0, 0, 1, 1], [], []>} : vector<6x153xf32>, vector<153x76xf32>, vector<6x76xf32> -> vector<6x76xf32>
    %c0_4 = arith.constant 0 : index
    %c0_5 = arith.constant 0 : index
    %c0_6 = arith.constant 0 : index
    %4 = vector.load %arg2[%c0_4, %c0_5, %c0_6] : memref<3x48x6xf32, #tpu.memory_space<vmem>>, vector<1x48x6xf32>
    %5 = vector.shape_cast %4 : vector<1x48x6xf32> to vector<48x6xf32>
    %cst_7 = arith.constant dense<0.000000e+00> : vector<48x76xf32>
    %6 = tpu.matmul %5, %3, %cst_7 {dimension_numbers = #tpu.dot_dimension_numbers<[1], [0], [0], [1], [0, 0, 1, 1], [], []>} : vector<48x6xf32>, vector<6x76xf32>, vector<48x76xf32> -> vector<48x76xf32>
    %c1 = arith.constant 1 : index
    %c0_8 = arith.constant 0 : index
    %c0_9 = arith.constant 0 : index
    %7 = vector.load %arg1[%c1, %c0_8, %c0_9] : memref<3x153x76xf32, #tpu.memory_space<vmem>>, vector<1x153x76xf32>
    %8 = vector.shape_cast %7 : vector<1x153x76xf32> to vector<153x76xf32>
    %cst_10 = arith.constant dense<0.000000e+00> : vector<6x76xf32>
    %9 = tpu.matmul %0, %8, %cst_10 {dimension_numbers = #tpu.dot_dimension_numbers<[1], [0], [0], [1], [0, 0, 1, 1], [], []>} : vector<6x153xf32>, vector<153x76xf32>, vector<6x76xf32> -> vector<6x76xf32>
    %c1_11 = arith.constant 1 : index
    %c0_12 = arith.constant 0 : index
    %c0_13 = arith.constant 0 : index
    %10 = vector.load %arg2[%c1_11, %c0_12, %c0_13] : memref<3x48x6xf32, #tpu.memory_space<vmem>>, vector<1x48x6xf32>
    %11 = vector.shape_cast %10 : vector<1x48x6xf32> to vector<48x6xf32>
    %cst_14 = arith.constant dense<0.000000e+00> : vector<48x76xf32>
    %12 = tpu.matmul %11, %9, %cst_14 {dimension_numbers = #tpu.dot_dimension_numbers<[1], [0], [0], [1], [0, 0, 1, 1], [], []>} : vector<48x6xf32>, vector<6x76xf32>, vector<48x76xf32> -> vector<48x76xf32>
    %13 = arith.addf %6, %12 : vector<48x76xf32>
    %c2 = arith.constant 2 : index
    %c0_15 = arith.constant 0 : index
    %c0_16 = arith.constant 0 : index
    %14 = vector.load %arg1[%c2, %c0_15, %c0_16] : memref<3x153x76xf32, #tpu.memory_space<vmem>>, vector<1x153x76xf32>
    %15 = vector.shape_cast %14 : vector<1x153x76xf32> to vector<153x76xf32>
    %cst_17 = arith.constant dense<0.000000e+00> : vector<6x76xf32>
    %16 = tpu.matmul %0, %15, %cst_17 {dimension_numbers = #tpu.dot_dimension_numbers<[1], [0], [0], [1], [0, 0, 1, 1], [], []>} : vector<6x153xf32>, vector<153x76xf32>, vector<6x76xf32> -> vector<6x76xf32>
    %c2_18 = arith.constant 2 : index
    %c0_19 = arith.constant 0 : index
    %c0_20 = arith.constant 0 : index
    %17 = vector.load %arg2[%c2_18, %c0_19, %c0_20] : memref<3x48x6xf32, #tpu.memory_space<vmem>>, vector<1x48x6xf32>
    %18 = vector.shape_cast %17 : vector<1x48x6xf32> to vector<48x6xf32>
    %cst_21 = arith.constant dense<0.000000e+00> : vector<48x76xf32>
    %19 = tpu.matmul %18, %16, %cst_21 {dimension_numbers = #tpu.dot_dimension_numbers<[1], [0], [0], [1], [0, 0, 1, 1], [], []>} : vector<48x6xf32>, vector<6x76xf32>, vector<48x76xf32> -> vector<48x76xf32>
    %20 = arith.addf %13, %19 : vector<48x76xf32>
    %c0_22 = arith.constant 0 : index
    %c0_23 = arith.constant 0 : index
    %21 = vector.load %arg3[%c0_22, %c0_23] : memref<48x1xf32, #tpu.memory_space<vmem>>, vector<48x1xf32>
    %22 = vector.broadcast %21 : vector<48x1xf32> to vector<48x76xf32>
    %23 = arith.addf %20, %22 : vector<48x76xf32>
    %cst_24 = arith.constant 0.000000e+00 : f32
    %24 = vector.broadcast %cst_24 : f32 to vector<48x76xf32>
    %25 = arith.maximumf %23, %24 : vector<48x76xf32>
    %c0_25 = arith.constant 0 : index
    %c0_26 = arith.constant 0 : index
    %c0_27 = arith.constant 0 : index
    %26 = vector.load %arg4[%c0_25, %c0_26, %c0_27] : memref<3x76x37xf32, #tpu.memory_space<vmem>>, vector<1x76x37xf32>
    %27 = vector.shape_cast %26 : vector<1x76x37xf32> to vector<76x37xf32>
    %cst_28 = arith.constant dense<0.000000e+00> : vector<48x37xf32>
    %28 = tpu.matmul %25, %27, %cst_28 {dimension_numbers = #tpu.dot_dimension_numbers<[1], [0], [0], [1], [0, 0, 1, 1], [], []>} : vector<48x76xf32>, vector<76x37xf32>, vector<48x37xf32> -> vector<48x37xf32>
    %c0_29 = arith.constant 0 : index
    %c0_30 = arith.constant 0 : index
    %c0_31 = arith.constant 0 : index
    %29 = vector.load %arg5[%c0_29, %c0_30, %c0_31] : memref<3x96x48xf32, #tpu.memory_space<vmem>>, vector<1x96x48xf32>
    %30 = vector.shape_cast %29 : vector<1x96x48xf32> to vector<96x48xf32>
    %cst_32 = arith.constant dense<0.000000e+00> : vector<96x37xf32>
    %31 = tpu.matmul %30, %28, %cst_32 {dimension_numbers = #tpu.dot_dimension_numbers<[1], [0], [0], [1], [0, 0, 1, 1], [], []>} : vector<96x48xf32>, vector<48x37xf32>, vector<96x37xf32> -> vector<96x37xf32>
    %c1_33 = arith.constant 1 : index
    %c0_34 = arith.constant 0 : index
    %c0_35 = arith.constant 0 : index
    %32 = vector.load %arg4[%c1_33, %c0_34, %c0_35] : memref<3x76x37xf32, #tpu.memory_space<vmem>>, vector<1x76x37xf32>
    %33 = vector.shape_cast %32 : vector<1x76x37xf32> to vector<76x37xf32>
    %cst_36 = arith.constant dense<0.000000e+00> : vector<48x37xf32>
    %34 = tpu.matmul %25, %33, %cst_36 {dimension_numbers = #tpu.dot_dimension_numbers<[1], [0], [0], [1], [0, 0, 1, 1], [], []>} : vector<48x76xf32>, vector<76x37xf32>, vector<48x37xf32> -> vector<48x37xf32>
    %c1_37 = arith.constant 1 : index
    %c0_38 = arith.constant 0 : index
    %c0_39 = arith.constant 0 : index
    %35 = vector.load %arg5[%c1_37, %c0_38, %c0_39] : memref<3x96x48xf32, #tpu.memory_space<vmem>>, vector<1x96x48xf32>
    %36 = vector.shape_cast %35 : vector<1x96x48xf32> to vector<96x48xf32>
    %cst_40 = arith.constant dense<0.000000e+00> : vector<96x37xf32>
    %37 = tpu.matmul %36, %34, %cst_40 {dimension_numbers = #tpu.dot_dimension_numbers<[1], [0], [0], [1], [0, 0, 1, 1], [], []>} : vector<96x48xf32>, vector<48x37xf32>, vector<96x37xf32> -> vector<96x37xf32>
    %38 = arith.addf %31, %37 : vector<96x37xf32>
    %c2_41 = arith.constant 2 : index
    %c0_42 = arith.constant 0 : index
    %c0_43 = arith.constant 0 : index
    %39 = vector.load %arg4[%c2_41, %c0_42, %c0_43] : memref<3x76x37xf32, #tpu.memory_space<vmem>>, vector<1x76x37xf32>
    %40 = vector.shape_cast %39 : vector<1x76x37xf32> to vector<76x37xf32>
    %cst_44 = arith.constant dense<0.000000e+00> : vector<48x37xf32>
    %41 = tpu.matmul %25, %40, %cst_44 {dimension_numbers = #tpu.dot_dimension_numbers<[1], [0], [0], [1], [0, 0, 1, 1], [], []>} : vector<48x76xf32>, vector<76x37xf32>, vector<48x37xf32> -> vector<48x37xf32>
    %c2_45 = arith.constant 2 : index
    %c0_46 = arith.constant 0 : index
    %c0_47 = arith.constant 0 : index
    %42 = vector.load %arg5[%c2_45, %c0_46, %c0_47] : memref<3x96x48xf32, #tpu.memory_space<vmem>>, vector<1x96x48xf32>
    %43 = vector.shape_cast %42 : vector<1x96x48xf32> to vector<96x48xf32>
    %cst_48 = arith.constant dense<0.000000e+00> : vector<96x37xf32>
    %44 = tpu.matmul %43, %41, %cst_48 {dimension_numbers = #tpu.dot_dimension_numbers<[1], [0], [0], [1], [0, 0, 1, 1], [], []>} : vector<96x48xf32>, vector<48x37xf32>, vector<96x37xf32> -> vector<96x37xf32>
    %45 = arith.addf %38, %44 : vector<96x37xf32>
    %c0_49 = arith.constant 0 : index
    %c0_50 = arith.constant 0 : index
    %46 = vector.load %arg6[%c0_49, %c0_50] : memref<96x1xf32, #tpu.memory_space<vmem>>, vector<96x1xf32>
    %47 = vector.broadcast %46 : vector<96x1xf32> to vector<96x37xf32>
    %48 = arith.addf %45, %47 : vector<96x37xf32>
    %cst_51 = arith.constant 0.000000e+00 : f32
    %49 = vector.broadcast %cst_51 : f32 to vector<96x37xf32>
    %50 = arith.maximumf %48, %49 : vector<96x37xf32>
    %c0_52 = arith.constant 0 : index
    %c0_53 = arith.constant 0 : index
    %c0_54 = arith.constant 0 : index
    %51 = vector.load %arg7[%c0_52, %c0_53, %c0_54] : memref<3x37x18xf32, #tpu.memory_space<vmem>>, vector<1x37x18xf32>
    %52 = vector.shape_cast %51 : vector<1x37x18xf32> to vector<37x18xf32>
    %cst_55 = arith.constant dense<0.000000e+00> : vector<96x18xf32>
    %53 = tpu.matmul %50, %52, %cst_55 {dimension_numbers = #tpu.dot_dimension_numbers<[1], [0], [0], [1], [0, 0, 1, 1], [], []>} : vector<96x37xf32>, vector<37x18xf32>, vector<96x18xf32> -> vector<96x18xf32>
    %c0_56 = arith.constant 0 : index
    %c0_57 = arith.constant 0 : index
    %c0_58 = arith.constant 0 : index
    %54 = vector.load %arg8[%c0_56, %c0_57, %c0_58] : memref<3x192x96xf32, #tpu.memory_space<vmem>>, vector<1x192x96xf32>
    %55 = vector.shape_cast %54 : vector<1x192x96xf32> to vector<192x96xf32>
    %cst_59 = arith.constant dense<0.000000e+00> : vector<192x18xf32>
    %56 = tpu.matmul %55, %53, %cst_59 {dimension_numbers = #tpu.dot_dimension_numbers<[1], [0], [0], [1], [0, 0, 1, 1], [], []>} : vector<192x96xf32>, vector<96x18xf32>, vector<192x18xf32> -> vector<192x18xf32>
    %c1_60 = arith.constant 1 : index
    %c0_61 = arith.constant 0 : index
    %c0_62 = arith.constant 0 : index
    %57 = vector.load %arg7[%c1_60, %c0_61, %c0_62] : memref<3x37x18xf32, #tpu.memory_space<vmem>>, vector<1x37x18xf32>
    %58 = vector.shape_cast %57 : vector<1x37x18xf32> to vector<37x18xf32>
    %cst_63 = arith.constant dense<0.000000e+00> : vector<96x18xf32>
    %59 = tpu.matmul %50, %58, %cst_63 {dimension_numbers = #tpu.dot_dimension_numbers<[1], [0], [0], [1], [0, 0, 1, 1], [], []>} : vector<96x37xf32>, vector<37x18xf32>, vector<96x18xf32> -> vector<96x18xf32>
    %c1_64 = arith.constant 1 : index
    %c0_65 = arith.constant 0 : index
    %c0_66 = arith.constant 0 : index
    %60 = vector.load %arg8[%c1_64, %c0_65, %c0_66] : memref<3x192x96xf32, #tpu.memory_space<vmem>>, vector<1x192x96xf32>
    %61 = vector.shape_cast %60 : vector<1x192x96xf32> to vector<192x96xf32>
    %cst_67 = arith.constant dense<0.000000e+00> : vector<192x18xf32>
    %62 = tpu.matmul %61, %59, %cst_67 {dimension_numbers = #tpu.dot_dimension_numbers<[1], [0], [0], [1], [0, 0, 1, 1], [], []>} : vector<192x96xf32>, vector<96x18xf32>, vector<192x18xf32> -> vector<192x18xf32>
    %63 = arith.addf %56, %62 : vector<192x18xf32>
    %c2_68 = arith.constant 2 : index
    %c0_69 = arith.constant 0 : index
    %c0_70 = arith.constant 0 : index
    %64 = vector.load %arg7[%c2_68, %c0_69, %c0_70] : memref<3x37x18xf32, #tpu.memory_space<vmem>>, vector<1x37x18xf32>
    %65 = vector.shape_cast %64 : vector<1x37x18xf32> to vector<37x18xf32>
    %cst_71 = arith.constant dense<0.000000e+00> : vector<96x18xf32>
    %66 = tpu.matmul %50, %65, %cst_71 {dimension_numbers = #tpu.dot_dimension_numbers<[1], [0], [0], [1], [0, 0, 1, 1], [], []>} : vector<96x37xf32>, vector<37x18xf32>, vector<96x18xf32> -> vector<96x18xf32>
    %c2_72 = arith.constant 2 : index
    %c0_73 = arith.constant 0 : index
    %c0_74 = arith.constant 0 : index
    %67 = vector.load %arg8[%c2_72, %c0_73, %c0_74] : memref<3x192x96xf32, #tpu.memory_space<vmem>>, vector<1x192x96xf32>
    %68 = vector.shape_cast %67 : vector<1x192x96xf32> to vector<192x96xf32>
    %cst_75 = arith.constant dense<0.000000e+00> : vector<192x18xf32>
    %69 = tpu.matmul %68, %66, %cst_75 {dimension_numbers = #tpu.dot_dimension_numbers<[1], [0], [0], [1], [0, 0, 1, 1], [], []>} : vector<192x96xf32>, vector<96x18xf32>, vector<192x18xf32> -> vector<192x18xf32>
    %70 = arith.addf %63, %69 : vector<192x18xf32>
    %c0_76 = arith.constant 0 : index
    %c0_77 = arith.constant 0 : index
    %71 = vector.load %arg9[%c0_76, %c0_77] : memref<192x1xf32, #tpu.memory_space<vmem>>, vector<192x1xf32>
    %72 = vector.broadcast %71 : vector<192x1xf32> to vector<192x18xf32>
    %73 = arith.addf %70, %72 : vector<192x18xf32>
    %cst_78 = arith.constant 0.000000e+00 : f32
    %74 = vector.broadcast %cst_78 : f32 to vector<192x18xf32>
    %75 = arith.maximumf %73, %74 : vector<192x18xf32>
    %c0_79 = arith.constant 0 : index
    %c0_80 = arith.constant 0 : index
    %76 = vector.load %arg10[%c0_79, %c0_80] : memref<192x18xf32, #tpu.memory_space<vmem>>, vector<192x18xf32>
    tpu.vector_store %arg10[%c0_79, %c0_80], %75 {strides = array<i32>} : memref<192x18xf32, #tpu.memory_space<vmem>>, vector<192x18xf32>,
    return
  }
}

module attributes {stable_mosaic.version = 11 : i64} {
  func.func @_mlp_kernel(%arg0: memref<2x1728xf32, #tpu.memory_space<vmem>>, %arg1: memref<1728x64xf32, #tpu.memory_space<vmem>>, %arg2: memref<1x64xf32, #tpu.memory_space<vmem>>, %arg3: memref<64x16xf32, #tpu.memory_space<vmem>>, %arg4: memref<1x16xf32, #tpu.memory_space<vmem>>, %arg5: memref<16x64xf32, #tpu.memory_space<vmem>>, %arg6: memref<1x64xf32, #tpu.memory_space<vmem>>, %arg7: memref<64x1728xf32, #tpu.memory_space<vmem>>, %arg8: memref<1x1728xf32, #tpu.memory_space<vmem>>, %arg9: memref<2x1728xf32, #tpu.memory_space<vmem>>) attributes {dimension_semantics = [], scalar_prefetch = 0 : i64, scratch_operands = 0 : i64, tpu.core_type = #tpu.core_type<tc>} {
    %c0 = arith.constant 0 : index
    %c0_0 = arith.constant 0 : index
    %0 = vector.load %arg0[%c0, %c0_0] : memref<2x1728xf32, #tpu.memory_space<vmem>>, vector<2x1728xf32>
    %c0_1 = arith.constant 0 : index
    %c0_2 = arith.constant 0 : index
    %1 = vector.load %arg1[%c0_1, %c0_2] : memref<1728x64xf32, #tpu.memory_space<vmem>>, vector<1728x64xf32>
    %cst = arith.constant dense<0.000000e+00> : vector<2x64xf32>
    %2 = tpu.matmul %0, %1, %cst {dimension_numbers = #tpu.dot_dimension_numbers<[1], [0], [0], [1], [0, 0, 1, 1], [], []>} : vector<2x1728xf32>, vector<1728x64xf32>, vector<2x64xf32> -> vector<2x64xf32>
    %c0_3 = arith.constant 0 : index
    %c0_4 = arith.constant 0 : index
    %3 = vector.load %arg2[%c0_3, %c0_4] : memref<1x64xf32, #tpu.memory_space<vmem>>, vector<1x64xf32>
    %4 = vector.broadcast %3 : vector<1x64xf32> to vector<2x64xf32>
    %5 = arith.addf %2, %4 : vector<2x64xf32>
    %cst_5 = arith.constant 0.000000e+00 : f32
    %6 = vector.broadcast %cst_5 : f32 to vector<2x64xf32>
    %7 = arith.maximumf %5, %6 : vector<2x64xf32>
    %c0_6 = arith.constant 0 : index
    %c0_7 = arith.constant 0 : index
    %8 = vector.load %arg3[%c0_6, %c0_7] : memref<64x16xf32, #tpu.memory_space<vmem>>, vector<64x16xf32>
    %cst_8 = arith.constant dense<0.000000e+00> : vector<2x16xf32>
    %9 = tpu.matmul %7, %8, %cst_8 {dimension_numbers = #tpu.dot_dimension_numbers<[1], [0], [0], [1], [0, 0, 1, 1], [], []>} : vector<2x64xf32>, vector<64x16xf32>, vector<2x16xf32> -> vector<2x16xf32>
    %c0_9 = arith.constant 0 : index
    %c0_10 = arith.constant 0 : index
    %10 = vector.load %arg4[%c0_9, %c0_10] : memref<1x16xf32, #tpu.memory_space<vmem>>, vector<1x16xf32>
    %11 = vector.broadcast %10 : vector<1x16xf32> to vector<2x16xf32>
    %12 = arith.addf %9, %11 : vector<2x16xf32>
    %c0_11 = arith.constant 0 : index
    %c0_12 = arith.constant 0 : index
    %13 = vector.load %arg5[%c0_11, %c0_12] : memref<16x64xf32, #tpu.memory_space<vmem>>, vector<16x64xf32>
    %cst_13 = arith.constant dense<0.000000e+00> : vector<2x64xf32>
    %14 = tpu.matmul %12, %13, %cst_13 {dimension_numbers = #tpu.dot_dimension_numbers<[1], [0], [0], [1], [0, 0, 1, 1], [], []>} : vector<2x16xf32>, vector<16x64xf32>, vector<2x64xf32> -> vector<2x64xf32>
    %c0_14 = arith.constant 0 : index
    %c0_15 = arith.constant 0 : index
    %15 = vector.load %arg6[%c0_14, %c0_15] : memref<1x64xf32, #tpu.memory_space<vmem>>, vector<1x64xf32>
    %16 = vector.broadcast %15 : vector<1x64xf32> to vector<2x64xf32>
    %17 = arith.addf %14, %16 : vector<2x64xf32>
    %cst_16 = arith.constant 0.000000e+00 : f32
    %18 = vector.broadcast %cst_16 : f32 to vector<2x64xf32>
    %19 = arith.maximumf %17, %18 : vector<2x64xf32>
    %c0_17 = arith.constant 0 : index
    %c0_18 = arith.constant 0 : index
    %20 = vector.load %arg7[%c0_17, %c0_18] : memref<64x1728xf32, #tpu.memory_space<vmem>>, vector<64x1728xf32>
    %cst_19 = arith.constant dense<0.000000e+00> : vector<2x1728xf32>
    %21 = tpu.matmul %19, %20, %cst_19 {dimension_numbers = #tpu.dot_dimension_numbers<[1], [0], [0], [1], [0, 0, 1, 1], [], []>} : vector<2x64xf32>, vector<64x1728xf32>, vector<2x1728xf32> -> vector<2x1728xf32>
    %c0_20 = arith.constant 0 : index
    %c0_21 = arith.constant 0 : index
    %22 = vector.load %arg8[%c0_20, %c0_21] : memref<1x1728xf32, #tpu.memory_space<vmem>>, vector<1x1728xf32>
    %23 = vector.broadcast %22 : vector<1x1728xf32> to vector<2x1728xf32>
    %24 = arith.addf %21, %23 : vector<2x1728xf32>
    %cst_22 = arith.constant 0.000000e+00 : f32
    %25 = vector.broadcast %cst_22 : f32 to vector<2x1728xf32>
    %26 = arith.maximumf %24, %25 : vector<2x1728xf32>
    %c0_23 = arith.constant 0 : index
    %c0_24 = arith.constant 0 : index
    %27 = vector.load %arg9[%c0_23, %c0_24] : memref<2x1728xf32, #tpu.memory_space<vmem>>, vector<2x1728xf32>
    tpu.vector_store %arg9[%c0_23, %c0_24], %26 {strides = array<i32>} : memref<2x1728xf32, #tpu.memory_space<vmem>>, vector<2x1728xf32>,
    return
  }
}

module attributes {stable_mosaic.version = 11 : i64} {
  func.func @_decoder_conv_kernel(%arg0: memref<192x18xf32, #tpu.memory_space<vmem>>, %arg1: memref<3x96x192xf32, #tpu.memory_space<vmem>>, %arg2: memref<3x18x37xf32, #tpu.memory_space<vmem>>, %arg3: memref<96x1xf32, #tpu.memory_space<vmem>>, %arg4: memref<3x48x96xf32, #tpu.memory_space<vmem>>, %arg5: memref<3x37x75xf32, #tpu.memory_space<vmem>>, %arg6: memref<48x1xf32, #tpu.memory_space<vmem>>, %arg7: memref<3x6x48xf32, #tpu.memory_space<vmem>>, %arg8: memref<3x75x151xf32, #tpu.memory_space<vmem>>, %arg9: memref<6x1xf32, #tpu.memory_space<vmem>>, %arg10: memref<6x151xf32, #tpu.memory_space<vmem>>) attributes {dimension_semantics = [], scalar_prefetch = 0 : i64, scratch_operands = 0 : i64, tpu.core_type = #tpu.core_type<tc>} {
    %c0 = arith.constant 0 : index
    %c0_0 = arith.constant 0 : index
    %0 = vector.load %arg0[%c0, %c0_0] : memref<192x18xf32, #tpu.memory_space<vmem>>, vector<192x18xf32>
    %c0_1 = arith.constant 0 : index
    %c0_2 = arith.constant 0 : index
    %c0_3 = arith.constant 0 : index
    %1 = vector.load %arg1[%c0_1, %c0_2, %c0_3] : memref<3x96x192xf32, #tpu.memory_space<vmem>>, vector<1x96x192xf32>
    %2 = vector.shape_cast %1 : vector<1x96x192xf32> to vector<96x192xf32>
    %cst = arith.constant dense<0.000000e+00> : vector<96x18xf32>
    %3 = tpu.matmul %2, %0, %cst {dimension_numbers = #tpu.dot_dimension_numbers<[1], [0], [0], [1], [0, 0, 1, 1], [], []>} : vector<96x192xf32>, vector<192x18xf32>, vector<96x18xf32> -> vector<96x18xf32>
    %c0_4 = arith.constant 0 : index
    %c0_5 = arith.constant 0 : index
    %c0_6 = arith.constant 0 : index
    %4 = vector.load %arg2[%c0_4, %c0_5, %c0_6] : memref<3x18x37xf32, #tpu.memory_space<vmem>>, vector<1x18x37xf32>
    %5 = vector.shape_cast %4 : vector<1x18x37xf32> to vector<18x37xf32>
    %cst_7 = arith.constant dense<0.000000e+00> : vector<96x37xf32>
    %6 = tpu.matmul %3, %5, %cst_7 {dimension_numbers = #tpu.dot_dimension_numbers<[1], [0], [0], [1], [0, 0, 1, 1], [], []>} : vector<96x18xf32>, vector<18x37xf32>, vector<96x37xf32> -> vector<96x37xf32>
    %c1 = arith.constant 1 : index
    %c0_8 = arith.constant 0 : index
    %c0_9 = arith.constant 0 : index
    %7 = vector.load %arg1[%c1, %c0_8, %c0_9] : memref<3x96x192xf32, #tpu.memory_space<vmem>>, vector<1x96x192xf32>
    %8 = vector.shape_cast %7 : vector<1x96x192xf32> to vector<96x192xf32>
    %cst_10 = arith.constant dense<0.000000e+00> : vector<96x18xf32>
    %9 = tpu.matmul %8, %0, %cst_10 {dimension_numbers = #tpu.dot_dimension_numbers<[1], [0], [0], [1], [0, 0, 1, 1], [], []>} : vector<96x192xf32>, vector<192x18xf32>, vector<96x18xf32> -> vector<96x18xf32>
    %c1_11 = arith.constant 1 : index
    %c0_12 = arith.constant 0 : index
    %c0_13 = arith.constant 0 : index
    %10 = vector.load %arg2[%c1_11, %c0_12, %c0_13] : memref<3x18x37xf32, #tpu.memory_space<vmem>>, vector<1x18x37xf32>
    %11 = vector.shape_cast %10 : vector<1x18x37xf32> to vector<18x37xf32>
    %cst_14 = arith.constant dense<0.000000e+00> : vector<96x37xf32>
    %12 = tpu.matmul %9, %11, %cst_14 {dimension_numbers = #tpu.dot_dimension_numbers<[1], [0], [0], [1], [0, 0, 1, 1], [], []>} : vector<96x18xf32>, vector<18x37xf32>, vector<96x37xf32> -> vector<96x37xf32>
    %13 = arith.addf %6, %12 : vector<96x37xf32>
    %c2 = arith.constant 2 : index
    %c0_15 = arith.constant 0 : index
    %c0_16 = arith.constant 0 : index
    %14 = vector.load %arg1[%c2, %c0_15, %c0_16] : memref<3x96x192xf32, #tpu.memory_space<vmem>>, vector<1x96x192xf32>
    %15 = vector.shape_cast %14 : vector<1x96x192xf32> to vector<96x192xf32>
    %cst_17 = arith.constant dense<0.000000e+00> : vector<96x18xf32>
    %16 = tpu.matmul %15, %0, %cst_17 {dimension_numbers = #tpu.dot_dimension_numbers<[1], [0], [0], [1], [0, 0, 1, 1], [], []>} : vector<96x192xf32>, vector<192x18xf32>, vector<96x18xf32> -> vector<96x18xf32>
    %c2_18 = arith.constant 2 : index
    %c0_19 = arith.constant 0 : index
    %c0_20 = arith.constant 0 : index
    %17 = vector.load %arg2[%c2_18, %c0_19, %c0_20] : memref<3x18x37xf32, #tpu.memory_space<vmem>>, vector<1x18x37xf32>
    %18 = vector.shape_cast %17 : vector<1x18x37xf32> to vector<18x37xf32>
    %cst_21 = arith.constant dense<0.000000e+00> : vector<96x37xf32>
    %19 = tpu.matmul %16, %18, %cst_21 {dimension_numbers = #tpu.dot_dimension_numbers<[1], [0], [0], [1], [0, 0, 1, 1], [], []>} : vector<96x18xf32>, vector<18x37xf32>, vector<96x37xf32> -> vector<96x37xf32>
    %20 = arith.addf %13, %19 : vector<96x37xf32>
    %c0_22 = arith.constant 0 : index
    %c0_23 = arith.constant 0 : index
    %21 = vector.load %arg3[%c0_22, %c0_23] : memref<96x1xf32, #tpu.memory_space<vmem>>, vector<96x1xf32>
    %22 = vector.broadcast %21 : vector<96x1xf32> to vector<96x37xf32>
    %23 = arith.addf %20, %22 : vector<96x37xf32>
    %cst_24 = arith.constant 0.000000e+00 : f32
    %24 = vector.broadcast %cst_24 : f32 to vector<96x37xf32>
    %25 = arith.maximumf %23, %24 : vector<96x37xf32>
    %c0_25 = arith.constant 0 : index
    %c0_26 = arith.constant 0 : index
    %c0_27 = arith.constant 0 : index
    %26 = vector.load %arg4[%c0_25, %c0_26, %c0_27] : memref<3x48x96xf32, #tpu.memory_space<vmem>>, vector<1x48x96xf32>
    %27 = vector.shape_cast %26 : vector<1x48x96xf32> to vector<48x96xf32>
    %cst_28 = arith.constant dense<0.000000e+00> : vector<48x37xf32>
    %28 = tpu.matmul %27, %25, %cst_28 {dimension_numbers = #tpu.dot_dimension_numbers<[1], [0], [0], [1], [0, 0, 1, 1], [], []>} : vector<48x96xf32>, vector<96x37xf32>, vector<48x37xf32> -> vector<48x37xf32>
    %c0_29 = arith.constant 0 : index
    %c0_30 = arith.constant 0 : index
    %c0_31 = arith.constant 0 : index
    %29 = vector.load %arg5[%c0_29, %c0_30, %c0_31] : memref<3x37x75xf32, #tpu.memory_space<vmem>>, vector<1x37x75xf32>
    %30 = vector.shape_cast %29 : vector<1x37x75xf32> to vector<37x75xf32>
    %cst_32 = arith.constant dense<0.000000e+00> : vector<48x75xf32>
    %31 = tpu.matmul %28, %30, %cst_32 {dimension_numbers = #tpu.dot_dimension_numbers<[1], [0], [0], [1], [0, 0, 1, 1], [], []>} : vector<48x37xf32>, vector<37x75xf32>, vector<48x75xf32> -> vector<48x75xf32>
    %c1_33 = arith.constant 1 : index
    %c0_34 = arith.constant 0 : index
    %c0_35 = arith.constant 0 : index
    %32 = vector.load %arg4[%c1_33, %c0_34, %c0_35] : memref<3x48x96xf32, #tpu.memory_space<vmem>>, vector<1x48x96xf32>
    %33 = vector.shape_cast %32 : vector<1x48x96xf32> to vector<48x96xf32>
    %cst_36 = arith.constant dense<0.000000e+00> : vector<48x37xf32>
    %34 = tpu.matmul %33, %25, %cst_36 {dimension_numbers = #tpu.dot_dimension_numbers<[1], [0], [0], [1], [0, 0, 1, 1], [], []>} : vector<48x96xf32>, vector<96x37xf32>, vector<48x37xf32> -> vector<48x37xf32>
    %c1_37 = arith.constant 1 : index
    %c0_38 = arith.constant 0 : index
    %c0_39 = arith.constant 0 : index
    %35 = vector.load %arg5[%c1_37, %c0_38, %c0_39] : memref<3x37x75xf32, #tpu.memory_space<vmem>>, vector<1x37x75xf32>
    %36 = vector.shape_cast %35 : vector<1x37x75xf32> to vector<37x75xf32>
    %cst_40 = arith.constant dense<0.000000e+00> : vector<48x75xf32>
    %37 = tpu.matmul %34, %36, %cst_40 {dimension_numbers = #tpu.dot_dimension_numbers<[1], [0], [0], [1], [0, 0, 1, 1], [], []>} : vector<48x37xf32>, vector<37x75xf32>, vector<48x75xf32> -> vector<48x75xf32>
    %38 = arith.addf %31, %37 : vector<48x75xf32>
    %c2_41 = arith.constant 2 : index
    %c0_42 = arith.constant 0 : index
    %c0_43 = arith.constant 0 : index
    %39 = vector.load %arg4[%c2_41, %c0_42, %c0_43] : memref<3x48x96xf32, #tpu.memory_space<vmem>>, vector<1x48x96xf32>
    %40 = vector.shape_cast %39 : vector<1x48x96xf32> to vector<48x96xf32>
    %cst_44 = arith.constant dense<0.000000e+00> : vector<48x37xf32>
    %41 = tpu.matmul %40, %25, %cst_44 {dimension_numbers = #tpu.dot_dimension_numbers<[1], [0], [0], [1], [0, 0, 1, 1], [], []>} : vector<48x96xf32>, vector<96x37xf32>, vector<48x37xf32> -> vector<48x37xf32>
    %c2_45 = arith.constant 2 : index
    %c0_46 = arith.constant 0 : index
    %c0_47 = arith.constant 0 : index
    %42 = vector.load %arg5[%c2_45, %c0_46, %c0_47] : memref<3x37x75xf32, #tpu.memory_space<vmem>>, vector<1x37x75xf32>
    %43 = vector.shape_cast %42 : vector<1x37x75xf32> to vector<37x75xf32>
    %cst_48 = arith.constant dense<0.000000e+00> : vector<48x75xf32>
    %44 = tpu.matmul %41, %43, %cst_48 {dimension_numbers = #tpu.dot_dimension_numbers<[1], [0], [0], [1], [0, 0, 1, 1], [], []>} : vector<48x37xf32>, vector<37x75xf32>, vector<48x75xf32> -> vector<48x75xf32>
    %45 = arith.addf %38, %44 : vector<48x75xf32>
    %c0_49 = arith.constant 0 : index
    %c0_50 = arith.constant 0 : index
    %46 = vector.load %arg6[%c0_49, %c0_50] : memref<48x1xf32, #tpu.memory_space<vmem>>, vector<48x1xf32>
    %47 = vector.broadcast %46 : vector<48x1xf32> to vector<48x75xf32>
    %48 = arith.addf %45, %47 : vector<48x75xf32>
    %cst_51 = arith.constant 0.000000e+00 : f32
    %49 = vector.broadcast %cst_51 : f32 to vector<48x75xf32>
    %50 = arith.maximumf %48, %49 : vector<48x75xf32>
    %c0_52 = arith.constant 0 : index
    %c0_53 = arith.constant 0 : index
    %c0_54 = arith.constant 0 : index
    %51 = vector.load %arg7[%c0_52, %c0_53, %c0_54] : memref<3x6x48xf32, #tpu.memory_space<vmem>>, vector<1x6x48xf32>
    %52 = vector.shape_cast %51 : vector<1x6x48xf32> to vector<6x48xf32>
    %cst_55 = arith.constant dense<0.000000e+00> : vector<6x75xf32>
    %53 = tpu.matmul %52, %50, %cst_55 {dimension_numbers = #tpu.dot_dimension_numbers<[1], [0], [0], [1], [0, 0, 1, 1], [], []>} : vector<6x48xf32>, vector<48x75xf32>, vector<6x75xf32> -> vector<6x75xf32>
    %c0_56 = arith.constant 0 : index
    %c0_57 = arith.constant 0 : index
    %c0_58 = arith.constant 0 : index
    %54 = vector.load %arg8[%c0_56, %c0_57, %c0_58] : memref<3x75x151xf32, #tpu.memory_space<vmem>>, vector<1x75x151xf32>
    %55 = vector.shape_cast %54 : vector<1x75x151xf32> to vector<75x151xf32>
    %cst_59 = arith.constant dense<0.000000e+00> : vector<6x151xf32>
    %56 = tpu.matmul %53, %55, %cst_59 {dimension_numbers = #tpu.dot_dimension_numbers<[1], [0], [0], [1], [0, 0, 1, 1], [], []>} : vector<6x75xf32>, vector<75x151xf32>, vector<6x151xf32> -> vector<6x151xf32>
    %c1_60 = arith.constant 1 : index
    %c0_61 = arith.constant 0 : index
    %c0_62 = arith.constant 0 : index
    %57 = vector.load %arg7[%c1_60, %c0_61, %c0_62] : memref<3x6x48xf32, #tpu.memory_space<vmem>>, vector<1x6x48xf32>
    %58 = vector.shape_cast %57 : vector<1x6x48xf32> to vector<6x48xf32>
    %cst_63 = arith.constant dense<0.000000e+00> : vector<6x75xf32>
    %59 = tpu.matmul %58, %50, %cst_63 {dimension_numbers = #tpu.dot_dimension_numbers<[1], [0], [0], [1], [0, 0, 1, 1], [], []>} : vector<6x48xf32>, vector<48x75xf32>, vector<6x75xf32> -> vector<6x75xf32>
    %c1_64 = arith.constant 1 : index
    %c0_65 = arith.constant 0 : index
    %c0_66 = arith.constant 0 : index
    %60 = vector.load %arg8[%c1_64, %c0_65, %c0_66] : memref<3x75x151xf32, #tpu.memory_space<vmem>>, vector<1x75x151xf32>
    %61 = vector.shape_cast %60 : vector<1x75x151xf32> to vector<75x151xf32>
    %cst_67 = arith.constant dense<0.000000e+00> : vector<6x151xf32>
    %62 = tpu.matmul %59, %61, %cst_67 {dimension_numbers = #tpu.dot_dimension_numbers<[1], [0], [0], [1], [0, 0, 1, 1], [], []>} : vector<6x75xf32>, vector<75x151xf32>, vector<6x151xf32> -> vector<6x151xf32>
    %63 = arith.addf %56, %62 : vector<6x151xf32>
    %c2_68 = arith.constant 2 : index
    %c0_69 = arith.constant 0 : index
    %c0_70 = arith.constant 0 : index
    %64 = vector.load %arg7[%c2_68, %c0_69, %c0_70] : memref<3x6x48xf32, #tpu.memory_space<vmem>>, vector<1x6x48xf32>
    %65 = vector.shape_cast %64 : vector<1x6x48xf32> to vector<6x48xf32>
    %cst_71 = arith.constant dense<0.000000e+00> : vector<6x75xf32>
    %66 = tpu.matmul %65, %50, %cst_71 {dimension_numbers = #tpu.dot_dimension_numbers<[1], [0], [0], [1], [0, 0, 1, 1], [], []>} : vector<6x48xf32>, vector<48x75xf32>, vector<6x75xf32> -> vector<6x75xf32>
    %c2_72 = arith.constant 2 : index
    %c0_73 = arith.constant 0 : index
    %c0_74 = arith.constant 0 : index
    %67 = vector.load %arg8[%c2_72, %c0_73, %c0_74] : memref<3x75x151xf32, #tpu.memory_space<vmem>>, vector<1x75x151xf32>
    %68 = vector.shape_cast %67 : vector<1x75x151xf32> to vector<75x151xf32>
    %cst_75 = arith.constant dense<0.000000e+00> : vector<6x151xf32>
    %69 = tpu.matmul %66, %68, %cst_75 {dimension_numbers = #tpu.dot_dimension_numbers<[1], [0], [0], [1], [0, 0, 1, 1], [], []>} : vector<6x75xf32>, vector<75x151xf32>, vector<6x151xf32> -> vector<6x151xf32>
    %70 = arith.addf %63, %69 : vector<6x151xf32>
    %c0_76 = arith.constant 0 : index
    %c0_77 = arith.constant 0 : index
    %71 = vector.load %arg9[%c0_76, %c0_77] : memref<6x1xf32, #tpu.memory_space<vmem>>, vector<6x1xf32>
    %72 = vector.broadcast %71 : vector<6x1xf32> to vector<6x151xf32>
    %73 = arith.addf %70, %72 : vector<6x151xf32>
    %c0_78 = arith.constant 0 : index
    %c0_79 = arith.constant 0 : index
    %74 = vector.load %arg10[%c0_78, %c0_79] : memref<6x151xf32, #tpu.memory_space<vmem>>, vector<6x151xf32>
    tpu.vector_store %arg10[%c0_78, %c0_79], %73 {strides = array<i32>} : memref<6x151xf32, #tpu.memory_space<vmem>>, vector<6x151xf32>,
    return
  }
}

</mosaic_0001>

<bundles_post_ra>
// kernel: ae_forward.4
= control target key start
LH: loop header
LB: loop body
LE: loop exit
PB: predicated region body
PF: predicated region fallthrough
CT: control target
= control target key end

     0   :  { %v2057_v27 = vmov 1983009808   ;;  %v267_v29 = vlaneseq  ;;  %vm335_vm0 = vcmask 523264   ;;  %vm2059_vm1 = vmmov 0   ;;  %s3273_s1 = inlined_call_operand.vmem [shape: f32[1728,64], index: 1, kind: input, shape index: {}]   ;;  %s3274_s0 = inlined_call_operand.vmem [shape: f32[2,1728], index: 0, kind: input, shape index: {}]   ;;  %s3275_s3 = inlined_call_operand.vmem [shape: f32[64,16], index: 3, kind: input, shape index: {}]   ;;  %s3276_s2 = inlined_call_operand.vmem [shape: f32[1,64], index: 2, kind: input, shape index: {}]   ;;  %s3277_s5 = inlined_call_operand.vmem [shape: f32[16,64], index: 5, kind: input, shape index: {}]   ;;  %s3278_s7 = inlined_call_operand.vmem [shape: f32[64,1728], index: 7, kind: input, shape index: {}]   ;;  %s3279_s4 = inlined_call_operand.vmem [shape: f32[1,16], index: 4, kind: input, shape index: {}]   ;;  %s3280_s6 = inlined_call_operand.vmem [shape: f32[1,64], index: 6, kind: input, shape index: {}]   ;;  %s3281_s8 = inlined_call_operand.vmem [shape: f32[1,1728], index: 8, kind: input, shape index: {}]   ;;  %s3282_s9 = inlined_call_operand.vmem [shape: f32[2,1728], index: 9, kind: output, shape index: {}]  }
   0x1   :  { %v67_v0 = vld [vmem:[%s3273_s1 + $0xf8] sm:$0xff]  ;;  %v66_v2 = vld [vmem:[%s3273_s1 + $0xf0] sm:$0xff]  ;;  %v65_v6 = vld [vmem:[%s3273_s1 + $0xe8] sm:$0xff]  ;;  %v265_v28 = vunpack.c.l.s4 %v2057_v27  ;;  %vm926_vm2 = vcmask 130048   ;;  %vm1781_vm3 = vcmask 1041408   ;;  %vm1782_vm4 = vcmask 519170  }
   0x2   :  { %v51_v1 = vld [vmem:[%s3273_s1 + $0x78] sm:$0xff]  ;;  %1803 = vmatprep.subr.mxu0 %v67_v0  ;;  %v50_v4 = vld [vmem:[%s3273_s1 + $0x70] sm:$0xff]  ;;  %v49_v8 = vld [vmem:[%s3273_s1 + $0x68] sm:$0xff]  ;;  %v2215_v39 = vshrl.u32 %v267_v29, 7 }
   0x3   :  { %v99_v3 = vld [vmem:[%s3273_s1 + $0x1f8] sm:$0xff]  ;;  %1804 = vmatpush3.msra.mxu0 %v51_v1  ;;  %v98_v7 = vld [vmem:[%s3273_s1 + $0x1f0] sm:$0xff]  ;;  %v97_v10 = vld [vmem:[%s3273_s1 + $0x1e8] sm:$0xff]  ;;  %v266_v38 = vunpack.c.0.s8 %v265_v28 }
   0x4   :  { %v83_v5 = vld [vmem:[%s3273_s1 + $0x178] sm:$0xff]  ;;  %1838 = vmatprep.subr.mxu1 %v99_v3  ;;  %1805 = vmatprep.subr.mxu0 %v66_v2  ;;  %v82_v9 = vld [vmem:[%s3273_s1 + $0x170] sm:$0xff]  ;;  %v64_v11 = vld [vmem:[%s3273_s1 + $0xe0] sm:$0xff] }
   0x5   :  { %1839 = vmatpush3.msra.mxu1 %v83_v5  ;;  %1806 = vmatpush3.msra.mxu0 %v50_v4  ;;  %v81_v12 = vld [vmem:[%s3273_s1 + $0x168] sm:$0xff]  ;;  %v48_v13 = vld [vmem:[%s3273_s1 + $0x60] sm:$0xff]  ;;  %v63_v15 = vld [vmem:[%s3273_s1 + $0xd8] sm:$0xff]  ;;  %v2242_v48 = vsub.s32 %v266_v38, %v2215_v39 }
   0x6   :  { %1840 = vmatprep.subr.mxu1 %v98_v7  ;;  %1807 = vmatprep.subr.mxu0 %v65_v6  ;;  %v96_v14 = vld [vmem:[%s3273_s1 + $0x1e0] sm:$0xff]  ;;  %v47_v17 = vld [vmem:[%s3273_s1 + $0x58] sm:$0xff]  ;;  %v62_v19 = vld [vmem:[%s3273_s1 + $0xd0] sm:$0xff] }
   0x7   :  { %1841 = vmatpush3.msra.mxu1 %v82_v9  ;;  %1808 = vmatpush3.msra.mxu0 %v49_v8  ;;  %v80_v16 = vld [vmem:[%s3273_s1 + $0x160] sm:$0xff]  ;;  %v95_v18 = vld [vmem:[%s3273_s1 + $0x1d8] sm:$0xff]  ;;  %v46_v21 = vld [vmem:[%s3273_s1 + $0x50] sm:$0xff] }
   0x8   :  { %1842 = vmatprep.subr.mxu1 %v97_v10  ;;  %1809 = vmatprep.subr.mxu0 %v64_v11  ;;  %v79_v20 = vld [vmem:[%s3273_s1 + $0x158] sm:$0xff]  ;;  %v94_v22 = vld [vmem:[%s3273_s1 + $0x1d0] sm:$0xff]  ;;  %v61_v23 = vld [vmem:[%s3273_s1 + $0xc8] sm:$0xff] }
   0x9   :  { %1843 = vmatpush3.msra.mxu1 %v81_v12  ;;  %1810 = vmatpush3.msra.mxu0 %v48_v13  ;;  %v78_v24 = vld [vmem:[%s3273_s1 + $0x150] sm:$0xff]  ;;  %v45_v25 = vld [vmem:[%s3273_s1 + $0x48] sm:$0xff]  ;;  %v60_v30 = vld [vmem:[%s3273_s1 + $0xc0] sm:$0xff] }
   0xa   :  { %1844 = vmatprep.subr.mxu1 %v96_v14  ;;  %1811 = vmatprep.subr.mxu0 %v63_v15  ;;  %v93_v26 = vld [vmem:[%s3273_s1 + $0x1c8] sm:$0xff]  ;;  %v44_v32 = vld [vmem:[%s3273_s1 + $0x40] sm:$0xff]  ;;  %v59_v34 = vld [vmem:[%s3273_s1 + $0xb8] sm:$0xff] }
   0xb   :  { %1845 = vmatpush3.msra.mxu1 %v80_v16  ;;  %1812 = vmatpush3.msra.mxu0 %v47_v17  ;;  %v77_v31 = vld [vmem:[%s3273_s1 + $0x148] sm:$0xff]  ;;  %v92_v33 = vld [vmem:[%s3273_s1 + $0x1c0] sm:$0xff]  ;;  %v43_v36 = vld [vmem:[%s3273_s1 + $0x38] sm:$0xff] }
   0xc   :  { %1846 = vmatprep.subr.mxu1 %v95_v18  ;;  %1813 = vmatprep.subr.mxu0 %v62_v19  ;;  %v76_v35 = vld [vmem:[%s3273_s1 + $0x140] sm:$0xff]  ;;  %v91_v37 = vld [vmem:[%s3273_s1 + $0x1b8] sm:$0xff]  ;;  %v58_v40 = vld [vmem:[%s3273_s1 + $0xb0] sm:$0xff] }
   0xd   :  { %1847 = vmatpush3.msra.mxu1 %v79_v20  ;;  %1814 = vmatpush3.msra.mxu0 %v46_v21  ;;  %v75_v41 = vld [vmem:[%s3273_s1 + $0x138] sm:$0xff]  ;;  %v42_v42 = vld [vmem:[%s3273_s1 + $0x30] sm:$0xff]  ;;  %v57_v44 = vld [vmem:[%s3273_s1 + $0xa8] sm:$0xff] }
   0xe   :  { %1848 = vmatprep.subr.mxu1 %v94_v22  ;;  %1815 = vmatprep.subr.mxu0 %v61_v23  ;;  %v90_v43 = vld [vmem:[%s3273_s1 + $0x1b0] sm:$0xff]  ;;  %v41_v46 = vld [vmem:[%s3273_s1 + $0x28] sm:$0xff]  ;;  %v56_v49 = vld [vmem:[%s3273_s1 + $0xa0] sm:$0xff] }
   0xf   :  { %1849 = vmatpush3.msra.mxu1 %v78_v24  ;;  %1816 = vmatpush3.msra.mxu0 %v45_v25  ;;  %v74_v45 = vld [vmem:[%s3273_s1 + $0x130] sm:$0xff]  ;;  %v89_v47 = vld [vmem:[%s3273_s1 + $0x1a8] sm:$0xff]  ;;  %v32_v51 = vld [vmem:[%s3274_s0] sm:$0xff] }
  0x10   :  { %1850 = vmatprep.subr.mxu1 %v93_v26  ;;  %1817 = vmatprep.subr.mxu0 %v60_v30  ;;  %v73_v50 = vld [vmem:[%s3273_s1 + $0x128] sm:$0xff]  ;;  %v40_v52 = vld [vmem:[%s3273_s1 + $0x20] sm:$0xff]  ;;  %v55_v54 = vld [vmem:[%s3273_s1 + $0x98] sm:$0xff]  ;;  %v270_v58 = vrot.slane %v32_v51, %v2242_v48  ;;  %v263_v59 = vcombine.high %v32_v51, %v32_v51 }
  0x11   :  { %1851 = vmatpush3.msra.mxu1 %v77_v31  ;;  %1818 = vmatpush3.msra.mxu0 %v44_v32  ;;  %v88_v53 = vld [vmem:[%s3273_s1 + $0x1a0] sm:$0xff]  ;;  %v39_v56 = vld [vmem:[%s3273_s1 + $0x18] sm:$0xff]  ;;  %v54_v60 = vld [vmem:[%s3273_s1 + $0x90] sm:$0xff] }
  0x12   :  { %1852 = vmatprep.subr.mxu1 %v92_v33  ;;  %1819 = vmatprep.subr.mxu0 %v59_v34  ;;  %v72_v55 = vld [vmem:[%s3273_s1 + $0x120] sm:$0xff]  ;;  %v87_v57 = vld [vmem:[%s3273_s1 + $0x198] sm:$0xff]  ;;  %v38_v62 = vld [vmem:[%s3273_s1 + $0x10] sm:$0xff]  ;;  %v278_v4 = vcombine.high %v270_v58, %v270_v58  ;;  %v277_v5 = vrot.slane %v263_v59, %v2242_v48 }
  0x13   :  { %1853 = vmatpush3.msra.mxu1 %v76_v35  ;;  %1820 = vmatpush3.msra.mxu0 %v43_v36  ;;  %v71_v61 = vld [vmem:[%s3273_s1 + $0x118] sm:$0xff]  ;;  %v86_v63 = vld [vmem:[%s3273_s1 + $0x190] sm:$0xff]  ;;  %v53_v0 = vld [vmem:[%s3273_s1 + $0x88] sm:$0xff] }
  0x14   :  { %1854 = vmatprep.subr.mxu1 %v91_v37  ;;  %1821 = vmatprep.subr.mxu0 %v58_v40  ;;  %v70_v1 = vld [vmem:[%s3273_s1 + $0x110] sm:$0xff]  ;;  %v37_v2 = vld [vmem:[%s3273_s1 + $0x8] sm:$0xff]  ;;  %v52_v6 = vld [vmem:[%s3273_s1 + $0x80] sm:$0xff]  ;;  %v279_v12 = vcombine.high %v277_v5, %v277_v5 }
  0x15   :  { %1855 = vmatpush3.msra.mxu1 %v75_v41  ;;  %1822 = vmatpush3.msra.mxu0 %v42_v42  ;;  %v85_v3 = vld [vmem:[%s3273_s1 + $0x188] sm:$0xff]  ;;  %v36_v7 = vld [vmem:[%s3273_s1] sm:$0xff]  ;;  %v131_v10 = vld [vmem:[%s3273_s1 + $0x2f8] sm:$0xff] }
  0x16   :  { %1856 = vmatprep.subr.mxu1 %v90_v43  ;;  %1823 = vmatprep.subr.mxu0 %v57_v44  ;;  %v69_v8 = vld [vmem:[%s3273_s1 + $0x108] sm:$0xff]  ;;  %v84_v9 = vld [vmem:[%s3273_s1 + $0x180] sm:$0xff]  ;;  %v115_v13 = vld [vmem:[%s3273_s1 + $0x278] sm:$0xff] }
  0x17   :  { %1857 = vmatpush3.msra.mxu1 %v74_v45  ;;  %1824 = vmatpush3.msra.mxu0 %v41_v46  ;;  %v68_v11 = vld [vmem:[%s3273_s1 + $0x100] sm:$0xff]  ;;  %v130_v14 = vld [vmem:[%s3273_s1 + $0x2f0] sm:$0xff]  ;;  %v163_v15 = vld [vmem:[%s3273_s1 + $0x3f8] sm:$0xff] }
  0x18   :  { %1858 = vmatprep.subr.mxu1 %v89_v47  ;;  %1825 = vmatprep.subr.mxu0 %v56_v49  ;;  %v114_v16 = vld [vmem:[%s3273_s1 + $0x270] sm:$0xff]  ;;  %v147_v17 = vld [vmem:[%s3273_s1 + $0x378] sm:$0xff]  ;;  %v129_v18 = vld [vmem:[%s3273_s1 + $0x2e8] sm:$0xff] }
  0x19   :  { %1859 = vmatpush3.msra.mxu1 %v73_v50  ;;  %1826 = vmatpush3.msra.mxu0 %v40_v52  ;;  %v162_v19 = vld [vmem:[%s3273_s1 + $0x3f0] sm:$0xff]  ;;  %v113_v20 = vld [vmem:[%s3273_s1 + $0x268] sm:$0xff]  ;;  %v128_v22 = vld [vmem:[%s3273_s1 + $0x2e0] sm:$0xff] }
  0x1a   :  { %1860 = vmatprep.subr.mxu1 %v88_v53  ;;  %1827 = vmatprep.subr.mxu0 %v55_v54  ;;  %v146_v21 = vld [vmem:[%s3273_s1 + $0x370] sm:$0xff]  ;;  %v161_v23 = vld [vmem:[%s3273_s1 + $0x3e8] sm:$0xff]  ;;  %v112_v24 = vld [vmem:[%s3273_s1 + $0x260] sm:$0xff] }
  0x1b   :  { %1861 = vmatpush3.msra.mxu1 %v72_v55  ;;  %1828 = vmatpush3.msra.mxu0 %v39_v56  ;;  %v145_v25 = vld [vmem:[%s3273_s1 + $0x368] sm:$0xff]  ;;  %v127_v26 = vld [vmem:[%s3273_s1 + $0x2d8] sm:$0xff]  ;;  %v160_v27 = vld [vmem:[%s3273_s1 + $0x3e0] sm:$0xff] }
  0x1c   :  { %1862 = vmatprep.subr.mxu1 %v87_v57  ;;  %1829 = vmatprep.subr.mxu0 %v54_v60  ;;  %v111_v28 = vld [vmem:[%s3273_s1 + $0x258] sm:$0xff]  ;;  %v144_v29 = vld [vmem:[%s3273_s1 + $0x360] sm:$0xff]  ;;  %v126_v30 = vld [vmem:[%s3273_s1 + $0x2d0] sm:$0xff] }
  0x1d   :  { %1863 = vmatpush3.msra.mxu1 %v71_v61  ;;  %1830 = vmatpush3.msra.mxu0 %v38_v62  ;;  %v159_v31 = vld [vmem:[%s3273_s1 + $0x3d8] sm:$0xff]  ;;  %v110_v32 = vld [vmem:[%s3273_s1 + $0x250] sm:$0xff]  ;;  %v125_v34 = vld [vmem:[%s3273_s1 + $0x2c8] sm:$0xff] }
  0x1e   :  { %1864 = vmatprep.subr.mxu1 %v86_v63  ;;  %1831 = vmatprep.subr.mxu0 %v53_v0  ;;  %v143_v33 = vld [vmem:[%s3273_s1 + $0x358] sm:$0xff]  ;;  %v158_v35 = vld [vmem:[%s3273_s1 + $0x3d0] sm:$0xff]  ;;  %v109_v36 = vld [vmem:[%s3273_s1 + $0x248] sm:$0xff] }
  0x1f   :  { %1865 = vmatpush3.msra.mxu1 %v70_v1  ;;  %1832 = vmatpush3.msra.mxu0 %v37_v2  ;;  %v142_v37 = vld [vmem:[%s3273_s1 + $0x350] sm:$0xff]  ;;  %v124_v38 = vld [vmem:[%s3273_s1 + $0x2c0] sm:$0xff]  ;;  %v157_v40 = vld [vmem:[%s3273_s1 + $0x3c8] sm:$0xff] }
  0x20   :  { %1866 = vmatprep.subr.mxu1 %v85_v3  ;;  %1833 = vmatprep.subr.mxu0 %v52_v6  ;;  %v108_v41 = vld [vmem:[%s3273_s1 + $0x240] sm:$0xff]  ;;  %v141_v42 = vld [vmem:[%s3273_s1 + $0x348] sm:$0xff]  ;;  %v123_v43 = vld [vmem:[%s3273_s1 + $0x2b8] sm:$0xff] }
  0x21   :  { %402 = vmatprep.mubr.f32.mxu0 %v278_v4  ;;  %1834 = vmatpush3.msra.mxu0 %v36_v7  ;;  %v156_v44 = vld [vmem:[%s3273_s1 + $0x3c0] sm:$0xff]  ;;  %v107_v45 = vld [vmem:[%s3273_s1 + $0x238] sm:$0xff]  ;;  %v122_v47 = vld [vmem:[%s3273_s1 + $0x2b0] sm:$0xff] }
  0x22   :  { %1867 = vmatpush3.msra.mxu1 %v69_v8  ;;  %403 = vmatmul.mubr.f32.vlgmr.msra.gmra.mxu0 %v270_v58  ;;  %v140_v46 = vld [vmem:[%s3273_s1 + $0x340] sm:$0xff]  ;;  %v155_v49 = vld [vmem:[%s3273_s1 + $0x3b8] sm:$0xff]  ;;  %v106_v50 = vld [vmem:[%s3273_s1 + $0x230] sm:$0xff] }
  0x23   :  { %1868 = vmatprep.subr.mxu1 %v84_v9  ;;  %1873 = vmatprep.subr.mxu0 %v131_v10  ;;  %v139_v51 = vld [vmem:[%s3273_s1 + $0x338] sm:$0xff]  ;;  %v121_v52 = vld [vmem:[%s3273_s1 + $0x2a8] sm:$0xff]  ;;  %v154_v53 = vld [vmem:[%s3273_s1 + $0x3b0] sm:$0xff] }
  0x24   :  { %1869 = vmatpush3.msra.mxu1 %v68_v11  ;;  %472 = vmatprep.mubr.f32.mxu1 %v279_v12  ;;  %v105_v54 = vld [vmem:[%s3273_s1 + $0x228] sm:$0xff]  ;;  %v138_v55 = vld [vmem:[%s3273_s1 + $0x330] sm:$0xff]  ;;  %v120_v56 = vld [vmem:[%s3273_s1 + $0x2a0] sm:$0xff] }
  0x25   :  { %1874 = vmatpush3.msra.mxu0 %v115_v13  ;;  %473 = vmatmul.mubr.f32.vlgmr.msra.gmra.mxu1 %v277_v5  ;;  %v153_v57 = vld [vmem:[%s3273_s1 + $0x3a8] sm:$0xff]  ;;  %v104_v58 = vld [vmem:[%s3273_s1 + $0x220] sm:$0xff]  ;;  %v119_v61 = vld [vmem:[%s3273_s1 + $0x298] sm:$0xff] }
  0x26   :  { %1875 = vmatprep.subr.mxu0 %v130_v14  ;;  %1908 = vmatprep.subr.mxu1 %v163_v15  ;;  %v33_v59 = vld [vmem:[%s3274_s0 + $0x8] sm:$0xff]  ;;  %v152_v62 = vld [vmem:[%s3273_s1 + $0x3a0] sm:$0xff]  ;;  %v103_v63 = vld [vmem:[%s3273_s1 + $0x218] sm:$0xff] }
  0x27   :  { %1876 = vmatpush3.msra.mxu0 %v114_v16  ;;  %1909 = vmatpush3.msra.mxu1 %v147_v17  ;;  %v137_v60 = vld [vmem:[%s3273_s1 + $0x328] sm:$0xff]  ;;  %v136_v0 = vld [vmem:[%s3273_s1 + $0x320] sm:$0xff]  ;;  %v118_v1 = vld [vmem:[%s3273_s1 + $0x290] sm:$0xff]  ;;  %v280_v2 = vcombine.high %v33_v59, %v33_v59  ;;  %v287_v5 = vrot.slane %v33_v59, %v2242_v48 }
  0x28   :  { %1877 = vmatprep.subr.mxu0 %v129_v18  ;;  %1910 = vmatprep.subr.mxu1 %v162_v19  ;;  %v151_v3 = vld [vmem:[%s3273_s1 + $0x398] sm:$0xff]  ;;  %v102_v4 = vld [vmem:[%s3273_s1 + $0x210] sm:$0xff]  ;;  %v117_v7 = vld [vmem:[%s3273_s1 + $0x288] sm:$0xff] }
  0x29   :  { %1878 = vmatpush3.msra.mxu0 %v113_v20  ;;  %1911 = vmatpush3.msra.mxu1 %v146_v21  ;;  %v135_v6 = vld [vmem:[%s3273_s1 + $0x318] sm:$0xff]  ;;  %v150_v8 = vld [vmem:[%s3273_s1 + $0x390] sm:$0xff]  ;;  %v101_v9 = vld [vmem:[%s3273_s1 + $0x208] sm:$0xff]  ;;  %v294_v12 = vrot.slane %v280_v2, %v2242_v48  ;;  %v295_v15 = vcombine.high %v287_v5, %v287_v5 }
  0x2a   :  { %1879 = vmatprep.subr.mxu0 %v128_v22  ;;  %1912 = vmatprep.subr.mxu1 %v161_v23  ;;  %v134_v10 = vld [vmem:[%s3273_s1 + $0x310] sm:$0xff]  ;;  %v116_v11 = vld [vmem:[%s3273_s1 + $0x280] sm:$0xff]  ;;  %v149_v13 = vld [vmem:[%s3273_s1 + $0x388] sm:$0xff] }
  0x2b   :  { %1880 = vmatpush3.msra.mxu0 %v112_v24  ;;  %1913 = vmatpush3.msra.mxu1 %v145_v25  ;;  %v100_v14 = vld [vmem:[%s3273_s1 + $0x200] sm:$0xff]  ;;  %v133_v16 = vld [vmem:[%s3273_s1 + $0x308] sm:$0xff]  ;;  %v195_v18 = vld [vmem:[%s3273_s1 + $0x4f8] sm:$0xff]  ;;  %v296_v20 = vcombine.high %v294_v12, %v294_v12 }
  0x2c   :  { %1881 = vmatprep.subr.mxu0 %v127_v26  ;;  %1914 = vmatprep.subr.mxu1 %v160_v27  ;;  %v148_v17 = vld [vmem:[%s3273_s1 + $0x380] sm:$0xff]  ;;  %v179_v21 = vld [vmem:[%s3273_s1 + $0x478] sm:$0xff]  ;;  %v194_v22 = vld [vmem:[%s3273_s1 + $0x4f0] sm:$0xff] }
  0x2d   :  { %1882 = vmatpush3.msra.mxu0 %v111_v28  ;;  %1915 = vmatpush3.msra.mxu1 %v144_v29  ;;  %v132_v19 = vld [vmem:[%s3273_s1 + $0x300] sm:$0xff]  ;;  %v227_v23 = vld [vmem:[%s3273_s1 + $0x5f8] sm:$0xff]  ;;  %v178_v24 = vld [vmem:[%s3273_s1 + $0x470] sm:$0xff] }
  0x2e   :  { %1883 = vmatprep.subr.mxu0 %v126_v30  ;;  %1916 = vmatprep.subr.mxu1 %v159_v31  ;;  %v211_v25 = vld [vmem:[%s3273_s1 + $0x578] sm:$0xff]  ;;  %v193_v26 = vld [vmem:[%s3273_s1 + $0x4e8] sm:$0xff]  ;;  %v226_v27 = vld [vmem:[%s3273_s1 + $0x5f0] sm:$0xff] }
  0x2f   :  { %1884 = vmatpush3.msra.mxu0 %v110_v32  ;;  %1917 = vmatpush3.msra.mxu1 %v143_v33  ;;  %v177_v28 = vld [vmem:[%s3273_s1 + $0x468] sm:$0xff]  ;;  %v210_v29 = vld [vmem:[%s3273_s1 + $0x570] sm:$0xff]  ;;  %v192_v30 = vld [vmem:[%s3273_s1 + $0x4e0] sm:$0xff] }
  0x30   :  { %1885 = vmatprep.subr.mxu0 %v125_v34  ;;  %1918 = vmatprep.subr.mxu1 %v158_v35  ;;  %v225_v31 = vld [vmem:[%s3273_s1 + $0x5e8] sm:$0xff]  ;;  %v176_v32 = vld [vmem:[%s3273_s1 + $0x460] sm:$0xff]  ;;  %v191_v34 = vld [vmem:[%s3273_s1 + $0x4d8] sm:$0xff] }
  0x31   :  { %1886 = vmatpush3.msra.mxu0 %v109_v36  ;;  %1919 = vmatpush3.msra.mxu1 %v142_v37  ;;  %v209_v33 = vld [vmem:[%s3273_s1 + $0x568] sm:$0xff]  ;;  %v224_v35 = vld [vmem:[%s3273_s1 + $0x5e0] sm:$0xff]  ;;  %v175_v36 = vld [vmem:[%s3273_s1 + $0x458] sm:$0xff] }
  0x32   :  { %1887 = vmatprep.subr.mxu0 %v124_v38  ;;  %1920 = vmatprep.subr.mxu1 %v157_v40  ;;  %v208_v37 = vld [vmem:[%s3273_s1 + $0x560] sm:$0xff]  ;;  %v190_v38 = vld [vmem:[%s3273_s1 + $0x4d0] sm:$0xff]  ;;  %v223_v40 = vld [vmem:[%s3273_s1 + $0x5d8] sm:$0xff] }
  0x33   :  { %1888 = vmatpush3.msra.mxu0 %v108_v41  ;;  %1921 = vmatpush3.msra.mxu1 %v141_v42  ;;  %v174_v41 = vld [vmem:[%s3273_s1 + $0x450] sm:$0xff]  ;;  %v207_v42 = vld [vmem:[%s3273_s1 + $0x558] sm:$0xff]  ;;  %v168_v2 = vld [vmem:[%s3273_s1 + $0x420] sm:$0xff] }
  0x34   :  { %1889 = vmatprep.subr.mxu0 %v123_v43  ;;  %1922 = vmatprep.subr.mxu1 %v156_v44  ;;  %v189_v43 = vld [vmem:[%s3273_s1 + $0x4c8] sm:$0xff]  ;;  %v222_v44 = vld [vmem:[%s3273_s1 + $0x5d0] sm:$0xff]  ;;  %v203_v59 = vld [vmem:[%s3273_s1 + $0x538] sm:$0xff] }
  0x35   :  { %1890 = vmatpush3.msra.mxu0 %v107_v45  ;;  %1923 = vmatpush3.msra.mxu1 %v140_v46  ;;  %v173_v45 = vld [vmem:[%s3273_s1 + $0x448] sm:$0xff]  ;;  %v206_v46 = vld [vmem:[%s3273_s1 + $0x550] sm:$0xff]  ;;  %vm1783_vm5 = vmor %vm1782_vm4, %vm1781_vm3 }
  0x36   :  { %1891 = vmatprep.subr.mxu0 %v122_v47  ;;  %1924 = vmatprep.subr.mxu1 %v155_v49  ;;  %v188_v47 = vld [vmem:[%s3273_s1 + $0x4c0] sm:$0xff]  ;;  %v221_v49 = vld [vmem:[%s3273_s1 + $0x5c8] sm:$0xff] }
  0x37   :  { %1892 = vmatpush3.msra.mxu0 %v106_v50  ;;  %1925 = vmatpush3.msra.mxu1 %v139_v51  ;;  %v172_v50 = vld [vmem:[%s3273_s1 + $0x440] sm:$0xff]  ;;  %v205_v51 = vld [vmem:[%s3273_s1 + $0x548] sm:$0xff] }
  0x38   :  { %1893 = vmatprep.subr.mxu0 %v121_v52  ;;  %1926 = vmatprep.subr.mxu1 %v154_v53  ;;  %v187_v52 = vld [vmem:[%s3273_s1 + $0x4b8] sm:$0xff]  ;;  %v220_v53 = vld [vmem:[%s3273_s1 + $0x5c0] sm:$0xff] }
  0x39   :  { %1894 = vmatpush3.msra.mxu0 %v105_v54  ;;  %1927 = vmatpush3.msra.mxu1 %v138_v55  ;;  %v171_v54 = vld [vmem:[%s3273_s1 + $0x438] sm:$0xff]  ;;  %v204_v55 = vld [vmem:[%s3273_s1 + $0x540] sm:$0xff] }
  0x3a   :  { %1895 = vmatprep.subr.mxu0 %v120_v56  ;;  %1928 = vmatprep.subr.mxu1 %v153_v57  ;;  %v186_v56 = vld [vmem:[%s3273_s1 + $0x4b0] sm:$0xff]  ;;  %v219_v57 = vld [vmem:[%s3273_s1 + $0x5b8] sm:$0xff] }
  0x3b   :  { %1896 = vmatpush3.msra.mxu0 %v104_v58  ;;  %1929 = vmatpush3.msra.mxu1 %v137_v60  ;;  %v170_v58 = vld [vmem:[%s3273_s1 + $0x430] sm:$0xff]  ;;  %v185_v60 = vld [vmem:[%s3273_s1 + $0x4a8] sm:$0xff] }
  0x3c   :  { %1897 = vmatprep.subr.mxu0 %v119_v61  ;;  %1930 = vmatprep.subr.mxu1 %v152_v62  ;;  %v218_v61 = vld [vmem:[%s3273_s1 + $0x5b0] sm:$0xff]  ;;  %v169_v62 = vld [vmem:[%s3273_s1 + $0x428] sm:$0xff] }
  0x3d   :  { %1898 = vmatpush3.msra.mxu0 %v103_v63  ;;  %1931 = vmatpush3.msra.mxu1 %v136_v0  ;;  %v202_v63 = vld [vmem:[%s3273_s1 + $0x530] sm:$0xff]  ;;  %v184_v0 = vld [vmem:[%s3273_s1 + $0x4a0] sm:$0xff] }
  0x3e   :  { %1899 = vmatprep.subr.mxu0 %v118_v1  ;;  %1932 = vmatprep.subr.mxu1 %v151_v3  ;;  %v217_v1 = vld [vmem:[%s3273_s1 + $0x5a8] sm:$0xff]  ;;  %v34_v3 = vld [vmem:[%s3274_s0 + $0x10] sm:$0xff] }
  0x3f   :  { %1900 = vmatpush3.msra.mxu0 %v102_v4  ;;  %1933 = vmatpush3.msra.mxu1 %v135_v6  ;;  %v201_v4 = vld [vmem:[%s3273_s1 + $0x528] sm:$0xff]  ;;  %v216_v6 = vld [vmem:[%s3273_s1 + $0x5a0] sm:$0xff] }
  0x40   :  { %1901 = vmatprep.subr.mxu0 %v117_v7  ;;  %1934 = vmatprep.subr.mxu1 %v150_v8  ;;  %v167_v7 = vld [vmem:[%s3273_s1 + $0x418] sm:$0xff]  ;;  %v200_v8 = vld [vmem:[%s3273_s1 + $0x520] sm:$0xff] }
  0x41   :  { %1902 = vmatpush3.msra.mxu0 %v101_v9  ;;  %1935 = vmatpush3.msra.mxu1 %v134_v10  ;;  %v182_v9 = vld [vmem:[%s3273_s1 + $0x490] sm:$0xff]  ;;  %v297_v10 = vcombine.high %v34_v3, %v34_v3 }
  0x42   :  { %1903 = vmatprep.subr.mxu0 %v116_v11  ;;  %1936 = vmatprep.subr.mxu1 %v149_v13  ;;  %v215_v11 = vld [vmem:[%s3273_s1 + $0x598] sm:$0xff]  ;;  %v304_v13 = vrot.slane %v34_v3, %v2242_v48 }
  0x43   :  { %1904 = vmatpush3.msra.mxu0 %v100_v14  ;;  %542 = vmatprep.mubr.f32.mxu0 %v295_v15  ;;  %v199_v14 = vld [vmem:[%s3273_s1 + $0x518] sm:$0xff]  ;;  %v181_v15 = vld [vmem:[%s3273_s1 + $0x488] sm:$0xff] }
  0x44   :  { %1937 = vmatpush3.msra.mxu1 %v133_v16  ;;  %543 = vmatmul.mubr.f32.vlgmr.msra.gmra.mxu0 %v287_v5  ;;  %v183_v5 = vld [vmem:[%s3273_s1 + $0x498] sm:$0xff]  ;;  %v214_v16 = vld [vmem:[%s3273_s1 + $0x590] sm:$0xff] }
  0x45   :  { %1938 = vmatprep.subr.mxu1 %v148_v17  ;;  %1943 = vmatprep.subr.mxu0 %v195_v18  ;;  %v165_v17 = vld [vmem:[%s3273_s1 + $0x408] sm:$0xff]  ;;  %v198_v18 = vld [vmem:[%s3273_s1 + $0x510] sm:$0xff] }
  0x46   :  { %1939 = vmatpush3.msra.mxu1 %v132_v19  ;;  %612 = vmatprep.mubr.f32.mxu1 %v296_v20  ;;  %v180_v19 = vld [vmem:[%s3273_s1 + $0x480] sm:$0xff]  ;;  %v311_v20 = vrot.slane %v297_v10, %v2242_v48 }
  0x47   :  { %1944 = vmatpush3.msra.mxu0 %v179_v21  ;;  %613 = vmatmul.mubr.f32.vlgmr.msra.gmra.mxu1 %v294_v12  ;;  %v166_v12 = vld [vmem:[%s3273_s1 + $0x410] sm:$0xff]  ;;  %v213_v21 = vld [vmem:[%s3273_s1 + $0x588] sm:$0xff] }
  0x48   :  { %1945 = vmatprep.subr.mxu0 %v194_v22  ;;  %1978 = vmatprep.subr.mxu1 %v227_v23  ;;  %v164_v22 = vld [vmem:[%s3273_s1 + $0x400] sm:$0xff]  ;;  %v312_v23 = vcombine.high %v304_v13, %v304_v13 }
  0x49   :  { %1946 = vmatpush3.msra.mxu0 %v178_v24  ;;  %1979 = vmatpush3.msra.mxu1 %v211_v25  ;;  %v197_v24 = vld [vmem:[%s3273_s1 + $0x508] sm:$0xff]  ;;  %v212_v25 = vld [vmem:[%s3273_s1 + $0x580] sm:$0xff] }
  0x4a   :  { %1947 = vmatprep.subr.mxu0 %v193_v26  ;;  %1980 = vmatprep.subr.mxu1 %v226_v27  ;;  %v2706_v26 = vld.sshfl [vmem:[%s3274_s0 + $0x18] sm:$0x33 pattern:$0x76325410]  ;;  %v196_v27 = vld [vmem:[%s3273_s1 + $0x500] sm:$0xff] }
  0x4b   :  { %1948 = vmatpush3.msra.mxu0 %v177_v28  ;;  %1981 = vmatpush3.msra.mxu1 %v210_v29  ;;  %v313_v28 = vcombine.high %v311_v20, %v311_v20  ;;  %v243_v29 = vld [vmem:[%s3273_s1 + $0x678] sm:$0xff] }
  0x4c   :  { %1949 = vmatprep.subr.mxu0 %v192_v30  ;;  %1982 = vmatprep.subr.mxu1 %v225_v31  ;;  %v321_v30 = vcombine.high %v2706_v26, %v2706_v26  ;;  %v2058_v31 = vmov 0.0  }
  0x4d   :  { %1950 = vmatpush3.msra.mxu0 %v176_v32  ;;  %1983 = vmatpush3.msra.mxu1 %v209_v33  ;;  %v242_v32 = vld [vmem:[%s3273_s1 + $0x670] sm:$0xff]  ;;  %v241_v33 = vld [vmem:[%s3273_s1 + $0x668] sm:$0xff] }
  0x4e   :  { %1951 = vmatprep.subr.mxu0 %v191_v34  ;;  %1984 = vmatprep.subr.mxu1 %v224_v35  ;;  %v240_v34 = vld [vmem:[%s3273_s1 + $0x660] sm:$0xff]  ;;  %v239_v35 = vld [vmem:[%s3273_s1 + $0x658] sm:$0xff] }
  0x4f   :  { %1952 = vmatpush3.msra.mxu0 %v175_v36  ;;  %1985 = vmatpush3.msra.mxu1 %v208_v37  ;;  %v238_v36 = vld [vmem:[%s3273_s1 + $0x650] sm:$0xff]  ;;  %v237_v37 = vld [vmem:[%s3273_s1 + $0x648] sm:$0xff] }
  0x50   :  { %1953 = vmatprep.subr.mxu0 %v190_v38  ;;  %1986 = vmatprep.subr.mxu1 %v223_v40  ;;  %v236_v38 = vld [vmem:[%s3273_s1 + $0x640] sm:$0xff]  ;;  %v235_v40 = vld [vmem:[%s3273_s1 + $0x638] sm:$0xff] }
  0x51   :  { %1954 = vmatpush3.msra.mxu0 %v174_v41  ;;  %1987 = vmatpush3.msra.mxu1 %v207_v42  ;;  %v234_v41 = vld [vmem:[%s3273_s1 + $0x630] sm:$0xff]  ;;  %v233_v42 = vld [vmem:[%s3273_s1 + $0x628] sm:$0xff] }
  0x52   :  { %1955 = vmatprep.subr.mxu0 %v189_v43  ;;  %1988 = vmatprep.subr.mxu1 %v222_v44  ;;  %v232_v43 = vld [vmem:[%s3273_s1 + $0x620] sm:$0xff]  ;;  %v231_v44 = vld [vmem:[%s3273_s1 + $0x618] sm:$0xff] }
  0x53   :  { %1956 = vmatpush3.msra.mxu0 %v173_v45  ;;  %1989 = vmatpush3.msra.mxu1 %v206_v46  ;;  %v230_v45 = vld [vmem:[%s3273_s1 + $0x610] sm:$0xff]  ;;  %v229_v46 = vld [vmem:[%s3273_s1 + $0x608] sm:$0xff] }
  0x54   :  { %1957 = vmatprep.subr.mxu0 %v188_v47  ;;  %1990 = vmatprep.subr.mxu1 %v221_v49  ;;  %v228_v47 = vld [vmem:[%s3273_s1 + $0x600] sm:$0xff]  ;;  %v251_v49 = vld [vmem:[%s3273_s1 + $0x6b8] sm:$0xff] }
  0x55   :  { %1958 = vmatpush3.msra.mxu0 %v172_v50  ;;  %1991 = vmatpush3.msra.mxu1 %v205_v51  ;;  %v250_v50 = vld [vmem:[%s3273_s1 + $0x6b0] sm:$0xff]  ;;  %v249_v51 = vld [vmem:[%s3273_s1 + $0x6a8] sm:$0xff] }
  0x56   :  { %1959 = vmatprep.subr.mxu0 %v187_v52  ;;  %1992 = vmatprep.subr.mxu1 %v220_v53  ;;  %v248_v52 = vld [vmem:[%s3273_s1 + $0x6a0] sm:$0xff]  ;;  %v247_v53 = vld [vmem:[%s3273_s1 + $0x698] sm:$0xff] }
  0x57   :  { %1960 = vmatpush3.msra.mxu0 %v171_v54  ;;  %1993 = vmatpush3.msra.mxu1 %v204_v55  ;;  %v246_v54 = vld [vmem:[%s3273_s1 + $0x690] sm:$0xff]  ;;  %v245_v55 = vld [vmem:[%s3273_s1 + $0x688] sm:$0xff] }
  0x58   :  { %1961 = vmatprep.subr.mxu0 %v186_v56  ;;  %1994 = vmatprep.subr.mxu1 %v219_v57  ;;  %v244_v56 = vld [vmem:[%s3273_s1 + $0x680] sm:$0xff]  ;;  %v836_v57 = vld [vmem:[%s3275_s3 + $0x38] sm:$0xff] }
  0x59   :  { %1962 = vmatpush3.msra.mxu0 %v170_v58  ;;  %1995 = vmatpush3.msra.mxu1 %v203_v59  ;;  %v835_v58 = vld [vmem:[%s3275_s3 + $0x30] sm:$0xff]  ;;  %v834_v59 = vld [vmem:[%s3275_s3 + $0x28] sm:$0xff] }
  0x5a   :  { %1963 = vmatprep.subr.mxu0 %v185_v60  ;;  %1996 = vmatprep.subr.mxu1 %v218_v61  ;;  %v833_v60 = vld [vmem:[%s3275_s3 + $0x20] sm:$0xff]  ;;  %v832_v61 = vld [vmem:[%s3275_s3 + $0x18] sm:$0xff] }
  0x5b   :  { %1964 = vmatpush3.msra.mxu0 %v169_v62  ;;  %1997 = vmatpush3.msra.mxu1 %v202_v63  ;;  %v831_v62 = vld [vmem:[%s3275_s3 + $0x10] sm:$0xff]  ;;  %v830_v63 = vld [vmem:[%s3275_s3 + $0x8] sm:$0xff] }
  0x5c   :  { %1965 = vmatprep.subr.mxu0 %v184_v0  ;;  %1998 = vmatprep.subr.mxu1 %v217_v1  ;;  %v829_v0 = vld [vmem:[%s3275_s3] sm:$0xff] }
  0x5d   :  { %1966 = vmatpush3.msra.mxu0 %v168_v2  ;;  %1999 = vmatpush3.msra.mxu1 %v201_v4 }
  0x5e   :  { %1967 = vmatprep.subr.mxu0 %v183_v5  ;;  %2000 = vmatprep.subr.mxu1 %v216_v6  ;;  %v1789_v6 = vld [vmem:[%s3276_s2] ss:$0 sm:$0xff] }
  0x5f   :  { %1968 = vmatpush3.msra.mxu0 %v167_v7  ;;  %2001 = vmatpush3.msra.mxu1 %v200_v8 }
  0x60   :  { %1969 = vmatprep.subr.mxu0 %v182_v9  ;;  %2002 = vmatprep.subr.mxu1 %v215_v11 }
  0x61   :  { %1970 = vmatpush3.msra.mxu0 %v166_v12  ;;  %2003 = vmatpush3.msra.mxu1 %v199_v14 }
  0x62   :  { %1971 = vmatprep.subr.mxu0 %v181_v15  ;;  %2004 = vmatprep.subr.mxu1 %v214_v16 }
  0x63   :  { %1972 = vmatpush3.msra.mxu0 %v165_v17  ;;  %2005 = vmatpush3.msra.mxu1 %v198_v18 }
  0x64   :  { %1973 = vmatprep.subr.mxu0 %v180_v19  ;;  %2006 = vmatprep.subr.mxu1 %v213_v21 }
  0x65   :  { %1974 = vmatpush3.msra.mxu0 %v164_v22  ;;  %682 = vmatprep.mubr.f32.mxu0 %v312_v23 }
  0x66   :  { %2007 = vmatpush3.msra.mxu1 %v197_v24  ;;  %683 = vmatmul.mubr.f32.vlgmr.msra.gmra.mxu0 %v304_v13 }
  0x67   :  { %2008 = vmatprep.subr.mxu1 %v212_v25  ;;  %758 = vmatprep.subr.mxu0 %v2058_v31 }
  0x68   :  { %2009 = vmatpush3.msra.mxu1 %v196_v27  ;;  %752 = vmatprep.mubr.f32.mxu1 %v313_v28 }
  0x69   :  { %759 = vmatpush1.msra.mxu0 %v243_v29  ;;  %753 = vmatmul.mubr.f32.vlgmr.msra.gmra.mxu1 %v311_v20 }
  0x6a   :  { %760 = vmatprep.subr.mxu0 %v2058_v31  ;;  %1791 = vmatprep.mubr.msk.f32.mxu0 %vm335_vm0, %v321_v30  ;;  %v918_v30 = vld [vmem:[%s3277_s5 + $0x8] sm:$0xff] }
  0x6b   :  { %761 = vmatpush1.msra.mxu0 %v242_v32  ;;  %2025 = vmatprep.subr.mxu1 %v2058_v31  ;;  %v917_v32 = vld [vmem:[%s3277_s5] sm:$0xff] }
  0x6c   :  { %762 = vmatprep.subr.mxu0 %v2058_v31  ;;  %2026 = vmatpush3.msra.mxu1 %v836_v57  ;;  %v1058_v57 = vld [vmem:[%s3278_s7 + $0x1c8] sm:$0xff] }
  0x6d   :  { %763 = vmatpush1.msra.mxu0 %v241_v33  ;;  %2027 = vmatprep.subr.mxu1 %v2058_v31  ;;  %v1100_v33 = vld [vmem:[%s3278_s7 + $0x318] sm:$0xff] }
  0x6e   :  { %764 = vmatprep.subr.mxu0 %v2058_v31  ;;  %2028 = vmatpush3.msra.mxu1 %v835_v58  ;;  %v1057_v58 = vld [vmem:[%s3278_s7 + $0x1c0] sm:$0xff] }
  0x6f   :  { %765 = vmatpush1.msra.mxu0 %v240_v34  ;;  %2029 = vmatprep.subr.mxu1 %v2058_v31  ;;  %v1104_v34 = vld [vmem:[%s3278_s7 + $0x338] sm:$0xff] }
  0x70   :  { %766 = vmatprep.subr.mxu0 %v2058_v31  ;;  %2030 = vmatpush3.msra.mxu1 %v834_v59  ;;  %v1044_v59 = vld [vmem:[%s3278_s7 + $0x158] sm:$0xff] }
  0x71   :  { %767 = vmatpush1.msra.mxu0 %v239_v35  ;;  %2031 = vmatprep.subr.mxu1 %v2058_v31  ;;  %v1103_v35 = vld [vmem:[%s3278_s7 + $0x330] sm:$0xff] }
  0x72   :  { %768 = vmatprep.subr.mxu0 %v2058_v31  ;;  %2032 = vmatpush3.msra.mxu1 %v833_v60  ;;  %v1043_v60 = vld [vmem:[%s3278_s7 + $0x150] sm:$0xff] }
  0x73   :  { %769 = vmatpush1.msra.mxu0 %v238_v36  ;;  %2033 = vmatprep.subr.mxu1 %v2058_v31  ;;  %v1090_v36 = vld [vmem:[%s3278_s7 + $0x2c8] sm:$0xff] }
  0x74   :  { %770 = vmatprep.subr.mxu0 %v2058_v31  ;;  %2034 = vmatpush3.msra.mxu1 %v832_v61  ;;  %v1030_v61 = vld [vmem:[%s3278_s7 + $0xe8] sm:$0xff] }
  0x75   :  { %771 = vmatpush1.msra.mxu0 %v237_v37  ;;  %2035 = vmatprep.subr.mxu1 %v2058_v31  ;;  %v1089_v37 = vld [vmem:[%s3278_s7 + $0x2c0] sm:$0xff] }
  0x76   :  { %772 = vmatprep.subr.mxu0 %v2058_v31  ;;  %2036 = vmatpush3.msra.mxu1 %v831_v62  ;;  %v1029_v62 = vld [vmem:[%s3278_s7 + $0xe0] sm:$0xff] }
  0x77   :  { %773 = vmatpush1.msra.mxu0 %v236_v38  ;;  %2037 = vmatprep.subr.mxu1 %v2058_v31  ;;  %v1076_v38 = vld [vmem:[%s3278_s7 + $0x258] sm:$0xff] }
  0x78   :  { %774 = vmatprep.subr.mxu0 %v2058_v31  ;;  %2038 = vmatpush3.msra.mxu1 %v830_v63  ;;  %v1016_v63 = vld [vmem:[%s3278_s7 + $0x78] sm:$0xff] }
  0x79   :  { %775 = vmatpush1.msra.mxu0 %v235_v40  ;;  %2039 = vmatprep.subr.mxu1 %v2058_v31  ;;  %v1075_v40 = vld [vmem:[%s3278_s7 + $0x250] sm:$0xff] }
  0x7a   :  { %776 = vmatprep.subr.mxu0 %v2058_v31  ;;  %2040 = vmatpush3.msra.mxu1 %v829_v0  ;;  %v1020_v0 = vld [vmem:[%s3278_s7 + $0x98] sm:$0xff] }
  0x7b   :  { %777 = vmatpush1.msra.mxu0 %v234_v41  ;;  %2041 = vmatprep.mubr.msk.f32.mxu1 %vm2059_vm1, %v2058_v31  ;;  %v1062_v41 = vld [vmem:[%s3278_s7 + $0x1e8] sm:$0xff] }
  0x7c   :  { %778 = vmatprep.subr.mxu0 %v2058_v31  ;;  %2044 = vmatprep.subr.mxu1 %v2058_v31 }
  0x7d   :  { %779 = vmatpush1.msra.mxu0 %v233_v42  ;;  %v1061_v42 = vld [vmem:[%s3278_s7 + $0x1e0] sm:$0xff] }
  0x7e   :  { %780 = vmatprep.subr.mxu0 %v2058_v31 }
  0x7f   :  { %781 = vmatpush1.msra.mxu0 %v232_v43  ;;  %v1048_v43 = vld [vmem:[%s3278_s7 + $0x178] sm:$0xff] }
  0x80   :  { %782 = vmatprep.subr.mxu0 %v2058_v31 }
  0x81   :  { %783 = vmatpush1.msra.mxu0 %v231_v44  ;;  %v1047_v44 = vld [vmem:[%s3278_s7 + $0x170] sm:$0xff] }
  0x82   :  { %784 = vmatprep.subr.mxu0 %v2058_v31 }
  0x83   :  { %785 = vmatpush1.msra.mxu0 %v230_v45  ;;  %v1034_v45 = vld [vmem:[%s3278_s7 + $0x108] sm:$0xff] }
  0x84   :  { %786 = vmatprep.subr.mxu0 %v2058_v31 }
  0x85   :  { %787 = vmatpush1.msra.mxu0 %v229_v46  ;;  %v1033_v46 = vld [vmem:[%s3278_s7 + $0x100] sm:$0xff] }
  0x86   :  { %788 = vmatprep.subr.mxu0 %v2058_v31 }
  0x87   :  { %789 = vmatpush1.msra.mxu0 %v228_v47  ;;  %v1792_v47 = vld [vmem:[%s3279_s4] ss:$0 sm:$0xff] }
  0x88   :  { %806 = vmatprep.subr.mxu0 %v2058_v31 }
  0x89   :  { %807 = vmatpush2.msra.mxu0 %v251_v49 }
  0x8a   :  { %808 = vmatprep.subr.mxu0 %v2058_v31 }
  0x8b   :  { %809 = vmatpush2.msra.mxu0 %v250_v50 }
  0x8c   :  { %810 = vmatprep.subr.mxu0 %v2058_v31 }
  0x8d   :  { %811 = vmatpush2.msra.mxu0 %v249_v51  ;;  %v1099_v51 = vld [vmem:[%s3278_s7 + $0x310] sm:$0xff] }
  0x8e   :  { %812 = vmatprep.subr.mxu0 %v2058_v31 }
  0x8f   :  { %813 = vmatpush2.msra.mxu0 %v248_v52 }
  0x90   :  { %814 = vmatprep.subr.mxu0 %v2058_v31 }
  0x91   :  { %815 = vmatpush2.msra.mxu0 %v247_v53  ;;  %v1086_v53 = vld [vmem:[%s3278_s7 + $0x2a8] sm:$0xff] }
  0x92   :  { %816 = vmatprep.subr.mxu0 %v2058_v31 }
  0x93   :  { %817 = vmatpush2.msra.mxu0 %v246_v54  ;;  %v1085_v54 = vld [vmem:[%s3278_s7 + $0x2a0] sm:$0xff] }
  0x94   :  { %818 = vmatprep.subr.mxu0 %v2058_v31 }
  0x95   :  { %819 = vmatpush2.msra.mxu0 %v245_v55  ;;  %v1072_v55 = vld [vmem:[%s3278_s7 + $0x238] sm:$0xff] }
  0x96   :  { %820 = vmatprep.subr.mxu0 %v2058_v31 }
  0x97   :  { %821 = vmatpush2.msra.mxu0 %v244_v56  ;;  %v1071_v56 = vld [vmem:[%s3278_s7 + $0x230] sm:$0xff] }
  0x98   :  { %823 = vmatmul.mubr.f32.vlgmr.msra.gmra.mxu0 %v2706_v26  ;;  %1348 = vmatprep.subr.mxu0 %v1104_v34  ;;  %v1038_v34 = vld [vmem:[%s3278_s7 + $0x128] sm:$0xff] }
  0x99   :  { %1396 = vmatprep.mubr.f32.mxu0 %v2058_v31  ;;  %1349 = vmatpush1.msra.mxu0 %v1103_v35  ;;  %v1031_v35 = vld [vmem:[%s3278_s7 + $0xf0] sm:$0xff] }
  0x9a   :  { %1350 = vmatprep.subr.mxu0 %v1090_v36  ;;  %v1037_v36 = vld [vmem:[%s3278_s7 + $0x120] sm:$0xff] }
  0x9b   :  { %1351 = vmatpush1.msra.mxu0 %v1089_v37  ;;  %v1018_v37 = vld [vmem:[%s3278_s7 + $0x88] sm:$0xff] }
  0x9c   :  { %1352 = vmatprep.subr.mxu0 %v1076_v38  ;;  %v1024_v38 = vld [vmem:[%s3278_s7 + $0xb8] sm:$0xff] }
  0x9d   :  { %1353 = vmatpush1.msra.mxu0 %v1075_v40  ;;  %v1017_v40 = vld [vmem:[%s3278_s7 + $0x80] sm:$0xff] }
  0x9e   :  { %1354 = vmatprep.subr.mxu0 %v1062_v41  ;;  %v1023_v41 = vld [vmem:[%s3278_s7 + $0xb0] sm:$0xff] }
  0x9f   :  { %1355 = vmatpush1.msra.mxu0 %v1061_v42  ;;  %v1004_v42 = vld [vmem:[%s3278_s7 + $0x18] sm:$0xff] }
  0xa0   :  { %1356 = vmatprep.subr.mxu0 %v1048_v43  ;;  %v1010_v43 = vld [vmem:[%s3278_s7 + $0x48] sm:$0xff] }
  0xa1   :  { %1357 = vmatpush1.msra.mxu0 %v1047_v44  ;;  %v1003_v44 = vld [vmem:[%s3278_s7 + $0x10] sm:$0xff] }
  0xa2   :  { %1358 = vmatprep.subr.mxu0 %v1034_v45  ;;  %v1009_v45 = vld [vmem:[%s3278_s7 + $0x40] sm:$0xff] }
  0xa3   :  { %1359 = vmatpush1.msra.mxu0 %v1033_v46  ;;  %v1106_v46 = vld [vmem:[%s3278_s7 + $0x348] sm:$0xff] }
  0xa4   :  { %1360 = vmatprep.subr.mxu0 %v1020_v0  ;;  %v1056_v0 = vld [vmem:[%s3278_s7 + $0x1b8] sm:$0xff] }
  0xe2   :  { %v1835_v1 = vpop.f32.mrf.mxu0 }
  0xe4   :  { %v1836_v2 = vpop.f32.mrf.mxu0 }
  0xe5   :  { %v1870_v3 = vpop.f32.mrf.mxu1  ;;  %v1837_v5 = vadd.f32 %v1836_v2, %v1835_v1  ;;  %v1015_v1 = vld [vmem:[%s3278_s7 + $0x70] sm:$0xff] }
  0xe6   :  { %v1019_v2 = vld [vmem:[%s3278_s7 + $0x90] sm:$0xff] }
  0xe7   :  { %v1871_v7 = vpop.f32.mrf.mxu1  ;;  %v405_v10 = vadd.f32 %v1837_v5, %v1789_v6  ;;  %1361 = vmatpush1.msra.mxu0 %v1019_v2  ;;  %v1001_v5 = vld [vmem:[%s3278_s7] sm:$0xff]  ;;  %v1055_v2 = vld [vmem:[%s3278_s7 + $0x1b0] sm:$0xff] }
  0xe8   :  { %v1872_v11 = vadd.f32 %v1871_v7, %v1870_v3  ;;  %v1002_v3 = vld [vmem:[%s3278_s7 + $0x8] sm:$0xff]  ;;  %v1005_v6 = vld [vmem:[%s3278_s7 + $0x20] sm:$0xff] }
  0xe9   :  { %v1102_v7 = vld [vmem:[%s3278_s7 + $0x328] sm:$0xff] }
  0xea   :  { %v475_v15 = vadd.f32 %v1872_v11, %v405_v10 }
 0x104   :  { %v1905_v4 = vpop.f32.mrf.mxu0 }
 0x106   :  { %v1906_v8 = vpop.f32.mrf.mxu0 }
 0x107   :  { %v1940_v9 = vpop.f32.mrf.mxu1  ;;  %v1907_v13 = vadd.f32 %v1906_v8, %v1905_v4  ;;  %v1006_v4 = vld [vmem:[%s3278_s7 + $0x28] sm:$0xff]  ;;  %v1108_v8 = vld [vmem:[%s3278_s7 + $0x358] sm:$0xff] }
 0x108   :  { %1362 = vmatprep.subr.mxu0 %v1006_v4  ;;  %v1042_v4 = vld [vmem:[%s3278_s7 + $0x148] sm:$0xff] }
 0x109   :  { %v1941_v14 = vpop.f32.mrf.mxu1  ;;  %v545_v18 = vadd.f32 %v1907_v13, %v475_v15  ;;  %1363 = vmatpush1.msra.mxu0 %v1005_v6  ;;  %v1107_v15 = vld [vmem:[%s3278_s7 + $0x350] sm:$0xff]  ;;  %v1041_v6 = vld [vmem:[%s3278_s7 + $0x140] sm:$0xff] }
 0x10a   :  { %v1942_v19 = vadd.f32 %v1941_v14, %v1940_v9  ;;  %1490 = vmatprep.subr.mxu0 %v1108_v8  ;;  %v1794_v9 = vld [vmem:[%s3280_s6] ss:$0 sm:$0xff]  ;;  %v1028_v8 = vld [vmem:[%s3278_s7 + $0xd8] sm:$0xff] }
 0x10b   :  { %v1101_v14 = vld [vmem:[%s3278_s7 + $0x320] sm:$0xff] }
 0x10c   :  { %v615_v22 = vadd.f32 %v1942_v19, %v545_v18  ;;  %v1087_v18 = vld [vmem:[%s3278_s7 + $0x2b0] sm:$0xff]  ;;  %v1093_v19 = vld [vmem:[%s3278_s7 + $0x2e0] sm:$0xff] }
 0x126   :  { %v1975_v12 = vpop.f32.mrf.mxu0 }
 0x128   :  { %v1976_v16 = vpop.f32.mrf.mxu0 }
 0x129   :  { %v2010_v17 = vpop.f32.mrf.mxu1  ;;  %v1977_v20 = vadd.f32 %v1976_v16, %v1975_v12  ;;  %v1088_v16 = vld [vmem:[%s3278_s7 + $0x2b8] sm:$0xff] }
 0x12b   :  { %v2011_v21 = vpop.f32.mrf.mxu1  ;;  %v685_v23 = vadd.f32 %v1977_v20, %v615_v22  ;;  %v1074_v20 = vld [vmem:[%s3278_s7 + $0x248] sm:$0xff]  ;;  %v1073_v22 = vld [vmem:[%s3278_s7 + $0x240] sm:$0xff] }
 0x12c   :  { %v2012_v24 = vadd.f32 %v2011_v21, %v2010_v17  ;;  %v1094_v17 = vld [vmem:[%s3278_s7 + $0x2e8] sm:$0xff]  ;;  %v1080_v21 = vld [vmem:[%s3278_s7 + $0x278] sm:$0xff] }
 0x12e   :  { %v755_v25 = vadd.f32 %v2012_v24, %v685_v23  ;;  %v1079_v23 = vld [vmem:[%s3278_s7 + $0x270] sm:$0xff]  ;;  %v1060_v24 = vld [vmem:[%s3278_s7 + $0x1d8] sm:$0xff] }
 0x158   :  { %v824_v26 = vpop.f32.mrf.mxu0 }
 0x159   :  { %v825_v27 = vadd.f32 %v824_v26, %v755_v25  ;;  %v1066_v25 = vld [vmem:[%s3278_s7 + $0x208] sm:$0xff]  ;;  %v1059_v26 = vld [vmem:[%s3278_s7 + $0x1d0] sm:$0xff] }
 0x15a   :  { %v826_v28 = vpop.f32.mrf.mxu0 }
 0x15b   :  { %v828_v29 = vmax.f32 %v825_v27, 0.0  ;;  %v1065_v27 = vld [vmem:[%s3278_s7 + $0x200] sm:$0xff]  ;;  %v1046_v28 = vld [vmem:[%s3278_s7 + $0x168] sm:$0xff] }
 0x15d   :  { %2042 = vmatmul.mubr.msk.f32.vlgmr.msra.gmra.mxu1 %vm335_vm0, %v828_v29  ;;  %v1052_v29 = vld [vmem:[%s3278_s7 + $0x198] sm:$0xff] }
 0x15e   :  { %2045 = vmatpush3.msra.mxu1 %v918_v30  ;;  %2048 = vmatprep.mubr.msk.f32.mxu1 %vm2059_vm1, %v2058_v31  ;;  %v1045_v30 = vld [vmem:[%s3278_s7 + $0x160] sm:$0xff] }
 0x15f   :  { %2046 = vmatprep.subr.mxu1 %v2058_v31 }
 0x160   :  { %2047 = vmatpush3.msra.mxu1 %v917_v32  ;;  %v1051_v32 = vld [vmem:[%s3278_s7 + $0x190] sm:$0xff] }
 0x161   :  { %1206 = vmatprep.subr.mxu1 %v1100_v33  ;;  %v1032_v33 = vld [vmem:[%s3278_s7 + $0xf8] sm:$0xff] }
 0x21d   :  { %v913_v49 = vpop.f32.mrf.mxu1 }
 0x21e   :  { %v914_v50 = vadd.f32 %v1792_v47, %v913_v49  ;;  %v1112_v47 = vld [vmem:[%s3278_s7 + $0x378] sm:$0xff]  ;;  %v1105_v49 = vld [vmem:[%s3278_s7 + $0x340] sm:$0xff] }
 0x21f   :  { %v2043_v52 = vpop.f32.mrf.mxu1 }
 0x220   :  { %2049 = vmatmul.mubr.msk.f32.vlgmr.msra.gmra.mxu1 %vm926_vm2, %v914_v50  ;;  %v1111_v50 = vld [vmem:[%s3278_s7 + $0x370] sm:$0xff]  ;;  %v1098_v52 = vld [vmem:[%s3278_s7 + $0x308] sm:$0xff] }
 0x221   :  { %1207 = vmatpush1.msra.mxu1 %v1099_v51  ;;  %1254 = vmatprep.mubr.f32.mxu1 %v2058_v31  ;;  %v1092_v51 = vld [vmem:[%s3278_s7 + $0x2d8] sm:$0xff] }
 0x222   :  { %1208 = vmatprep.subr.mxu1 %v1086_v53  ;;  %v1091_v53 = vld [vmem:[%s3278_s7 + $0x2d0] sm:$0xff] }
 0x223   :  { %1209 = vmatpush1.msra.mxu1 %v1085_v54  ;;  %v1097_v54 = vld [vmem:[%s3278_s7 + $0x300] sm:$0xff] }
 0x224   :  { %1210 = vmatprep.subr.mxu1 %v1072_v55  ;;  %v1078_v55 = vld [vmem:[%s3278_s7 + $0x268] sm:$0xff] }
 0x225   :  { %1211 = vmatpush1.msra.mxu1 %v1071_v56  ;;  %v1084_v56 = vld [vmem:[%s3278_s7 + $0x298] sm:$0xff] }
 0x226   :  { %1212 = vmatprep.subr.mxu1 %v1058_v57  ;;  %v1077_v57 = vld [vmem:[%s3278_s7 + $0x260] sm:$0xff] }
 0x227   :  { %1213 = vmatpush1.msra.mxu1 %v1057_v58  ;;  %v1083_v58 = vld [vmem:[%s3278_s7 + $0x290] sm:$0xff] }
 0x228   :  { %1214 = vmatprep.subr.mxu1 %v1044_v59  ;;  %v1064_v59 = vld [vmem:[%s3278_s7 + $0x1f8] sm:$0xff] }
 0x229   :  { %1215 = vmatpush1.msra.mxu1 %v1043_v60  ;;  %v1070_v60 = vld [vmem:[%s3278_s7 + $0x228] sm:$0xff] }
 0x22a   :  { %1216 = vmatprep.subr.mxu1 %v1030_v61  ;;  %v1063_v61 = vld [vmem:[%s3278_s7 + $0x1f0] sm:$0xff] }
 0x22b   :  { %1217 = vmatpush1.msra.mxu1 %v1029_v62  ;;  %v1069_v62 = vld [vmem:[%s3278_s7 + $0x220] sm:$0xff] }
 0x22c   :  { %1218 = vmatprep.subr.mxu1 %v1016_v63  ;;  %v1050_v63 = vld [vmem:[%s3278_s7 + $0x188] sm:$0xff] }
 0x22d   :  { %1219 = vmatpush1.msra.mxu1 %v1015_v1  ;;  %v1049_v1 = vld [vmem:[%s3278_s7 + $0x180] sm:$0xff] }
 0x22e   :  { %1220 = vmatprep.subr.mxu1 %v1002_v3  ;;  %v1036_v3 = vld [vmem:[%s3278_s7 + $0x118] sm:$0xff] }
 0x22f   :  { %1221 = vmatpush1.msra.mxu1 %v1001_v5  ;;  %v1035_v5 = vld [vmem:[%s3278_s7 + $0x110] sm:$0xff] }
 0x230   :  { %1277 = vmatprep.subr.mxu1 %v1102_v7  ;;  %v1022_v7 = vld [vmem:[%s3278_s7 + $0xa8] sm:$0xff] }
 0x2e0   :  { %v996_v10 = vpop.f32.mrf.mxu1 }
 0x2e1   :  { %v997_v11 = vadd.f32 %v1794_v9, %v996_v10  ;;  %v1021_v9 = vld [vmem:[%s3278_s7 + $0xa0] sm:$0xff]  ;;  %v1027_v10 = vld [vmem:[%s3278_s7 + $0xd0] sm:$0xff] }
 0x2e2   :  { %v2050_v12 = vpop.f32.mrf.mxu1 }
 0x2e3   :  { %v2969_v13 = vmax.f32 %v997_v11, 0.0  ;;  %v1008_v11 = vld [vmem:[%s3278_s7 + $0x38] sm:$0xff]  ;;  %v1014_v12 = vld [vmem:[%s3278_s7 + $0x68] sm:$0xff] }
 0x2e5   :  { %1796 = vmatmul.mubr.msk.f32.vlgmr.msra.gmra.mxu1 %vm335_vm0, %v2969_v13  ;;  %1798 = vmatmul.mubr.msk.f32.vlgmr.msra.gmra.mxu0 %vm335_vm0, %v2969_v13 }
 0x2e6   :  { %1278 = vmatpush1.msra.mxu1 %v1101_v14  ;;  %1491 = vmatpush1.msra.mxu0 %v1107_v15  ;;  %v1007_v14 = vld [vmem:[%s3278_s7 + $0x30] sm:$0xff]  ;;  %v1013_v15 = vld [vmem:[%s3278_s7 + $0x60] sm:$0xff] }
 0x2e7   :  { %1279 = vmatprep.subr.mxu1 %v1088_v16  ;;  %1492 = vmatprep.subr.mxu0 %v1094_v17  ;;  %v1110_v16 = vld [vmem:[%s3278_s7 + $0x368] sm:$0xff]  ;;  %v1109_v17 = vld [vmem:[%s3278_s7 + $0x360] sm:$0xff] }
 0x2e8   :  { %1280 = vmatpush1.msra.mxu1 %v1087_v18  ;;  %1493 = vmatpush1.msra.mxu0 %v1093_v19  ;;  %v1096_v18 = vld [vmem:[%s3278_s7 + $0x2f8] sm:$0xff]  ;;  %v1095_v19 = vld [vmem:[%s3278_s7 + $0x2f0] sm:$0xff] }
 0x2e9   :  { %1281 = vmatprep.subr.mxu1 %v1074_v20  ;;  %1494 = vmatprep.subr.mxu0 %v1080_v21  ;;  %v1082_v20 = vld [vmem:[%s3278_s7 + $0x288] sm:$0xff]  ;;  %v1081_v21 = vld [vmem:[%s3278_s7 + $0x280] sm:$0xff] }
 0x2ea   :  { %1282 = vmatpush1.msra.mxu1 %v1073_v22  ;;  %1495 = vmatpush1.msra.mxu0 %v1079_v23  ;;  %v1068_v22 = vld [vmem:[%s3278_s7 + $0x218] sm:$0xff]  ;;  %v1067_v23 = vld [vmem:[%s3278_s7 + $0x210] sm:$0xff] }
 0x2eb   :  { %1283 = vmatprep.subr.mxu1 %v1060_v24  ;;  %1496 = vmatprep.subr.mxu0 %v1066_v25  ;;  %v1054_v24 = vld [vmem:[%s3278_s7 + $0x1a8] sm:$0xff]  ;;  %v1040_v25 = vld [vmem:[%s3278_s7 + $0x138] sm:$0xff] }
 0x2ec   :  { %1284 = vmatpush1.msra.mxu1 %v1059_v26  ;;  %1497 = vmatpush1.msra.mxu0 %v1065_v27  ;;  %v1039_v26 = vld [vmem:[%s3278_s7 + $0x130] sm:$0xff]  ;;  %v1026_v27 = vld [vmem:[%s3278_s7 + $0xc8] sm:$0xff] }
 0x2ed   :  { %1285 = vmatprep.subr.mxu1 %v1046_v28  ;;  %1498 = vmatprep.subr.mxu0 %v1052_v29  ;;  %v1025_v28 = vld [vmem:[%s3278_s7 + $0xc0] sm:$0xff]  ;;  %v1012_v29 = vld [vmem:[%s3278_s7 + $0x58] sm:$0xff] }
 0x2ee   :  { %1286 = vmatpush1.msra.mxu1 %v1045_v30  ;;  %1499 = vmatpush1.msra.mxu0 %v1051_v32  ;;  %v1011_v30 = vld [vmem:[%s3278_s7 + $0x50] sm:$0xff]  ;;  %v1123_v32 = vsub.s32 1, %v2215_v39 }
 0x2ef   :  { %1287 = vmatprep.subr.mxu1 %v1032_v33  ;;  %1500 = vmatprep.subr.mxu0 %v1038_v34  ;;  %v1119_v34 = vsub.s32 0, %v2215_v39 }
 0x2f0   :  { %1288 = vmatpush1.msra.mxu1 %v1031_v35  ;;  %1501 = vmatpush1.msra.mxu0 %v1037_v36  ;;  %v1113_v35 = vld [vmem:[%s3281_s8] sm:$0xff] }
 0x2f1   :  { %1289 = vmatprep.subr.mxu1 %v1018_v37  ;;  %1502 = vmatprep.subr.mxu0 %v1024_v38  ;;  %v1124_v36 = vrot.slane %v1113_v35, %v1123_v32  ;;  %v1127_v37 = vsub.s32 2, %v2215_v39 }
 0x2f2   :  { %1290 = vmatpush1.msra.mxu1 %v1017_v40  ;;  %1503 = vmatpush1.msra.mxu0 %v1023_v41  ;;  %v1120_v40 = vrot.slane %v1113_v35, %v1119_v34 }
 0x2f3   :  { %1291 = vmatprep.subr.mxu1 %v1004_v42  ;;  %1504 = vmatprep.subr.mxu0 %v1010_v43  ;;  %v1128_v42 = vrot.slane %v1113_v35, %v1127_v37 }
 0x2f4   :  { %1292 = vmatpush1.msra.mxu1 %v1003_v44  ;;  %1325 = vmatprep.mubr.f32.mxu1 %v2058_v31 }
 0x2f5   :  { %1505 = vmatpush1.msra.mxu0 %v1009_v45  ;;  %1538 = vmatprep.mubr.f32.mxu0 %v2058_v31 }
 0x2f6   :  { %1797 = vmatmul.mubr.msk.f32.vlgmr.msra.gmra.mxu1 %vm335_vm0, %v2969_v13  ;;  %1419 = vmatprep.subr.mxu1 %v1106_v46 }
 0x2f7   :  { %1800 = vmatmul.mubr.msk.f32.vlgmr.msra.gmra.mxu0 %vm335_vm0, %v2969_v13  ;;  %1632 = vmatprep.subr.mxu0 %v1112_v47 }
 0x2f8   :  { %1420 = vmatpush1.msra.mxu1 %v1105_v49  ;;  %1633 = vmatpush1.msra.mxu0 %v1111_v50 }
 0x2f9   :  { %1421 = vmatprep.subr.mxu1 %v1092_v51  ;;  %1634 = vmatprep.subr.mxu0 %v1098_v52 }
 0x2fa   :  { %1422 = vmatpush1.msra.mxu1 %v1091_v53  ;;  %1635 = vmatpush1.msra.mxu0 %v1097_v54 }
 0x2fb   :  { %1423 = vmatprep.subr.mxu1 %v1078_v55  ;;  %1636 = vmatprep.subr.mxu0 %v1084_v56  ;;  %v1139_v56 = vsub.s32 5, %v2215_v39 }
 0x2fc   :  { %1424 = vmatpush1.msra.mxu1 %v1077_v57  ;;  %1637 = vmatpush1.msra.mxu0 %v1083_v58  ;;  %v1135_v58 = vsub.s32 4, %v2215_v39 }
 0x2fd   :  { %1425 = vmatprep.subr.mxu1 %v1064_v59  ;;  %1638 = vmatprep.subr.mxu0 %v1070_v60 }
 0x2fe   :  { %1426 = vmatpush1.msra.mxu1 %v1063_v61  ;;  %1639 = vmatpush1.msra.mxu0 %v1069_v62  ;;  %v1140_v61 = vrot.slane %v1113_v35, %v1139_v56 }
 0x2ff   :  { %1427 = vmatprep.subr.mxu1 %v1050_v63  ;;  %1640 = vmatprep.subr.mxu0 %v1056_v0  ;;  %v1143_v0 = vsub.s32 6, %v2215_v39 }
 0x300   :  { %1428 = vmatpush1.msra.mxu1 %v1049_v1  ;;  %1641 = vmatpush1.msra.mxu0 %v1055_v2  ;;  %v1136_v1 = vrot.slane %v1113_v35, %v1135_v58 }
 0x301   :  { %1429 = vmatprep.subr.mxu1 %v1036_v3  ;;  %1642 = vmatprep.subr.mxu0 %v1042_v4  ;;  %v1147_v3 = vsub.s32 7, %v2215_v39 }
 0x302   :  { %1430 = vmatpush1.msra.mxu1 %v1035_v5  ;;  %1643 = vmatpush1.msra.mxu0 %v1041_v6  ;;  %v1114_v5 = vld [vmem:[%s3281_s8 + $0x8] sm:$0x3f]  ;;  %v1144_v6 = vrot.slane %v1113_v35, %v1143_v0 }
 0x303   :  { %1431 = vmatprep.subr.mxu1 %v1022_v7  ;;  %1644 = vmatprep.subr.mxu0 %v1028_v8  ;;  %v1168_v7 = vrot.slane %v1114_v5, %v1135_v58 }
 0x304   :  { %1432 = vmatpush1.msra.mxu1 %v1021_v9  ;;  %1645 = vmatpush1.msra.mxu0 %v1027_v10  ;;  %v1148_v10 = vrot.slane %v1113_v35, %v1147_v3 }
 0x305   :  { %1433 = vmatprep.subr.mxu1 %v1008_v11  ;;  %1646 = vmatprep.subr.mxu0 %v1014_v12  ;;  %v1172_v12 = vrot.slane %v1114_v5, %v1139_v56 }
 0x306   :  { %1434 = vmatpush1.msra.mxu1 %v1007_v14  ;;  %1467 = vmatprep.mubr.f32.mxu1 %v2058_v31 }
 0x307   :  { %1647 = vmatpush1.msra.mxu0 %v1013_v15  ;;  %1680 = vmatprep.mubr.f32.mxu0 %v2058_v31 }
 0x308   :  { %1799 = vmatmul.mubr.msk.f32.vlgmr.msra.gmra.mxu1 %vm335_vm0, %v2969_v13  ;;  %1561 = vmatprep.subr.mxu1 %v1110_v16 }
 0x309   :  { %1802 = vmatmul.mubr.msk.f32.vlgmr.msra.gmra.mxu0 %vm335_vm0, %v2969_v13  ;;  %1562 = vmatpush1.msra.mxu1 %v1109_v17 }
 0x30a   :  { %1563 = vmatprep.subr.mxu1 %v1096_v18  ;;  %1609 = vmatprep.mubr.f32.mxu1 %v2058_v31  ;;  %v1053_v31 = vld [vmem:[%s3278_s7 + $0x1a0] sm:$0xff] }
 0x30b   :  { %1564 = vmatpush1.msra.mxu1 %v1095_v19 }
 0x30c   :  { %1565 = vmatprep.subr.mxu1 %v1082_v20 }
 0x30d   :  { %1566 = vmatpush1.msra.mxu1 %v1081_v21 }
 0x30e   :  { %1567 = vmatprep.subr.mxu1 %v1068_v22 }
 0x30f   :  { %1568 = vmatpush1.msra.mxu1 %v1067_v23 }
 0x310   :  { %1569 = vmatprep.subr.mxu1 %v1054_v24 }
 0x311   :  { %1570 = vmatpush1.msra.mxu1 %v1053_v31 }
 0x312   :  { %1571 = vmatprep.subr.mxu1 %v1040_v25 }
 0x313   :  { %1572 = vmatpush1.msra.mxu1 %v1039_v26 }
 0x314   :  { %1573 = vmatprep.subr.mxu1 %v1026_v27 }
 0x315   :  { %1574 = vmatpush1.msra.mxu1 %v1025_v28 }
 0x316   :  { %1575 = vmatprep.subr.mxu1 %v1012_v29 }
 0x317   :  { %1576 = vmatpush1.msra.mxu1 %v1011_v30  ;;  %v1156_v30 = vrot.slane %v1114_v5, %v1123_v32  ;;  %v1160_v32 = vrot.slane %v1114_v5, %v1127_v37 }
 0x318   :  { %1801 = vmatmul.mubr.msk.f32.vlgmr.msra.gmra.mxu1 %vm335_vm0, %v2969_v13  ;;  %v1131_v13 = vsub.s32 3, %v2215_v39 }
 0x31a   :  { %v1132_v44 = vrot.slane %v1113_v35, %v1131_v13 }
 0x3a5   :  { %v1256_v33 = vpop.f32.mrf.mxu1  ;;  %v1398_v55 = vpop.f32.mrf.mxu0 }
 0x3a6   :  { %v1257_v43 = vadd.f32 %v1256_v33, %v1120_v40  ;;  %v1399_v8 = vadd.f32 %v1398_v55, %v1136_v1 }
 0x3a7   :  { %v1258_v38 = vpop.f32.mrf.mxu1  ;;  %v1400_v62 = vpop.f32.mrf.mxu0 }
 0x3a8   :  { %v1259_v41 = vadd.f32 %v1258_v38, %v1124_v36  ;;  %v1687_v50 = vmax.f32 %v1257_v43, 0.0  ;;  %v1401_v4 = vadd.f32 %v1400_v62, %v1140_v61  ;;  %v1691_v19 = vmax.f32 %v1399_v8, 0.0 }
 0x3a9   :  { %v1152_v36 = vrot.slane %v1114_v5, %v1119_v34 }
 0x3aa   :  { %v1688_v46 = vmax.f32 %v1259_v41, 0.0  ;;  %v1692_v14 = vmax.f32 %v1401_v4, 0.0 }
 0x3ac   :  { %v1715_v52 = vcombine.low %v1687_v50, %v1688_v46  ;;  %v1732_v23 = vcombine.low %v1691_v19, %v1692_v14 }
 0x3ae   :  { %v1723_v59 = vrot.slane %v1715_v52, %v2242_v48  ;;  %v1740_v29 = vrot.slane %v1732_v23, %v2242_v48 }
 0x3b6   :  { %v1327_v45 = vpop.f32.mrf.mxu1 }
 0x3b7   :  { %v1328_v47 = vadd.f32 %v1327_v45, %v1128_v42  ;;  %v1540_v2 = vpop.f32.mrf.mxu0  ;;  %v1164_v42 = vrot.slane %v1114_v5, %v1131_v13 }
 0x3b8   :  { %v1329_v49 = vpop.f32.mrf.mxu1  ;;  %v1541_v41 = vadd.f32 %v1540_v2, %v1152_v36 }
 0x3b9   :  { %v1330_v51 = vadd.f32 %v1329_v49, %v1132_v44  ;;  %v1689_v53 = vmax.f32 %v1328_v47, 0.0  ;;  %v1542_v9 = vpop.f32.mrf.mxu0 }
 0x3ba   :  { %v1543_v40 = vadd.f32 %v1542_v9, %v1156_v30  ;;  %v1695_v46 = vmax.f32 %v1541_v41, 0.0 }
 0x3bb   :  { %v1690_v54 = vmax.f32 %v1330_v51, 0.0 }
 0x3bc   :  { %v1696_v44 = vmax.f32 %v1543_v40, 0.0 }
 0x3bd   :  { %v1716_v57 = vcombine.low %v1689_v53, %v1690_v54 }
 0x3be   :  { %v1749_v49 = vcombine.low %v1695_v46, %v1696_v44 }
 0x3bf   :  { %v1730_v60 = vrot.slane %v1716_v57, %v2242_v48 }
 0x3c0   :  { %v1757_v53 = vrot.slane %v1749_v49, %v2242_v48 }
 0x3c1   :  { %v1731_v63 = vcombine.low %v1723_v59, %v1730_v60 }
 0x3c3   :  { %1778 = vst [vmem:[%s3282_s9] sm:$0xff] %v1731_v63 }
 0x3c8   :  { %v1469_v11 = vpop.f32.mrf.mxu1 }
 0x3c9   :  { %v1470_v15 = vadd.f32 %v1469_v11, %v1144_v6  ;;  %v1682_v16 = vpop.f32.mrf.mxu0 }
 0x3ca   :  { %v1683_v17 = vadd.f32 %v1682_v16, %v1168_v7  ;;  %v1471_v18 = vpop.f32.mrf.mxu1 }
 0x3cb   :  { %v1472_v20 = vadd.f32 %v1471_v18, %v1148_v10  ;;  %v1684_v21 = vpop.f32.mrf.mxu0  ;;  %v1693_v24 = vmax.f32 %v1470_v15, 0.0 }
 0x3cc   :  { %v1685_v22 = vadd.f32 %v1684_v21, %v1172_v12  ;;  %v1699_v25 = vmax.f32 %v1683_v17, 0.0 }
 0x3cd   :  { %v1694_v31 = vmax.f32 %v1472_v20, 0.0 }
 0x3ce   :  { %v1700_v26 = vmax.f32 %v1685_v22, 0.0 }
 0x3cf   :  { %v1733_v27 = vcombine.low %v1693_v24, %v1694_v31 }
 0x3d0   :  { %v1766_v28 = vcombine.low %v1699_v25, %v1700_v26 }
 0x3d1   :  { %v1747_v33 = vrot.slane %v1733_v27, %v2242_v48 }
 0x3d2   :  { %v1773_v35 = vrot.slane %v1766_v28, %v2242_v48 }
 0x3d3   :  { %v1748_v38 = vcombine.low %v1740_v29, %v1747_v33 }
 0x3d4   :  { %1784 = vst.msk [vmem:[%s3282_s9 + $0x18] sm:$0xf] %vm1783_vm5, %v1773_v35 }
 0x3d5   :  { %1779 = vst [vmem:[%s3282_s9 + $0x8] sm:$0xff] %v1748_v38 }
 0x3d8   :  { %v1611_v43 = vpop.f32.mrf.mxu1 }
 0x3d9   :  { %v1612_v34 = vadd.f32 %v1611_v43, %v1160_v32 }
 0x3da   :  { %v1613_v45 = vpop.f32.mrf.mxu1 }
 0x3db   :  { %v1614_v47 = vadd.f32 %v1613_v45, %v1164_v42  ;;  %v1697_v50 = vmax.f32 %v1612_v34, 0.0 }
 0x3dd   :  { %v1698_v51 = vmax.f32 %v1614_v47, 0.0 }
 0x3df   :  { %v1750_v52 = vcombine.low %v1697_v50, %v1698_v51 }
 0x3e1   :  { %v1764_v54 = vrot.slane %v1750_v52, %v2242_v48 }
 0x3e3   :  { %v1765_v55 = vcombine.low %v1757_v53, %v1764_v54 }
 0x3e5   :  { %1780 = vst [vmem:[%s3282_s9 + $0x10] sm:$0xff] %v1765_v55 }

// kernel: ae_forward.3
= control target key start
LH: loop header
LB: loop body
LE: loop exit
PB: predicated region body
PF: predicated region fallthrough
CT: control target
= control target key end

     0   :  { %v4362_v0 = vmov 0.0   ;;  %vm61_vm0 = vcmask 1040384   ;;  %vm57_vm1 = vcmask 203776   ;;  %vm242_vm2 = vcmask 48128   ;;  %s5900_s1 = inlined_call_operand.vmem [shape: f32[3,153,76], index: 1, kind: input, shape index: {}]   ;;  %s5901_s0 = inlined_call_operand.vmem [shape: f32[6,153], index: 0, kind: input, shape index: {}]   ;;  %s5902_s2 = inlined_call_operand.vmem [shape: f32[3,48,6], index: 2, kind: input, shape index: {}]   ;;  %s5903_s3 = inlined_call_operand.vmem [shape: f32[48,1], index: 3, kind: input, shape index: {}]   ;;  %s5904_s6 = inlined_call_operand.vmem [shape: f32[96,1], index: 6, kind: input, shape index: {}]   ;;  %s5905_s9 = inlined_call_operand.vmem [shape: f32[192,1], index: 9, kind: input, shape index: {}]   ;;  %s5906_s4 = inlined_call_operand.vmem [shape: f32[3,76,37], index: 4, kind: input, shape index: {}]   ;;  %s5907_s5 = inlined_call_operand.vmem [shape: f32[3,96,48], index: 5, kind: input, shape index: {}]   ;;  %s5908_s7 = inlined_call_operand.vmem [shape: f32[3,37,18], index: 7, kind: input, shape index: {}]   ;;  %s5909_s8 = inlined_call_operand.vmem [shape: f32[3,192,96], index: 8, kind: input, shape index: {}]   ;;  %s5910_s10 = inlined_call_operand.vmem [shape: f32[192,18], index: 10, kind: output, shape index: {}]  }
   0x1   :  { %65 = vmatprep.subr.mxu0 %v4362_v0  ;;  %165 = vmatprep.subr.mxu1 %v4362_v0  ;;  %v52_v1 = vld [vmem:[%s5900_s1 + $0x78] sm:$0xff]  ;;  %v51_v3 = vld [vmem:[%s5900_s1 + $0x70] sm:$0xff]  ;;  %v50_v5 = vld [vmem:[%s5900_s1 + $0x68] sm:$0xff]  ;;  %vm261_vm3 = vcmask 1045504   ;;  %vm776_vm4 = vcmask 1043456   ;;  %vm757_vm5 = vcmask 621568  }
   0x2   :  { %v3270_v2 = vld [vmem:[%s5900_s1 + $0x118] sm:$0xff]  ;;  %66 = vmatpush1.msra.mxu0 %v52_v1  ;;  %v3269_v4 = vld [vmem:[%s5900_s1 + $0x110] sm:$0xff]  ;;  %v3268_v6 = vld [vmem:[%s5900_s1 + $0x108] sm:$0xff]  ;;  %vm1009_vm6 = vcmask 392192   ;;  %vm1765_vm7 = vcmask 1044480   ;;  %vm1728_vm8 = vcmask 302080  }
   0x3   :  { %166 = vmatpush1.msra.mxu1 %v3270_v2  ;;  %67 = vmatprep.subr.mxu0 %v4362_v0  ;;  %v49_v7 = vld [vmem:[%s5900_s1 + $0x60] sm:$0xff]  ;;  %v48_v9 = vld [vmem:[%s5900_s1 + $0x58] sm:$0xff]  ;;  %v47_v11 = vld [vmem:[%s5900_s1 + $0x50] sm:$0xff]  ;;  %vm2077_vm9 = vcmask 785408   ;;  %vm3224_vm10 = vcmask 146432  }
   0x4   :  { %167 = vmatprep.subr.mxu1 %v4362_v0  ;;  %68 = vmatpush1.msra.mxu0 %v51_v3  ;;  %v3267_v8 = vld [vmem:[%s5900_s1 + $0x100] sm:$0xff]  ;;  %v3266_v10 = vld [vmem:[%s5900_s1 + $0xf8] sm:$0xff]  ;;  %v3265_v12 = vld [vmem:[%s5900_s1 + $0xf0] sm:$0xff] }
   0x5   :  { %168 = vmatpush1.msra.mxu1 %v3269_v4  ;;  %69 = vmatprep.subr.mxu0 %v4362_v0  ;;  %v46_v13 = vld [vmem:[%s5900_s1 + $0x48] sm:$0xff]  ;;  %v45_v15 = vld [vmem:[%s5900_s1 + $0x40] sm:$0xff]  ;;  %v44_v17 = vld [vmem:[%s5900_s1 + $0x38] sm:$0xff] }
   0x6   :  { %169 = vmatprep.subr.mxu1 %v4362_v0  ;;  %70 = vmatpush1.msra.mxu0 %v50_v5  ;;  %v3264_v14 = vld [vmem:[%s5900_s1 + $0xe8] sm:$0xff]  ;;  %v3263_v16 = vld [vmem:[%s5900_s1 + $0xe0] sm:$0xff]  ;;  %v3262_v18 = vld [vmem:[%s5900_s1 + $0xd8] sm:$0xff] }
   0x7   :  { %170 = vmatpush1.msra.mxu1 %v3268_v6  ;;  %71 = vmatprep.subr.mxu0 %v4362_v0  ;;  %v43_v19 = vld [vmem:[%s5900_s1 + $0x30] sm:$0xff]  ;;  %v42_v21 = vld [vmem:[%s5900_s1 + $0x28] sm:$0xff]  ;;  %v41_v23 = vld [vmem:[%s5900_s1 + $0x20] sm:$0xff] }
   0x8   :  { %171 = vmatprep.subr.mxu1 %v4362_v0  ;;  %72 = vmatpush1.msra.mxu0 %v49_v7  ;;  %v3261_v20 = vld [vmem:[%s5900_s1 + $0xd0] sm:$0xff]  ;;  %v3260_v22 = vld [vmem:[%s5900_s1 + $0xc8] sm:$0xff]  ;;  %v3259_v24 = vld [vmem:[%s5900_s1 + $0xc0] sm:$0xff] }
   0x9   :  { %172 = vmatpush1.msra.mxu1 %v3267_v8  ;;  %73 = vmatprep.subr.mxu0 %v4362_v0  ;;  %v40_v25 = vld [vmem:[%s5900_s1 + $0x18] sm:$0xff]  ;;  %v39_v27 = vld [vmem:[%s5900_s1 + $0x10] sm:$0xff]  ;;  %v38_v29 = vld [vmem:[%s5900_s1 + $0x8] sm:$0xff] }
   0xa   :  { %173 = vmatprep.subr.mxu1 %v4362_v0  ;;  %74 = vmatpush1.msra.mxu0 %v48_v9  ;;  %v3258_v26 = vld [vmem:[%s5900_s1 + $0xb8] sm:$0xff]  ;;  %v3257_v28 = vld [vmem:[%s5900_s1 + $0xb0] sm:$0xff]  ;;  %v3256_v30 = vld [vmem:[%s5900_s1 + $0xa8] sm:$0xff] }
   0xb   :  { %174 = vmatpush1.msra.mxu1 %v3266_v10  ;;  %75 = vmatprep.subr.mxu0 %v4362_v0  ;;  %v37_v31 = vld [vmem:[%s5900_s1] sm:$0xff]  ;;  %v56_v33 = vld [vmem:[%s5900_s1 + $0x98] sm:$0x1]  ;;  %v55_v35 = vld [vmem:[%s5900_s1 + $0x90] sm:$0xff] }
   0xc   :  { %175 = vmatprep.subr.mxu1 %v4362_v0  ;;  %76 = vmatpush1.msra.mxu0 %v47_v11  ;;  %v3255_v32 = vld [vmem:[%s5900_s1 + $0xa0] sm:$0xff]  ;;  %v3274_v34 = vld [vmem:[%s5900_s1 + $0x138] sm:$0x1]  ;;  %v3273_v36 = vld [vmem:[%s5900_s1 + $0x130] sm:$0xff] }
   0xd   :  { %176 = vmatpush1.msra.mxu1 %v3265_v12  ;;  %77 = vmatprep.subr.mxu0 %v4362_v0  ;;  %v54_v37 = vld [vmem:[%s5900_s1 + $0x88] sm:$0xff]  ;;  %v53_v39 = vld [vmem:[%s5900_s1 + $0x80] sm:$0xff]  ;;  %v3277_v43 = vld [vmem:[%s5902_s2 + $0x30] sm:$0xff] }
   0xe   :  { %177 = vmatprep.subr.mxu1 %v4362_v0  ;;  %78 = vmatpush1.msra.mxu0 %v46_v13  ;;  %v3272_v38 = vld [vmem:[%s5900_s1 + $0x128] sm:$0xff]  ;;  %v3271_v41 = vld [vmem:[%s5900_s1 + $0x120] sm:$0xff]  ;;  %v3278_v47 = vld [vmem:[%s5902_s2 + $0x38] sm:$0xff] }
   0xf   :  { %178 = vmatpush1.msra.mxu1 %v3264_v14  ;;  %79 = vmatprep.subr.mxu0 %v4362_v0  ;;  %v4579_v40 = vld [vmem:[%s5901_s0 + $0x8] sm:$0x3f]  ;;  %v4589_v42 = vld [vmem:[%s5901_s0] sm:$0x3f]  ;;  %v3312_v51 = vld [vmem:[%s5900_s1 + $0x1b8] sm:$0xff] }
  0x10   :  { %179 = vmatprep.subr.mxu1 %v4362_v0  ;;  %80 = vmatpush1.msra.mxu0 %v45_v15  ;;  %v135_v44 = vld [vmem:[%s5902_s2] sm:$0xff]  ;;  %v136_v48 = vld [vmem:[%s5902_s2 + $0x8] sm:$0xff]  ;;  %v137_v52 = vld [vmem:[%s5902_s2 + $0x10] sm:$0xff] }
  0x11   :  { %180 = vmatpush1.msra.mxu1 %v3263_v16  ;;  %81 = vmatprep.subr.mxu0 %v4362_v0  ;;  %v3279_v49 = vld [vmem:[%s5902_s2 + $0x40] sm:$0xff]  ;;  %v3311_v54 = vld [vmem:[%s5900_s1 + $0x1b0] sm:$0xff]  ;;  %v138_v55 = vld [vmem:[%s5902_s2 + $0x18] sm:$0xff]  ;;  %v4363_v16 = vmov 0  }
  0x12   :  { %181 = vmatprep.subr.mxu1 %v4362_v0  ;;  %82 = vmatpush1.msra.mxu0 %v44_v17  ;;  %v3280_v56 = vld [vmem:[%s5902_s2 + $0x48] sm:$0xff]  ;;  %v3281_v58 = vld [vmem:[%s5902_s2 + $0x50] sm:$0xff]  ;;  %v139_v59 = vld [vmem:[%s5902_s2 + $0x20] sm:$0xff] }
  0x13   :  { %182 = vmatpush1.msra.mxu1 %v3262_v18  ;;  %83 = vmatprep.subr.mxu0 %v4362_v0  ;;  %v3310_v57 = vld [vmem:[%s5900_s1 + $0x1a8] sm:$0xff]  ;;  %v3309_v60 = vld [vmem:[%s5900_s1 + $0x1a0] sm:$0xff]  ;;  %v3282_v62 = vld [vmem:[%s5902_s2 + $0x58] sm:$0xff] }
  0x14   :  { %183 = vmatprep.subr.mxu1 %v4362_v0  ;;  %84 = vmatpush1.msra.mxu0 %v43_v19  ;;  %v140_v61 = vld [vmem:[%s5902_s2 + $0x28] sm:$0xff]  ;;  %v3308_v63 = vld [vmem:[%s5900_s1 + $0x198] sm:$0xff]  ;;  %v3307_v1 = vld [vmem:[%s5900_s1 + $0x190] sm:$0xff] }
  0x15   :  { %184 = vmatpush1.msra.mxu1 %v3261_v20  ;;  %85 = vmatprep.subr.mxu0 %v4362_v0  ;;  %v3306_v2 = vld [vmem:[%s5900_s1 + $0x188] sm:$0xff]  ;;  %v3305_v3 = vld [vmem:[%s5900_s1 + $0x180] sm:$0xff]  ;;  %v3304_v4 = vld [vmem:[%s5900_s1 + $0x178] sm:$0xff] }
  0x16   :  { %185 = vmatprep.subr.mxu1 %v4362_v0  ;;  %86 = vmatpush1.msra.mxu0 %v42_v21  ;;  %v3303_v5 = vld [vmem:[%s5900_s1 + $0x170] sm:$0xff]  ;;  %v3302_v6 = vld [vmem:[%s5900_s1 + $0x168] sm:$0xff]  ;;  %v3301_v7 = vld [vmem:[%s5900_s1 + $0x160] sm:$0xff] }
  0x17   :  { %186 = vmatpush1.msra.mxu1 %v3260_v22  ;;  %87 = vmatprep.subr.mxu0 %v4362_v0  ;;  %v3300_v8 = vld [vmem:[%s5900_s1 + $0x158] sm:$0xff]  ;;  %v3299_v9 = vld [vmem:[%s5900_s1 + $0x150] sm:$0xff]  ;;  %v3298_v10 = vld [vmem:[%s5900_s1 + $0x148] sm:$0xff] }
  0x18   :  { %187 = vmatprep.subr.mxu1 %v4362_v0  ;;  %88 = vmatpush1.msra.mxu0 %v41_v23  ;;  %v3297_v11 = vld [vmem:[%s5900_s1 + $0x140] sm:$0xff]  ;;  %v3316_v12 = vld [vmem:[%s5900_s1 + $0x1d8] sm:$0x1]  ;;  %v3315_v13 = vld [vmem:[%s5900_s1 + $0x1d0] sm:$0xff] }
  0x19   :  { %188 = vmatpush1.msra.mxu1 %v3259_v24  ;;  %89 = vmatprep.subr.mxu0 %v4362_v0  ;;  %v3314_v14 = vld [vmem:[%s5900_s1 + $0x1c8] sm:$0xff]  ;;  %v3313_v15 = vld [vmem:[%s5900_s1 + $0x1c0] sm:$0xff]  ;;  %v701_v20 = vld [vmem:[%s5903_s3 + $0x10] sm:$0xff] }
  0x1a   :  { %189 = vmatprep.subr.mxu1 %v4362_v0  ;;  %90 = vmatpush1.msra.mxu0 %v40_v25  ;;  %v699_v17 = vld [vmem:[%s5903_s3] sm:$0xff]  ;;  %v700_v18 = vld [vmem:[%s5903_s3 + $0x8] sm:$0xff]  ;;  %v702_v22 = vld [vmem:[%s5903_s3 + $0x18] sm:$0xff] }
  0x1b   :  { %190 = vmatpush1.msra.mxu1 %v3258_v26  ;;  %91 = vmatprep.subr.mxu0 %v4362_v0  ;;  %v3319_v19 = vld [vmem:[%s5902_s2 + $0x60] sm:$0xff]  ;;  %v1629_v23 = vld [vmem:[%s5904_s6 + $0x10] sm:$0xff]  ;;  %v704_v24 = vld [vmem:[%s5903_s3 + $0x28] sm:$0xff] }
  0x1c   :  { %191 = vmatprep.subr.mxu1 %v4362_v0  ;;  %92 = vmatpush1.msra.mxu0 %v39_v27  ;;  %v1627_v21 = vld [vmem:[%s5904_s6] sm:$0xff]  ;;  %v1628_v26 = vld [vmem:[%s5904_s6 + $0x8] sm:$0xff]  ;;  %v1633_v27 = vld [vmem:[%s5904_s6 + $0x30] sm:$0xff] }
  0x1d   :  { %192 = vmatpush1.msra.mxu1 %v3257_v28  ;;  %93 = vmatprep.subr.mxu0 %v4362_v0  ;;  %v1631_v25 = vld [vmem:[%s5904_s6 + $0x20] sm:$0xff]  ;;  %v1630_v28 = vld [vmem:[%s5904_s6 + $0x18] sm:$0xff] }
  0x1e   :  { %193 = vmatprep.subr.mxu1 %v4362_v0  ;;  %94 = vmatpush1.msra.mxu0 %v38_v29  ;;  %v1635_v29 = vld [vmem:[%s5904_s6 + $0x40] sm:$0xff] }
  0x1f   :  { %194 = vmatpush1.msra.mxu1 %v3256_v30  ;;  %95 = vmatprep.subr.mxu0 %v4362_v0  ;;  %v1632_v30 = vld [vmem:[%s5904_s6 + $0x28] sm:$0xff] }
  0x20   :  { %195 = vmatprep.subr.mxu1 %v4362_v0  ;;  %96 = vmatpush1.msra.mxu0 %v37_v31  ;;  %v1637_v31 = vld [vmem:[%s5904_s6 + $0x50] sm:$0xff] }
  0x21   :  { %196 = vmatpush1.msra.mxu1 %v3255_v32  ;;  %121 = vmatprep.subr.mxu0 %v4362_v0  ;;  %v1634_v32 = vld [vmem:[%s5904_s6 + $0x38] sm:$0xff] }
  0x22   :  { %221 = vmatprep.subr.mxu1 %v4362_v0  ;;  %3253 = vmatpush2.msk.msra.mxu0 %vm61_vm0, %v56_v33  ;;  %v3032_v33 = vld [vmem:[%s5905_s9] sm:$0xff] }
  0x23   :  { %3275 = vmatpush2.msk.msra.mxu1 %vm61_vm0, %v3274_v34  ;;  %123 = vmatprep.subr.mxu0 %v4362_v0  ;;  %v1636_v34 = vld [vmem:[%s5904_s6 + $0x48] sm:$0xff] }
  0x24   :  { %223 = vmatprep.subr.mxu1 %v4362_v0  ;;  %124 = vmatpush2.msra.mxu0 %v55_v35  ;;  %v3034_v35 = vld [vmem:[%s5905_s9 + $0x10] sm:$0xff] }
  0x25   :  { %224 = vmatpush2.msra.mxu1 %v3273_v36  ;;  %125 = vmatprep.subr.mxu0 %v4362_v0  ;;  %v1638_v36 = vld [vmem:[%s5904_s6 + $0x58] sm:$0xff] }
  0x26   :  { %225 = vmatprep.subr.mxu1 %v4362_v0  ;;  %126 = vmatpush2.msra.mxu0 %v54_v37  ;;  %v3036_v37 = vld [vmem:[%s5905_s9 + $0x20] sm:$0xff] }
  0x27   :  { %226 = vmatpush2.msra.mxu1 %v3272_v38  ;;  %127 = vmatprep.subr.mxu0 %v4362_v0  ;;  %v3033_v38 = vld [vmem:[%s5905_s9 + $0x8] sm:$0xff] }
  0x28   :  { %227 = vmatprep.subr.mxu1 %v4362_v0  ;;  %128 = vmatpush2.msra.mxu0 %v53_v39  ;;  %v3038_v39 = vld [vmem:[%s5905_s9 + $0x30] sm:$0xff] }
  0x29   :  { %3254 = vmatprep.mubr.msk.f32.mxu0 %vm57_vm1, %v4579_v40  ;;  %228 = vmatpush2.msra.mxu1 %v3271_v41  ;;  %v3040_v41 = vld [vmem:[%s5905_s9 + $0x40] sm:$0xff] }
  0x2a   :  { %3276 = vmatprep.mubr.msk.f32.mxu1 %vm57_vm1, %v4579_v40  ;;  %130 = vmatmul.mubr.f32.vlgmr.msra.gmra.mxu0 %v4589_v42 }
  0x2b   :  { %230 = vmatmul.mubr.f32.vlgmr.msra.gmra.mxu1 %v4589_v42  ;;  %3886 = vmatprep.mubr.msk.f32.mxu0 %vm242_vm2, %v3277_v43  ;;  %v3042_v43 = vld [vmem:[%s5905_s9 + $0x50] sm:$0xff] }
  0x2c   :  { %3897 = vmatprep.mubr.msk.f32.mxu1 %vm242_vm2, %v135_v44  ;;  %4360 = vset.pattern.permute.xlu0 %v4363_v16  ;;  %v3039_v44 = vld [vmem:[%s5905_s9 + $0x38] sm:$0xff] }
  0x2d   :  { %4361 = vset.pattern.permute.xlu1 %v4363_v16  ;;  %707 = vperm.xlu0 %4360, %v699_v17   ;;  %v749_v16 = vld [vmem:[%s5906_s4 + $0x10] sm:$0xff]  ;;  %v748_v17 = vld [vmem:[%s5906_s4 + $0x8] sm:$0xff] }
  0x2e   :  { %717 = vperm.xlu1 %4361, %v701_v20  }
  0x31   :  { %712 = vperm.xlu0 %4360, %v700_v18   ;;  %v747_v18 = vld [vmem:[%s5906_s4] sm:$0xff] }
  0x32   :  { %722 = vperm.xlu1 %4361, %v702_v22  }
  0x36   :  { %732 = vperm.xlu1 %4361, %v704_v24  }
  0x3a   :  { %1646 = vperm.xlu1 %4361, %v1628_v26  }
  0x3e   :  { %1656 = vperm.xlu1 %4361, %v1630_v28  }
  0x42   :  { %1666 = vperm.xlu1 %4361, %v1632_v30  }
  0x46   :  { %1676 = vperm.xlu1 %4361, %v1634_v32  }
  0x4a   :  { %1686 = vperm.xlu1 %4361, %v1636_v34  }
  0x4e   :  { %1696 = vperm.xlu1 %4361, %v1638_v36  }
  0x52   :  { %3063 = vperm.xlu1 %4361, %v3033_v38  }
  0xa8   :  { %v708_v24 = vpop.permute.xlu0 %707 }
  0xea   :  { %v131_v45 = vpop.f32.mrf.mxu0 }
  0xeb   :  { %v231_v46 = vpop.f32.mrf.mxu1  ;;  %3895 = vmatprep.subr.msk.mxu1 %vm261_vm3, %v131_v45 }
  0xec   :  { %3884 = vmatprep.subr.msk.mxu0 %vm261_vm3, %v231_v46  ;;  %3896 = vmatpush3.msk.msra.mxu1 %vm261_vm3, %v131_v45  ;;  %v133_v53 = vpop.f32.mrf.mxu0  ;;  %v3044_v45 = vld [vmem:[%s5905_s9 + $0x60] sm:$0xff] }
  0xed   :  { %v233_v50 = vpop.f32.mrf.mxu1  ;;  %3885 = vmatpush3.msk.msra.mxu0 %vm261_vm3, %v231_v46  ;;  %3898 = vmatmul.mubr.msk.f32.vlgmr.msra.gmra.mxu1 %vm242_vm2, %v136_v48  ;;  %v3041_v46 = vld [vmem:[%s5905_s9 + $0x48] sm:$0xff]  ;;  %v3043_v48 = vld [vmem:[%s5905_s9 + $0x58] sm:$0xff]  ;;  %v3052_v53 = vld [vmem:[%s5905_s9 + $0xa0] sm:$0xff] }
  0xee   :  { %3887 = vmatmul.mubr.msk.f32.vlgmr.msra.gmra.mxu0 %vm242_vm2, %v3278_v47  ;;  %500 = vmatprep.subr.mxu0 %v4362_v0  ;;  %v3046_v47 = vld [vmem:[%s5905_s9 + $0x70] sm:$0xff]  ;;  %v3045_v50 = vld [vmem:[%s5905_s9 + $0x68] sm:$0xff] }
  0xef   :  { %3889 = vmatprep.mubr.msk.f32.mxu0 %vm242_vm2, %v3279_v49  ;;  %501 = vmatpush1.msra.mxu0 %v3312_v51  ;;  %v3048_v49 = vld [vmem:[%s5905_s9 + $0x80] sm:$0xff]  ;;  %v3050_v51 = vld [vmem:[%s5905_s9 + $0x90] sm:$0xff] }
  0xf0   :  { %3900 = vmatprep.mubr.msk.f32.mxu1 %vm242_vm2, %v137_v52  ;;  %502 = vmatprep.subr.mxu0 %v4362_v0  ;;  %v3047_v52 = vld [vmem:[%s5905_s9 + $0x78] sm:$0xff] }
  0xf1   :  { %503 = vmatpush1.msra.mxu0 %v3311_v54  ;;  %3901 = vmatmul.mubr.msk.f32.gmra.mxu1 %vm242_vm2, %v138_v55  ;;  %v3049_v54 = vld [vmem:[%s5905_s9 + $0x88] sm:$0xff]  ;;  %v3054_v55 = vld [vmem:[%s5905_s9 + $0xb0] sm:$0xff] }
  0xf2   :  { %504 = vmatprep.subr.mxu0 %v4362_v0  ;;  %3890 = vmatmul.mubr.msk.f32.gmra.mxu0 %vm242_vm2, %v3280_v56  ;;  %v3051_v56 = vld [vmem:[%s5905_s9 + $0x98] sm:$0xff] }
  0xf3   :  { %505 = vmatpush1.msra.mxu0 %v3310_v57  ;;  %3892 = vmatprep.mubr.msk.f32.mxu0 %vm242_vm2, %v3281_v58  ;;  %v3053_v57 = vld [vmem:[%s5905_s9 + $0xa8] sm:$0xff]  ;;  %v3055_v58 = vld [vmem:[%s5905_s9 + $0xb8] sm:$0xff] }
  0xf4   :  { %506 = vmatprep.subr.mxu0 %v4362_v0  ;;  %3903 = vmatprep.mubr.msk.f32.mxu1 %vm242_vm2, %v139_v59 }
  0xf5   :  { %507 = vmatpush1.msra.mxu0 %v3309_v60  ;;  %3904 = vmatmul.mubr.msk.f32.gmra.mxu1 %vm242_vm2, %v140_v61 }
  0xf6   :  { %508 = vmatprep.subr.mxu0 %v4362_v0  ;;  %3893 = vmatmul.mubr.msk.f32.gmra.mxu0 %vm242_vm2, %v3282_v62 }
  0xf7   :  { %509 = vmatpush1.msra.mxu0 %v3308_v63  ;;  %3318 = vmatprep.mubr.msk.f32.mxu0 %vm57_vm1, %v4579_v40  ;;  %v3035_v40 = vld [vmem:[%s5905_s9 + $0x18] sm:$0xff] }
  0xf8   :  { %510 = vmatprep.subr.mxu0 %v4362_v0  ;;  %3908 = vmatprep.mubr.msk.f32.mxu1 %vm242_vm2, %v3319_v19 }
  0xf9   :  { %511 = vmatpush1.msra.mxu0 %v3307_v1  ;;  %3073 = vperm.xlu1 %4361, %v3035_v40  }
  0xfa   :  { %512 = vmatprep.subr.mxu0 %v4362_v0 }
  0xfb   :  { %513 = vmatpush1.msra.mxu0 %v3306_v2 }
  0xfc   :  { %514 = vmatprep.subr.mxu0 %v4362_v0 }
  0xfd   :  { %515 = vmatpush1.msra.mxu0 %v3305_v3  ;;  %v3320_v3 = vld [vmem:[%s5902_s2 + $0x68] sm:$0xff] }
  0xfe   :  { %516 = vmatprep.subr.mxu0 %v4362_v0 }
  0xff   :  { %517 = vmatpush1.msra.mxu0 %v3304_v4  ;;  %v756_v4 = vld [vmem:[%s5906_s4 + $0x48] sm:$0xf] }
 0x100   :  { %518 = vmatprep.subr.mxu0 %v4362_v0 }
 0x101   :  { %519 = vmatpush1.msra.mxu0 %v3303_v5  ;;  %v3321_v5 = vld [vmem:[%s5902_s2 + $0x70] sm:$0xff] }
 0x102   :  { %520 = vmatprep.subr.mxu0 %v4362_v0 }
 0x103   :  { %521 = vmatpush1.msra.mxu0 %v3302_v6 }
 0x104   :  { %522 = vmatprep.subr.mxu0 %v4362_v0 }
 0x105   :  { %523 = vmatpush1.msra.mxu0 %v3301_v7  ;;  %v755_v7 = vld [vmem:[%s5906_s4 + $0x40] sm:$0xff] }
 0x106   :  { %524 = vmatprep.subr.mxu0 %v4362_v0 }
 0x107   :  { %525 = vmatpush1.msra.mxu0 %v3300_v8  ;;  %v3322_v8 = vld [vmem:[%s5902_s2 + $0x78] sm:$0xff] }
 0x108   :  { %526 = vmatprep.subr.mxu0 %v4362_v0 }
 0x109   :  { %527 = vmatpush1.msra.mxu0 %v3299_v9  ;;  %v754_v9 = vld [vmem:[%s5906_s4 + $0x38] sm:$0xff] }
 0x10a   :  { %528 = vmatprep.subr.mxu0 %v4362_v0 }
 0x10b   :  { %529 = vmatpush1.msra.mxu0 %v3298_v10  ;;  %v3323_v10 = vld [vmem:[%s5902_s2 + $0x80] sm:$0xff] }
 0x10c   :  { %530 = vmatprep.subr.mxu0 %v4362_v0 }
 0x10d   :  { %531 = vmatpush1.msra.mxu0 %v3297_v11  ;;  %v753_v11 = vld [vmem:[%s5906_s4 + $0x30] sm:$0xff] }
 0x10e   :  { %556 = vmatprep.subr.mxu0 %v4362_v0 }
 0x10f   :  { %3317 = vmatpush2.msk.msra.mxu0 %vm61_vm0, %v3316_v12  ;;  %v3324_v12 = vld [vmem:[%s5902_s2 + $0x88] sm:$0xff] }
 0x110   :  { %558 = vmatprep.subr.mxu0 %v4362_v0 }
 0x111   :  { %559 = vmatpush2.msra.mxu0 %v3315_v13  ;;  %v752_v13 = vld [vmem:[%s5906_s4 + $0x28] sm:$0xff] }
 0x112   :  { %560 = vmatprep.subr.mxu0 %v4362_v0 }
 0x113   :  { %561 = vmatpush2.msra.mxu0 %v3314_v14  ;;  %v751_v14 = vld [vmem:[%s5906_s4 + $0x20] sm:$0xff] }
 0x114   :  { %562 = vmatprep.subr.mxu0 %v4362_v0  ;;  %v703_v0 = vld [vmem:[%s5903_s3 + $0x20] sm:$0xff] }
 0x115   :  { %563 = vmatpush2.msra.mxu0 %v3313_v15  ;;  %727 = vperm.xlu0 %4360, %v703_v0   ;;  %v750_v15 = vld [vmem:[%s5906_s4 + $0x18] sm:$0xff] }
 0x116   :  { %565 = vmatmul.mubr.f32.vlgmr.msra.gmra.mxu0 %v4589_v42  ;;  %v3037_v42 = vld [vmem:[%s5905_s9 + $0x28] sm:$0xff]  ;;  %v3348_v0 = vld [vmem:[%s5906_s4 + $0x98] sm:$0xf] }
 0x117   :  { %3083 = vperm.xlu1 %4361, %v3037_v42  }
 0x119   :  { %1641 = vperm.xlu0 %4360, %v1627_v21  }
 0x11b   :  { %3093 = vperm.xlu1 %4361, %v3039_v44  }
 0x11d   :  { %1651 = vperm.xlu0 %4360, %v1629_v23  }
 0x11f   :  { %3103 = vperm.xlu1 %4361, %v3041_v46  }
 0x121   :  { %1661 = vperm.xlu0 %4360, %v1631_v25  }
 0x123   :  { %3113 = vperm.xlu1 %4361, %v3043_v48  }
 0x125   :  { %1671 = vperm.xlu0 %4360, %v1633_v27   ;;  %v718_v27 = vpop.permute.xlu1 %717 }
 0x127   :  { %3123 = vperm.xlu1 %4361, %v3045_v50  }
 0x129   :  { %1681 = vperm.xlu0 %4360, %v1635_v29   ;;  %v723_v38 = vpop.permute.xlu1 %722 }
 0x12b   :  { %3133 = vperm.xlu1 %4361, %v3047_v52  }
 0x12d   :  { %1691 = vperm.xlu0 %4360, %v1637_v31  }
 0x12f   :  { %3143 = vperm.xlu1 %4361, %v3049_v54  }
 0x131   :  { %3058 = vperm.xlu0 %4360, %v3032_v33   ;;  %v713_v33 = vpop.permute.xlu0 %712 }
 0x133   :  { %3153 = vperm.xlu1 %4361, %v3051_v56   ;;  %v3346_v56 = vld [vmem:[%s5906_s4 + $0x88] sm:$0xff] }
 0x135   :  { %3068 = vperm.xlu0 %4360, %v3034_v35  }
 0x137   :  { %3163 = vperm.xlu1 %4361, %v3053_v57  }
 0x139   :  { %3078 = vperm.xlu0 %4360, %v3036_v37  }
 0x13b   :  { %3173 = vperm.xlu1 %4361, %v3055_v58  }
 0x13d   :  { %3088 = vperm.xlu0 %4360, %v3038_v39  }
 0x141   :  { %3098 = vperm.xlu0 %4360, %v3040_v41  }
 0x145   :  { %3108 = vperm.xlu0 %4360, %v3042_v43  }
 0x149   :  { %3118 = vperm.xlu0 %4360, %v3044_v45  }
 0x14d   :  { %3128 = vperm.xlu0 %4360, %v3046_v47  }
 0x151   :  { %3138 = vperm.xlu0 %4360, %v3048_v49  }
 0x155   :  { %3148 = vperm.xlu0 %4360, %v3050_v51   ;;  %v3347_v51 = vld [vmem:[%s5906_s4 + $0x90] sm:$0xff] }
 0x159   :  { %3158 = vperm.xlu0 %4360, %v3052_v53   ;;  %v733_v53 = vpop.permute.xlu1 %732 }
 0x15d   :  { %3168 = vperm.xlu0 %4360, %v3054_v55  }
 0x190   :  { %v728_v57 = vpop.permute.xlu0 %727 }
 0x1ad   :  { %v3899_v19 = vpop.f32.mrf.mxu1 }
 0x1ae   :  { %v3888_v59 = vpop.f32.mrf.mxu0 }
 0x1af   :  { %v447_v20 = vpop.f32.mrf.mxu1  ;;  %v453_v26 = vadd.f32 %v3899_v19, %v3888_v59  ;;  %v879_v19 = vld [vmem:[%s5907_s5 + $0x20] sm:$0xff] }
 0x1b0   :  { %v4863_v60 = vpop.f32.mrf.mxu0 }
 0x1b1   :  { %v3902_v21 = vpop.f32.mrf.mxu1  ;;  %v448_v29 = vadd.f32 %v447_v20, %v4863_v60 }
 0x1b2   :  { %v4865_v61 = vpop.f32.mrf.mxu0 }
 0x1b3   :  { %v457_v22 = vpop.f32.mrf.mxu1  ;;  %v463_v32 = vadd.f32 %v3902_v21, %v4865_v61  ;;  %v3345_v61 = vld [vmem:[%s5906_s4 + $0x80] sm:$0xff] }
 0x1b4   :  { %v4867_v62 = vpop.f32.mrf.mxu0 }
 0x1b5   :  { %v3905_v23 = vpop.f32.mrf.mxu1  ;;  %v458_v37 = vadd.f32 %v457_v22, %v4867_v62  ;;  %v880_v22 = vld [vmem:[%s5907_s5 + $0x28] sm:$0xff] }
 0x1b6   :  { %v4869_v63 = vpop.f32.mrf.mxu0 }
 0x1b7   :  { %v467_v25 = vpop.f32.mrf.mxu1  ;;  %v473_v42 = vadd.f32 %v3905_v23, %v4869_v63  ;;  %v3344_v63 = vld [vmem:[%s5906_s4 + $0x78] sm:$0xff]  ;;  %v881_v23 = vld [vmem:[%s5907_s5 + $0x30] sm:$0xff] }
 0x1b8   :  { %v4871_v1 = vpop.f32.mrf.mxu0 }
 0x1b9   :  { %v468_v48 = vadd.f32 %v467_v25, %v4871_v1 }
 0x1d6   :  { %v566_v2 = vpop.f32.mrf.mxu0 }
 0x1d7   :  { %3906 = vmatprep.subr.msk.mxu1 %vm261_vm3, %v566_v2 }
 0x1d8   :  { %v568_v6 = vpop.f32.mrf.mxu0  ;;  %3907 = vmatpush3.msk.msra.mxu1 %vm261_vm3, %v566_v2  ;;  %v3343_v2 = vld [vmem:[%s5906_s4 + $0x70] sm:$0xff] }
 0x1d9   :  { %3909 = vmatmul.mubr.msk.f32.vlgmr.msra.gmra.mxu1 %vm242_vm2, %v3320_v3  ;;  %3917 = vmatprep.subr.msk.mxu1 %vm776_vm4, %v756_v4  ;;  %v3342_v3 = vld [vmem:[%s5906_s4 + $0x68] sm:$0xff]  ;;  %v3339_v6 = vld [vmem:[%s5906_s4 + $0x50] sm:$0xff] }
 0x1da   :  { %3911 = vmatprep.mubr.msk.f32.mxu1 %vm242_vm2, %v3321_v5  ;;  %3918 = vmatpush3.msk.msra.mxu1 %vm776_vm4, %v756_v4  ;;  %v3341_v4 = vld [vmem:[%s5906_s4 + $0x60] sm:$0xff]  ;;  %v3340_v5 = vld [vmem:[%s5906_s4 + $0x58] sm:$0xff] }
 0x1db   :  { %3919 = vmatprep.subr.mxu1 %v755_v7 }
 0x1dc   :  { %3920 = vmatpush3.msra.mxu1 %v755_v7  ;;  %v3356_v7 = vld [vmem:[%s5907_s5 + $0x60] sm:$0xff] }
 0x1dd   :  { %3912 = vmatmul.mubr.msk.f32.gmra.mxu1 %vm242_vm2, %v3322_v8  ;;  %3921 = vmatprep.subr.mxu1 %v754_v9  ;;  %v875_v8 = vld [vmem:[%s5907_s5] sm:$0xff] }
 0x1de   :  { %3914 = vmatprep.mubr.msk.f32.mxu1 %vm242_vm2, %v3323_v10  ;;  %3922 = vmatpush3.msra.mxu1 %v754_v9 }
 0x1df   :  { %3923 = vmatprep.subr.mxu1 %v753_v11  ;;  %3987 = vmatprep.mubr.msk.f32.mxu0 %vm1009_vm6, %v3356_v7 }
 0x1e0   :  { %3924 = vmatpush3.msra.mxu1 %v753_v11 }
 0x1e1   :  { %3915 = vmatmul.mubr.msk.f32.gmra.mxu1 %vm242_vm2, %v3324_v12  ;;  %3925 = vmatprep.subr.mxu1 %v752_v13 }
 0x1e2   :  { %3926 = vmatpush3.msra.mxu1 %v752_v13 }
 0x1e3   :  { %3927 = vmatprep.subr.mxu1 %v751_v14 }
 0x1e4   :  { %3928 = vmatpush3.msra.mxu1 %v751_v14 }
 0x1e5   :  { %3929 = vmatprep.subr.mxu1 %v750_v15 }
 0x1e6   :  { %3930 = vmatpush3.msra.mxu1 %v750_v15  ;;  %v876_v15 = vld [vmem:[%s5907_s5 + $0x8] sm:$0xff] }
 0x1e7   :  { %3931 = vmatprep.subr.mxu1 %v749_v16 }
 0x1e8   :  { %3932 = vmatpush3.msra.mxu1 %v749_v16  ;;  %v877_v16 = vld [vmem:[%s5907_s5 + $0x10] sm:$0xff] }
 0x1e9   :  { %3933 = vmatprep.subr.mxu1 %v748_v17 }
 0x1ea   :  { %3934 = vmatpush3.msra.mxu1 %v748_v17 }
 0x1eb   :  { %3935 = vmatprep.subr.mxu1 %v747_v18 }
 0x1ec   :  { %3936 = vmatpush3.msra.mxu1 %v747_v18 }
 0x1ed   :  { %3946 = vmatprep.subr.msk.mxu1 %vm776_vm4, %v3348_v0 }
 0x299   :  { %v3910_v28 = vpop.f32.mrf.mxu1 }
 0x29a   :  { %v694_v30 = vadd.f32 %v3910_v28, %v453_v26  ;;  %v882_v26 = vld [vmem:[%s5907_s5 + $0x38] sm:$0xff]  ;;  %v884_v28 = vld [vmem:[%s5907_s5 + $0x48] sm:$0xff] }
 0x29b   :  { %v664_v31 = vpop.f32.mrf.mxu1 }
 0x29c   :  { %v693_v34 = vadd.f32 %v664_v31, %v448_v29  ;;  %v736_v35 = vadd.f32 %v713_v33, %v694_v30  ;;  %v885_v29 = vld [vmem:[%s5907_s5 + $0x50] sm:$0xff]  ;;  %v3357_v30 = vld [vmem:[%s5907_s5 + $0x68] sm:$0xff]  ;;  %v3400_v33 = vld [vmem:[%s5906_s4 + $0xe0] sm:$0xff] }
 0x29d   :  { %v3913_v36 = vpop.f32.mrf.mxu1  ;;  %v3401_v31 = vld [vmem:[%s5906_s4 + $0xe8] sm:$0xf] }
 0x29e   :  { %v735_v39 = vadd.f32 %v708_v24, %v693_v34  ;;  %v696_v40 = vadd.f32 %v3913_v36, %v463_v32  ;;  %v4937_v45 = vmax.f32 %v736_v35, 0.0  ;;  %v3358_v32 = vld [vmem:[%s5907_s5 + $0x70] sm:$0xff]  ;;  %v886_v34 = vld [vmem:[%s5907_s5 + $0x58] sm:$0xff] }
 0x29f   :  { %v674_v41 = vpop.f32.mrf.mxu1  ;;  %v3359_v35 = vld [vmem:[%s5907_s5 + $0x78] sm:$0xff] }
 0x2a0   :  { %v4935_v43 = vmax.f32 %v735_v39, 0.0  ;;  %v695_v44 = vadd.f32 %v674_v41, %v458_v37  ;;  %v738_v46 = vadd.f32 %v723_v38, %v696_v40  ;;  %v3399_v36 = vld [vmem:[%s5906_s4 + $0xd8] sm:$0xff]  ;;  %v3360_v37 = vld [vmem:[%s5907_s5 + $0x80] sm:$0xff]  ;;  %v3398_v38 = vld [vmem:[%s5906_s4 + $0xd0] sm:$0xff] }
 0x2a1   :  { %v3916_v47 = vpop.f32.mrf.mxu1  ;;  %v3361_v39 = vld [vmem:[%s5907_s5 + $0x88] sm:$0xff]  ;;  %v3362_v41 = vld [vmem:[%s5907_s5 + $0x90] sm:$0xff] }
 0x2a2   :  { %v737_v49 = vadd.f32 %v718_v27, %v695_v44  ;;  %v698_v50 = vadd.f32 %v3916_v47, %v473_v42  ;;  %3937 = vmatprep.mubr.msk.f32.mxu1 %vm757_vm5, %v4935_v43  ;;  %v4953_v58 = vmax.f32 %v738_v46, 0.0  ;;  %v883_v27 = vld [vmem:[%s5907_s5 + $0x40] sm:$0xff]  ;;  %v3397_v40 = vld [vmem:[%s5906_s4 + $0xc8] sm:$0xff]  ;;  %v3363_v44 = vld [vmem:[%s5907_s5 + $0x98] sm:$0xff] }
 0x2a3   :  { %v684_v52 = vpop.f32.mrf.mxu1  ;;  %3938 = vmatmul.mubr.msk.f32.vlgmr.msra.gmra.mxu1 %vm757_vm5, %v4937_v45  ;;  %v3396_v42 = vld [vmem:[%s5906_s4 + $0xc0] sm:$0xff]  ;;  %v3395_v46 = vld [vmem:[%s5906_s4 + $0xb8] sm:$0xff] }
 0x2a4   :  { %v4947_v54 = vmax.f32 %v737_v49, 0.0  ;;  %v697_v55 = vadd.f32 %v684_v52, %v468_v48  ;;  %3947 = vmatpush3.msk.msra.mxu1 %vm776_vm4, %v3348_v0  ;;  %v740_v59 = vadd.f32 %v733_v53, %v698_v50  ;;  %v878_v0 = vld [vmem:[%s5907_s5 + $0x18] sm:$0xff]  ;;  %v3364_v47 = vld [vmem:[%s5907_s5 + $0xa0] sm:$0xff]  ;;  %v3394_v48 = vld [vmem:[%s5906_s4 + $0xb0] sm:$0xff] }
 0x2a5   :  { %3948 = vmatprep.subr.mxu1 %v3347_v51  ;;  %v3365_v49 = vld [vmem:[%s5907_s5 + $0xa8] sm:$0xff]  ;;  %v3392_v52 = vld [vmem:[%s5906_s4 + $0xa0] sm:$0xff]  ;;  %v3367_v53 = vld [vmem:[%s5907_s5 + $0xb8] sm:$0xff] }
 0x2a6   :  { %v739_v60 = vadd.f32 %v728_v57, %v697_v55  ;;  %3949 = vmatpush3.msra.mxu1 %v3347_v51  ;;  %3940 = vmatprep.mubr.msk.f32.mxu1 %vm757_vm5, %v4947_v54  ;;  %v4967_v1 = vmax.f32 %v740_v59, 0.0  ;;  %v3393_v50 = vld [vmem:[%s5906_s4 + $0xa8] sm:$0xff]  ;;  %v3366_v51 = vld [vmem:[%s5907_s5 + $0xb0] sm:$0xff]  ;;  %v3409_v55 = vld [vmem:[%s5907_s5 + $0xc0] sm:$0xff] }
 0x2a7   :  { %3950 = vmatprep.subr.mxu1 %v3346_v56  ;;  %3941 = vmatmul.mubr.msk.f32.gmra.mxu1 %vm757_vm5, %v4953_v58 }
 0x2a8   :  { %v4962_v62 = vmax.f32 %v739_v60, 0.0  ;;  %3951 = vmatpush3.msra.mxu1 %v3346_v56 }
 0x2a9   :  { %3952 = vmatprep.subr.mxu1 %v3345_v61 }
 0x2aa   :  { %3953 = vmatpush3.msra.mxu1 %v3345_v61  ;;  %3943 = vmatprep.mubr.msk.f32.mxu1 %vm757_vm5, %v4962_v62 }
 0x2ab   :  { %3954 = vmatprep.subr.mxu1 %v3344_v63  ;;  %3944 = vmatmul.mubr.msk.f32.gmra.mxu1 %vm757_vm5, %v4967_v1 }
 0x2ac   :  { %3955 = vmatpush3.msra.mxu1 %v3344_v63  ;;  %3966 = vmatprep.mubr.msk.f32.mxu1 %vm757_vm5, %v4935_v43 }
 0x2ad   :  { %3956 = vmatprep.subr.mxu1 %v3343_v2 }
 0x2ae   :  { %3957 = vmatpush3.msra.mxu1 %v3343_v2 }
 0x2af   :  { %3958 = vmatprep.subr.mxu1 %v3342_v3 }
 0x2b0   :  { %3959 = vmatpush3.msra.mxu1 %v3342_v3 }
 0x2b1   :  { %3960 = vmatprep.subr.mxu1 %v3341_v4 }
 0x2b2   :  { %3961 = vmatpush3.msra.mxu1 %v3341_v4 }
 0x2b3   :  { %3962 = vmatprep.subr.mxu1 %v3340_v5 }
 0x2b4   :  { %3963 = vmatpush3.msra.mxu1 %v3340_v5 }
 0x2b5   :  { %3964 = vmatprep.subr.mxu1 %v3339_v6 }
 0x2b6   :  { %3965 = vmatpush3.msra.mxu1 %v3339_v6 }
 0x2b7   :  { %3967 = vmatmul.mubr.msk.f32.vlgmr.msra.gmra.mxu1 %vm757_vm5, %v4937_v45 }
 0x2b8   :  { %3969 = vmatprep.mubr.msk.f32.mxu1 %vm757_vm5, %v4947_v54 }
 0x2bb   :  { %3970 = vmatmul.mubr.msk.f32.gmra.mxu1 %vm757_vm5, %v4953_v58 }
 0x2bc   :  { %3972 = vmatprep.mubr.msk.f32.mxu1 %vm757_vm5, %v4962_v62 }
 0x2bf   :  { %3973 = vmatmul.mubr.msk.f32.gmra.mxu1 %vm757_vm5, %v4967_v1 }
 0x2c0   :  { %4017 = vmatprep.mubr.msk.f32.mxu1 %vm1009_vm6, %v875_v8  ;;  %v3410_v8 = vld [vmem:[%s5907_s5 + $0xc8] sm:$0xff] }
 0x363   :  { %v3939_v9 = vpop.f32.mrf.mxu1 }
 0x365   :  { %v846_v10 = vpop.f32.mrf.mxu1 }
 0x367   :  { %v3942_v11 = vpop.f32.mrf.mxu1 }
 0x369   :  { %v856_v12 = vpop.f32.mrf.mxu1 }
 0x36b   :  { %v3945_v13 = vpop.f32.mrf.mxu1 }
 0x36c   :  { %4005 = vmatprep.subr.mxu1 %v3945_v13 }
 0x36d   :  { %v866_v14 = vpop.f32.mrf.mxu1  ;;  %4006 = vmatpush3.msra.mxu1 %v3945_v13  ;;  %v3415_v13 = vld [vmem:[%s5907_s5 + $0xf0] sm:$0xff] }
 0x36e   :  { %4007 = vmatprep.subr.mxu1 %v866_v14 }
 0x36f   :  { %4008 = vmatpush3.msra.mxu1 %v866_v14  ;;  %v3416_v14 = vld [vmem:[%s5907_s5 + $0xf8] sm:$0xff] }
 0x370   :  { %4009 = vmatprep.subr.mxu1 %v3942_v11 }
 0x371   :  { %4010 = vmatpush3.msra.mxu1 %v3942_v11  ;;  %v3413_v11 = vld [vmem:[%s5907_s5 + $0xe0] sm:$0xff] }
 0x372   :  { %4011 = vmatprep.subr.mxu1 %v856_v12 }
 0x373   :  { %4012 = vmatpush3.msra.mxu1 %v856_v12  ;;  %v3414_v12 = vld [vmem:[%s5907_s5 + $0xe8] sm:$0xff] }
 0x374   :  { %4013 = vmatprep.subr.mxu1 %v3939_v9 }
 0x375   :  { %4014 = vmatpush3.msra.mxu1 %v3939_v9  ;;  %v3411_v9 = vld [vmem:[%s5907_s5 + $0xd0] sm:$0xff] }
 0x376   :  { %4015 = vmatprep.subr.mxu1 %v846_v10 }
 0x377   :  { %v3968_v17 = vpop.f32.mrf.mxu1  ;;  %4016 = vmatpush3.msra.mxu1 %v846_v10  ;;  %v3412_v10 = vld [vmem:[%s5907_s5 + $0xd8] sm:$0xff] }
 0x378   :  { %4018 = vmatmul.mubr.msk.f32.vlgmr.msra.gmra.mxu1 %vm1009_vm6, %v876_v15  ;;  %v3417_v15 = vld [vmem:[%s5907_s5 + $0x100] sm:$0xff] }
 0x379   :  { %v967_v18 = vpop.f32.mrf.mxu1  ;;  %4020 = vmatprep.mubr.msk.f32.mxu1 %vm1009_vm6, %v877_v16  ;;  %v3418_v16 = vld [vmem:[%s5907_s5 + $0x108] sm:$0xff] }
 0x37b   :  { %v3971_v20 = vpop.f32.mrf.mxu1 }
 0x37c   :  { %4021 = vmatmul.mubr.msk.f32.gmra.mxu1 %vm1009_vm6, %v878_v0  ;;  %v1727_v0 = vld [vmem:[%s5908_s7 + $0x20] sm:$0x1f] }
 0x37d   :  { %v977_v21 = vpop.f32.mrf.mxu1  ;;  %4023 = vmatprep.mubr.msk.f32.mxu1 %vm1009_vm6, %v879_v19  ;;  %v3450_v19 = vld [vmem:[%s5908_s7 + $0x48] sm:$0x1f] }
 0x37f   :  { %v3974_v24 = vpop.f32.mrf.mxu1 }
 0x380   :  { %3975 = vmatprep.subr.mxu0 %v3974_v24  ;;  %4024 = vmatmul.mubr.msk.f32.gmra.mxu1 %vm1009_vm6, %v880_v22  ;;  %v1725_v22 = vld [vmem:[%s5908_s7 + $0x10] sm:$0xff] }
 0x381   :  { %v987_v25 = vpop.f32.mrf.mxu1  ;;  %3976 = vmatpush3.msra.mxu0 %v3974_v24  ;;  %4026 = vmatprep.mubr.msk.f32.mxu1 %vm1009_vm6, %v881_v23  ;;  %v3448_v23 = vld [vmem:[%s5908_s7 + $0x38] sm:$0xff]  ;;  %v1724_v24 = vld [vmem:[%s5908_s7 + $0x8] sm:$0xff] }
 0x382   :  { %3977 = vmatprep.subr.mxu0 %v987_v25 }
 0x383   :  { %3978 = vmatpush3.msra.mxu0 %v987_v25  ;;  %v3447_v25 = vld [vmem:[%s5908_s7 + $0x30] sm:$0xff] }
 0x384   :  { %3979 = vmatprep.subr.mxu0 %v3971_v20  ;;  %4027 = vmatmul.mubr.msk.f32.gmra.mxu1 %vm1009_vm6, %v882_v26  ;;  %v1723_v26 = vld [vmem:[%s5908_s7] sm:$0xff] }
 0x385   :  { %3980 = vmatpush3.msra.mxu0 %v3971_v20  ;;  %4029 = vmatprep.mubr.msk.f32.mxu1 %vm1009_vm6, %v883_v27  ;;  %v1726_v20 = vld [vmem:[%s5908_s7 + $0x18] sm:$0xff]  ;;  %v3446_v27 = vld [vmem:[%s5908_s7 + $0x28] sm:$0xff] }
 0x386   :  { %3981 = vmatprep.subr.mxu0 %v977_v21 }
 0x387   :  { %3982 = vmatpush3.msra.mxu0 %v977_v21  ;;  %v3449_v21 = vld [vmem:[%s5908_s7 + $0x40] sm:$0xff] }
 0x388   :  { %3983 = vmatprep.subr.mxu0 %v3968_v17  ;;  %4030 = vmatmul.mubr.msk.f32.gmra.mxu1 %vm1009_vm6, %v884_v28 }
 0x389   :  { %3984 = vmatpush3.msra.mxu0 %v3968_v17  ;;  %4032 = vmatprep.mubr.msk.f32.mxu1 %vm1009_vm6, %v885_v29  ;;  %v3419_v17 = vld [vmem:[%s5907_s5 + $0x110] sm:$0xff] }
 0x38a   :  { %3985 = vmatprep.subr.mxu0 %v967_v18 }
 0x38b   :  { %3986 = vmatpush3.msra.mxu0 %v967_v18  ;;  %v3420_v18 = vld [vmem:[%s5907_s5 + $0x118] sm:$0xff] }
 0x38c   :  { %3988 = vmatmul.mubr.msk.f32.vlgmr.msra.gmra.mxu0 %vm1009_vm6, %v3357_v30  ;;  %4035 = vmatprep.subr.msk.mxu0 %vm776_vm4, %v3401_v31 }
 0x38d   :  { %3990 = vmatprep.mubr.msk.f32.mxu0 %vm1009_vm6, %v3358_v32  ;;  %4036 = vmatpush3.msk.msra.mxu0 %vm776_vm4, %v3401_v31 }
 0x38e   :  { %4037 = vmatprep.subr.mxu0 %v3400_v33  ;;  %4033 = vmatmul.mubr.msk.f32.gmra.mxu1 %vm1009_vm6, %v886_v34 }
 0x38f   :  { %4038 = vmatpush3.msra.mxu0 %v3400_v33  ;;  %4076 = vmatprep.mubr.msk.f32.mxu1 %vm1009_vm6, %v3409_v55 }
 0x390   :  { %3991 = vmatmul.mubr.msk.f32.gmra.mxu0 %vm1009_vm6, %v3359_v35  ;;  %4039 = vmatprep.subr.mxu0 %v3399_v36 }
 0x391   :  { %3993 = vmatprep.mubr.msk.f32.mxu0 %vm1009_vm6, %v3360_v37  ;;  %4040 = vmatpush3.msra.mxu0 %v3399_v36 }
 0x392   :  { %4041 = vmatprep.subr.mxu0 %v3398_v38 }
 0x393   :  { %4042 = vmatpush3.msra.mxu0 %v3398_v38  ;;  %v1647_v38 = vpop.permute.xlu1 %1646 }
 0x394   :  { %3994 = vmatmul.mubr.msk.f32.gmra.mxu0 %vm1009_vm6, %v3361_v39  ;;  %4043 = vmatprep.subr.mxu0 %v3397_v40  ;;  %v1642_v39 = vpop.permute.xlu0 %1641 }
 0x395   :  { %3996 = vmatprep.mubr.msk.f32.mxu0 %vm1009_vm6, %v3362_v41  ;;  %4044 = vmatpush3.msra.mxu0 %v3397_v40 }
 0x396   :  { %4045 = vmatprep.subr.mxu0 %v3396_v42 }
 0x397   :  { %4046 = vmatpush3.msra.mxu0 %v3396_v42  ;;  %v1657_v42 = vpop.permute.xlu1 %1656 }
 0x398   :  { %3997 = vmatmul.mubr.msk.f32.gmra.mxu0 %vm1009_vm6, %v3363_v44  ;;  %4047 = vmatprep.subr.mxu0 %v3395_v46 }
 0x399   :  { %3999 = vmatprep.mubr.msk.f32.mxu0 %vm1009_vm6, %v3364_v47  ;;  %4048 = vmatpush3.msra.mxu0 %v3395_v46  ;;  %v1652_v46 = vpop.permute.xlu0 %1651 }
 0x39a   :  { %4049 = vmatprep.subr.mxu0 %v3394_v48 }
 0x39b   :  { %4050 = vmatpush3.msra.mxu0 %v3394_v48 }
 0x39c   :  { %4000 = vmatmul.mubr.msk.f32.gmra.mxu0 %vm1009_vm6, %v3365_v49  ;;  %4051 = vmatprep.subr.mxu0 %v3393_v50 }
 0x39d   :  { %4002 = vmatprep.mubr.msk.f32.mxu0 %vm1009_vm6, %v3366_v51  ;;  %4052 = vmatpush3.msra.mxu0 %v3393_v50 }
 0x39e   :  { %4053 = vmatprep.subr.mxu0 %v3392_v52 }
 0x39f   :  { %4054 = vmatpush3.msra.mxu0 %v3392_v52 }
 0x3a0   :  { %4003 = vmatmul.mubr.msk.f32.gmra.mxu0 %vm1009_vm6, %v3367_v53  ;;  %4122 = vmatprep.subr.msk.mxu0 %vm1765_vm7, %v3450_v19 }
 0x3a1   :  { %4055 = vmatprep.mubr.msk.f32.mxu0 %vm757_vm5, %v4935_v43 }
 0x3a4   :  { %4056 = vmatmul.mubr.msk.f32.vlgmr.msra.gmra.mxu0 %vm757_vm5, %v4937_v45 }
 0x3a5   :  { %4058 = vmatprep.mubr.msk.f32.mxu0 %vm757_vm5, %v4947_v54  ;;  %4123 = vmatpush3.msk.msra.mxu0 %vm1765_vm7, %v3450_v19 }
 0x3a6   :  { %4124 = vmatprep.subr.mxu0 %v3449_v21 }
 0x3a7   :  { %4125 = vmatpush3.msra.mxu0 %v3449_v21 }
 0x3a8   :  { %4059 = vmatmul.mubr.msk.f32.gmra.mxu0 %vm757_vm5, %v4953_v58  ;;  %4126 = vmatprep.subr.mxu0 %v3448_v23 }
 0x3a9   :  { %4061 = vmatprep.mubr.msk.f32.mxu0 %vm757_vm5, %v4962_v62  ;;  %4127 = vmatpush3.msra.mxu0 %v3448_v23 }
 0x3aa   :  { %4128 = vmatprep.subr.mxu0 %v3447_v25 }
 0x3ab   :  { %4129 = vmatpush3.msra.mxu0 %v3447_v25 }
 0x3ac   :  { %4062 = vmatmul.mubr.msk.f32.gmra.mxu0 %vm757_vm5, %v4967_v1  ;;  %4130 = vmatprep.subr.mxu0 %v3446_v27 }
 0x3ad   :  { %4131 = vmatpush3.msra.mxu0 %v3446_v27 }
 0x438   :  { %v4019_v28 = vpop.f32.mrf.mxu1 }
 0x43a   :  { %v1273_v29 = vpop.f32.mrf.mxu1 }
 0x43c   :  { %v4022_v30 = vpop.f32.mrf.mxu1 }
 0x43e   :  { %v1283_v31 = vpop.f32.mrf.mxu1 }
 0x440   :  { %v4025_v32 = vpop.f32.mrf.mxu1 }
 0x442   :  { %v1293_v33 = vpop.f32.mrf.mxu1 }
 0x444   :  { %v4028_v34 = vpop.f32.mrf.mxu1 }
 0x446   :  { %v1303_v35 = vpop.f32.mrf.mxu1 }
 0x448   :  { %v4031_v36 = vpop.f32.mrf.mxu1 }
 0x44a   :  { %v1313_v37 = vpop.f32.mrf.mxu1 }
 0x44c   :  { %v5144_v43 = vpop.f32.mrf.mxu0 }
 0x44d   :  { %v1279_v44 = vadd.f32 %v4019_v28, %v5144_v43 }
 0x44e   :  { %v5146_v45 = vpop.f32.mrf.mxu0  ;;  %v5246_v40 = vpop.f32.mrf.mxu1 }
 0x44f   :  { %v1274_v48 = vadd.f32 %v1273_v29, %v5146_v45 }
 0x450   :  { %v5148_v54 = vpop.f32.mrf.mxu0  ;;  %v5248_v41 = vpop.f32.mrf.mxu1 }
 0x451   :  { %v1289_v51 = vadd.f32 %v4022_v30, %v5148_v54 }
 0x452   :  { %v5150_v56 = vpop.f32.mrf.mxu0 }
 0x454   :  { %v5152_v57 = vpop.f32.mrf.mxu0 }
 0x455   :  { %v1299_v43 = vadd.f32 %v4025_v32, %v5152_v57 }
 0x456   :  { %v5154_v58 = vpop.f32.mrf.mxu0 }
 0x458   :  { %v5156_v59 = vpop.f32.mrf.mxu0 }
 0x45a   :  { %v5158_v60 = vpop.f32.mrf.mxu0 }
 0x45b   :  { %v1304_v19 = vadd.f32 %v1303_v35, %v5158_v60 }
 0x45c   :  { %v5160_v61 = vpop.f32.mrf.mxu0 }
 0x45e   :  { %v5162_v62 = vpop.f32.mrf.mxu0 }
 0x45f   :  { %v1314_v28 = vadd.f32 %v1313_v37, %v5162_v62 }
 0x460   :  { %v5164_v63 = vpop.f32.mrf.mxu0 }
 0x461   :  { %v1329_v32 = vadd.f32 %v5246_v40, %v5164_v63 }
 0x462   :  { %v5166_v1 = vpop.f32.mrf.mxu0 }
 0x463   :  { %v1324_v37 = vadd.f32 %v5248_v41, %v5166_v1 }
 0x464   :  { %v4057_v2 = vpop.f32.mrf.mxu0 }
 0x466   :  { %v1412_v3 = vpop.f32.mrf.mxu0 }
 0x468   :  { %v4060_v4 = vpop.f32.mrf.mxu0 }
 0x46a   :  { %v1422_v5 = vpop.f32.mrf.mxu0 }
 0x46c   :  { %v4063_v6 = vpop.f32.mrf.mxu0 }
 0x46d   :  { %4064 = vmatprep.subr.mxu1 %v4063_v6 }
 0x46e   :  { %v1432_v7 = vpop.f32.mrf.mxu0  ;;  %4065 = vmatpush3.msra.mxu1 %v4063_v6  ;;  %v1662_v6 = vpop.permute.xlu0 %1661 }
 0x46f   :  { %4066 = vmatprep.subr.mxu1 %v1432_v7 }
 0x470   :  { %4067 = vmatpush3.msra.mxu1 %v1432_v7 }
 0x471   :  { %4068 = vmatprep.subr.mxu1 %v4060_v4 }
 0x472   :  { %4069 = vmatpush3.msra.mxu1 %v4060_v4 }
 0x473   :  { %4070 = vmatprep.subr.mxu1 %v1422_v5 }
 0x474   :  { %4071 = vmatpush3.msra.mxu1 %v1422_v5 }
 0x475   :  { %4072 = vmatprep.subr.mxu1 %v4057_v2 }
 0x476   :  { %4073 = vmatpush3.msra.mxu1 %v4057_v2  ;;  %v1667_v2 = vpop.permute.xlu1 %1666 }
 0x477   :  { %4074 = vmatprep.subr.mxu1 %v1412_v3 }
 0x478   :  { %4075 = vmatpush3.msra.mxu1 %v1412_v3  ;;  %v1284_v3 = vadd.f32 %v1283_v31, %v5150_v56 }
 0x479   :  { %4077 = vmatmul.mubr.msk.f32.vlgmr.msra.gmra.mxu1 %vm1009_vm6, %v3410_v8  ;;  %4094 = vmatprep.subr.msk.mxu1 %vm1765_vm7, %v1727_v0 }
 0x47a   :  { %4079 = vmatprep.mubr.msk.f32.mxu1 %vm1009_vm6, %v3411_v9  ;;  %4095 = vmatpush3.msk.msra.mxu1 %vm1765_vm7, %v1727_v0  ;;  %v1677_v57 = vpop.permute.xlu1 %1676 }
 0x47b   :  { %4096 = vmatprep.subr.mxu1 %v1726_v20 }
 0x47c   :  { %4097 = vmatpush3.msra.mxu1 %v1726_v20 }
 0x47d   :  { %4080 = vmatmul.mubr.msk.f32.gmra.mxu1 %vm1009_vm6, %v3412_v10  ;;  %4098 = vmatprep.subr.mxu1 %v1725_v22 }
 0x47e   :  { %4082 = vmatprep.mubr.msk.f32.mxu1 %vm1009_vm6, %v3413_v11  ;;  %4099 = vmatpush3.msra.mxu1 %v1725_v22  ;;  %v1294_v11 = vadd.f32 %v1293_v33, %v5154_v58  ;;  %v1687_v27 = vpop.permute.xlu1 %1686 }
 0x47f   :  { %4100 = vmatprep.subr.mxu1 %v1724_v24 }
 0x480   :  { %4101 = vmatpush3.msra.mxu1 %v1724_v24 }
 0x481   :  { %4083 = vmatmul.mubr.msk.f32.gmra.mxu1 %vm1009_vm6, %v3414_v12  ;;  %4102 = vmatprep.subr.mxu1 %v1723_v26 }
 0x482   :  { %4085 = vmatprep.mubr.msk.f32.mxu1 %vm1009_vm6, %v3415_v13  ;;  %4103 = vmatpush3.msra.mxu1 %v1723_v26  ;;  %v1697_v63 = vpop.permute.xlu1 %1696 }
 0x485   :  { %4086 = vmatmul.mubr.msk.f32.gmra.mxu1 %vm1009_vm6, %v3416_v14  ;;  %v1309_v14 = vadd.f32 %v4028_v34, %v5156_v59  ;;  %v1319_v59 = vadd.f32 %v4031_v36, %v5160_v61 }
 0x486   :  { %4088 = vmatprep.mubr.msk.f32.mxu1 %vm1009_vm6, %v3417_v15 }
 0x489   :  { %4089 = vmatmul.mubr.msk.f32.gmra.mxu1 %vm1009_vm6, %v3418_v16  ;;  %v1672_v16 = vpop.permute.xlu0 %1671 }
 0x48a   :  { %4091 = vmatprep.mubr.msk.f32.mxu1 %vm1009_vm6, %v3419_v17 }
 0x48d   :  { %4092 = vmatmul.mubr.msk.f32.gmra.mxu1 %vm1009_vm6, %v3420_v18  ;;  %v1682_v31 = vpop.permute.xlu0 %1681 }
 0x491   :  { %v1692_v1 = vpop.permute.xlu0 %1691 }
 0x539   :  { %v4078_v47 = vpop.f32.mrf.mxu1 }
 0x53a   :  { %v1616_v49 = vadd.f32 %v4078_v47, %v1279_v44 }
 0x53b   :  { %v1556_v50 = vpop.f32.mrf.mxu1 }
 0x53c   :  { %v1615_v52 = vadd.f32 %v1556_v50, %v1274_v48  ;;  %v1700_v53 = vadd.f32 %v1647_v38, %v1616_v49  ;;  %v3464_v50 = vld [vmem:[%s5909_s8 + $0xc0] sm:$0xff] }
 0x53d   :  { %v4081_v55 = vpop.f32.mrf.mxu1 }
 0x53e   :  { %v1699_v4 = vadd.f32 %v1642_v39, %v1615_v52  ;;  %v1618_v5 = vadd.f32 %v4081_v55, %v1289_v51  ;;  %v5257_v9 = vmax.f32 %v1700_v53, 0.0  ;;  %v1894_v51 = vld [vmem:[%s5909_s8] sm:$0xff] }
 0x53f   :  { %v1566_v7 = vpop.f32.mrf.mxu1 }
 0x540   :  { %v5255_v8 = vmax.f32 %v1699_v4, 0.0  ;;  %v1617_v45 = vadd.f32 %v1566_v7, %v1284_v3  ;;  %v1702_v10 = vadd.f32 %v1657_v42, %v1618_v5 }
 0x541   :  { %v4084_v54 = vpop.f32.mrf.mxu1 }
 0x542   :  { %v1701_v12 = vadd.f32 %v1652_v46, %v1617_v45  ;;  %v1620_v13 = vadd.f32 %v4084_v54, %v1299_v43  ;;  %4104 = vmatprep.mubr.msk.f32.mxu1 %vm1728_vm8, %v5255_v8  ;;  %4132 = vmatprep.mubr.msk.f32.mxu0 %vm1728_vm8, %v5255_v8  ;;  %v5271_v17 = vmax.f32 %v1702_v10, 0.0 }
 0x543   :  { %v1576_v56 = vpop.f32.mrf.mxu1  ;;  %4105 = vmatmul.mubr.msk.f32.vlgmr.msra.gmra.mxu1 %vm1728_vm8, %v5257_v9  ;;  %4133 = vmatmul.mubr.msk.f32.vlgmr.msra.gmra.mxu0 %vm1728_vm8, %v5257_v9 }
 0x544   :  { %v5269_v15 = vmax.f32 %v1701_v12, 0.0  ;;  %v1619_v58 = vadd.f32 %v1576_v56, %v1294_v11  ;;  %v1704_v18 = vadd.f32 %v1667_v2, %v1620_v13 }
 0x545   :  { %v4087_v0 = vpop.f32.mrf.mxu1 }
 0x546   :  { %v1703_v20 = vadd.f32 %v1662_v6, %v1619_v58  ;;  %v1622_v21 = vadd.f32 %v4087_v0, %v1309_v14  ;;  %4107 = vmatprep.mubr.msk.f32.mxu1 %vm1728_vm8, %v5269_v15  ;;  %4135 = vmatprep.mubr.msk.f32.mxu0 %vm1728_vm8, %v5269_v15  ;;  %v5285_v24 = vmax.f32 %v1704_v18, 0.0 }
 0x547   :  { %v1586_v22 = vpop.f32.mrf.mxu1  ;;  %4108 = vmatmul.mubr.msk.f32.gmra.mxu1 %vm1728_vm8, %v5271_v17  ;;  %4136 = vmatmul.mubr.msk.f32.gmra.mxu0 %vm1728_vm8, %v5271_v17 }
 0x548   :  { %v5283_v23 = vmax.f32 %v1703_v20, 0.0  ;;  %v1621_v60 = vadd.f32 %v1586_v22, %v1304_v19  ;;  %v1706_v25 = vadd.f32 %v1677_v57, %v1622_v21  ;;  %v3465_v20 = vld [vmem:[%s5909_s8 + $0xc8] sm:$0xff]  ;;  %v3466_v22 = vld [vmem:[%s5909_s8 + $0xd0] sm:$0xff] }
 0x549   :  { %v4090_v26 = vpop.f32.mrf.mxu1  ;;  %v1895_v21 = vld [vmem:[%s5909_s8 + $0x8] sm:$0xff] }
 0x54a   :  { %v1705_v29 = vadd.f32 %v1672_v16, %v1621_v60  ;;  %v1624_v30 = vadd.f32 %v4090_v26, %v1319_v59  ;;  %4110 = vmatprep.mubr.msk.f32.mxu1 %vm1728_vm8, %v5283_v23  ;;  %4138 = vmatprep.mubr.msk.f32.mxu0 %vm1728_vm8, %v5283_v23  ;;  %v5300_v34 = vmax.f32 %v1706_v25, 0.0  ;;  %v1896_v59 = vld [vmem:[%s5909_s8 + $0x10] sm:$0xff]  ;;  %v3467_v25 = vld [vmem:[%s5909_s8 + $0xd8] sm:$0xff] }
 0x54b   :  { %v1596_v61 = vpop.f32.mrf.mxu1  ;;  %4111 = vmatmul.mubr.msk.f32.gmra.mxu1 %vm1728_vm8, %v5285_v24  ;;  %4139 = vmatmul.mubr.msk.f32.gmra.mxu0 %vm1728_vm8, %v5285_v24  ;;  %v3540_v60 = vld [vmem:[%s5908_s7 + $0x70] sm:$0x1f]  ;;  %v1897_v26 = vld [vmem:[%s5909_s8 + $0x18] sm:$0xff] }
 0x54c   :  { %v5298_v62 = vmax.f32 %v1705_v29, 0.0  ;;  %v1623_v33 = vadd.f32 %v1596_v61, %v1314_v28  ;;  %v1708_v35 = vadd.f32 %v1687_v27, %v1624_v30  ;;  %v3468_v27 = vld [vmem:[%s5909_s8 + $0xe0] sm:$0xff]  ;;  %v3539_v29 = vld [vmem:[%s5908_s7 + $0x68] sm:$0xff]  ;;  %v3470_v61 = vld [vmem:[%s5909_s8 + $0xf0] sm:$0xff] }
 0x54d   :  { %v4093_v36 = vpop.f32.mrf.mxu1  ;;  %v1898_v28 = vld [vmem:[%s5909_s8 + $0x20] sm:$0xff]  ;;  %v3469_v30 = vld [vmem:[%s5909_s8 + $0xe8] sm:$0xff] }
 0x54e   :  { %v1707_v38 = vadd.f32 %v1682_v31, %v1623_v33  ;;  %v1626_v39 = vadd.f32 %v4093_v36, %v1329_v32  ;;  %4113 = vmatprep.mubr.msk.f32.mxu1 %vm1728_vm8, %v5298_v62  ;;  %4141 = vmatprep.mubr.msk.f32.mxu0 %vm1728_vm8, %v5298_v62  ;;  %v5314_v41 = vmax.f32 %v1708_v35, 0.0  ;;  %v1899_v31 = vld [vmem:[%s5909_s8 + $0x28] sm:$0xff]  ;;  %v1900_v32 = vld [vmem:[%s5909_s8 + $0x30] sm:$0xff]  ;;  %v3538_v33 = vld [vmem:[%s5908_s7 + $0x60] sm:$0xff] }
 0x54f   :  { %v1606_v42 = vpop.f32.mrf.mxu1  ;;  %4114 = vmatmul.mubr.msk.f32.gmra.mxu1 %vm1728_vm8, %v5300_v34  ;;  %4142 = vmatmul.mubr.msk.f32.gmra.mxu0 %vm1728_vm8, %v5300_v34  ;;  %v3471_v35 = vld [vmem:[%s5909_s8 + $0xf8] sm:$0xff] }
 0x550   :  { %v5312_v40 = vmax.f32 %v1707_v38, 0.0  ;;  %v1625_v44 = vadd.f32 %v1606_v42, %v1324_v37  ;;  %v1710_v46 = vadd.f32 %v1697_v63, %v1626_v39  ;;  %v1901_v36 = vld [vmem:[%s5909_s8 + $0x38] sm:$0xff]  ;;  %v3472_v37 = vld [vmem:[%s5909_s8 + $0x100] sm:$0xff]  ;;  %v3473_v42 = vld [vmem:[%s5909_s8 + $0x108] sm:$0xff] }
 0x551   :  { %v1902_v38 = vld [vmem:[%s5909_s8 + $0x40] sm:$0xff]  ;;  %v3537_v39 = vld [vmem:[%s5908_s7 + $0x58] sm:$0xff]  ;;  %v1903_v63 = vld [vmem:[%s5909_s8 + $0x48] sm:$0xff] }
 0x552   :  { %v1709_v47 = vadd.f32 %v1692_v1, %v1625_v44  ;;  %4116 = vmatprep.mubr.msk.f32.mxu1 %vm1728_vm8, %v5312_v40  ;;  %4144 = vmatprep.mubr.msk.f32.mxu0 %vm1728_vm8, %v5312_v40  ;;  %v5326_v49 = vmax.f32 %v1710_v46, 0.0  ;;  %v3474_v44 = vld [vmem:[%s5909_s8 + $0x110] sm:$0xff] }
 0x553   :  { %4117 = vmatmul.mubr.msk.f32.gmra.mxu1 %vm1728_vm8, %v5314_v41  ;;  %4145 = vmatmul.mubr.msk.f32.gmra.mxu0 %vm1728_vm8, %v5314_v41  ;;  %v1904_v1 = vld [vmem:[%s5909_s8 + $0x50] sm:$0xff] }
 0x554   :  { %v5324_v48 = vmax.f32 %v1709_v47, 0.0  ;;  %v3536_v46 = vld [vmem:[%s5908_s7 + $0x50] sm:$0xff]  ;;  %v3475_v47 = vld [vmem:[%s5909_s8 + $0x118] sm:$0xff] }
 0x556   :  { %4119 = vmatprep.mubr.msk.f32.mxu1 %vm1728_vm8, %v5324_v48  ;;  %4147 = vmatprep.mubr.msk.f32.mxu0 %vm1728_vm8, %v5324_v48 }
 0x557   :  { %4120 = vmatmul.mubr.msk.f32.gmra.mxu1 %vm1728_vm8, %v5326_v49  ;;  %4148 = vmatmul.mubr.msk.f32.gmra.mxu0 %vm1728_vm8, %v5326_v49 }
 0x558   :  { %4174 = vmatprep.mubr.msk.f32.mxu1 %vm2077_vm9, %v3464_v50  ;;  %4234 = vmatprep.mubr.msk.f32.mxu0 %vm2077_vm9, %v1894_v51  ;;  %v1905_v50 = vld [vmem:[%s5909_s8 + $0x58] sm:$0xff]  ;;  %v3476_v51 = vld [vmem:[%s5909_s8 + $0x120] sm:$0xff] }
 0x603   :  { %v5344_v52 = vpop.f32.mrf.mxu1  ;;  %v5346_v53 = vpop.f32.mrf.mxu0 }
 0x605   :  { %v5348_v55 = vpop.f32.mrf.mxu1  ;;  %v5350_v2 = vpop.f32.mrf.mxu0 }
 0x607   :  { %v4109_v3 = vpop.f32.mrf.mxu1  ;;  %v4137_v4 = vpop.f32.mrf.mxu0 }
 0x609   :  { %v1845_v5 = vpop.f32.mrf.mxu1  ;;  %v2003_v6 = vpop.f32.mrf.mxu0 }
 0x60b   :  { %v4112_v7 = vpop.f32.mrf.mxu1  ;;  %v4140_v43 = vpop.f32.mrf.mxu0 }
 0x60d   :  { %v1855_v45 = vpop.f32.mrf.mxu1  ;;  %v2013_v10 = vpop.f32.mrf.mxu0 }
 0x60f   :  { %v4115_v54 = vpop.f32.mrf.mxu1  ;;  %v4143_v11 = vpop.f32.mrf.mxu0 }
 0x611   :  { %v1865_v12 = vpop.f32.mrf.mxu1  ;;  %v2023_v13 = vpop.f32.mrf.mxu0 }
 0x613   :  { %v4118_v56 = vpop.f32.mrf.mxu1  ;;  %v4146_v57 = vpop.f32.mrf.mxu0 }
 0x615   :  { %v1875_v14 = vpop.f32.mrf.mxu1  ;;  %v2033_v58 = vpop.f32.mrf.mxu0 }
 0x617   :  { %v4121_v16 = vpop.f32.mrf.mxu1  ;;  %v4149_v18 = vpop.f32.mrf.mxu0 }
 0x618   :  { %4150 = vmatprep.subr.mxu1 %v4149_v18  ;;  %4210 = vmatprep.subr.mxu0 %v4121_v16 }
 0x619   :  { %v1885_v0 = vpop.f32.mrf.mxu1  ;;  %v2043_v19 = vpop.f32.mrf.mxu0  ;;  %4151 = vmatpush3.msra.mxu1 %v4149_v18  ;;  %4211 = vmatpush3.msra.mxu0 %v4121_v16  ;;  %v1916_v16 = vld [vmem:[%s5909_s8 + $0xb0] sm:$0xff]  ;;  %v3487_v18 = vld [vmem:[%s5909_s8 + $0x178] sm:$0xff] }
 0x61a   :  { %4152 = vmatprep.subr.mxu1 %v2043_v19  ;;  %4212 = vmatprep.subr.mxu0 %v1885_v0 }
 0x61b   :  { %4153 = vmatpush3.msra.mxu1 %v2043_v19  ;;  %4213 = vmatpush3.msra.mxu0 %v1885_v0  ;;  %v1917_v0 = vld [vmem:[%s5909_s8 + $0xb8] sm:$0xff] }
 0x61c   :  { %4154 = vmatprep.subr.mxu1 %v4146_v57  ;;  %4214 = vmatprep.subr.mxu0 %v4118_v56 }
 0x61d   :  { %4155 = vmatpush3.msra.mxu1 %v4146_v57  ;;  %4215 = vmatpush3.msra.mxu0 %v4118_v56  ;;  %v1914_v56 = vld [vmem:[%s5909_s8 + $0xa0] sm:$0xff]  ;;  %v3485_v57 = vld [vmem:[%s5909_s8 + $0x168] sm:$0xff] }
 0x61e   :  { %4156 = vmatprep.subr.mxu1 %v2033_v58  ;;  %4216 = vmatprep.subr.mxu0 %v1875_v14 }
 0x61f   :  { %4157 = vmatpush3.msra.mxu1 %v2033_v58  ;;  %4217 = vmatpush3.msra.mxu0 %v1875_v14  ;;  %v1915_v14 = vld [vmem:[%s5909_s8 + $0xa8] sm:$0xff]  ;;  %v3486_v58 = vld [vmem:[%s5909_s8 + $0x170] sm:$0xff] }
 0x620   :  { %4158 = vmatprep.subr.mxu1 %v4143_v11  ;;  %4218 = vmatprep.subr.mxu0 %v4115_v54 }
 0x621   :  { %4159 = vmatpush3.msra.mxu1 %v4143_v11  ;;  %4219 = vmatpush3.msra.mxu0 %v4115_v54  ;;  %v1912_v54 = vld [vmem:[%s5909_s8 + $0x90] sm:$0xff]  ;;  %v3483_v11 = vld [vmem:[%s5909_s8 + $0x158] sm:$0xff] }
 0x622   :  { %4160 = vmatprep.subr.mxu1 %v2023_v13  ;;  %4220 = vmatprep.subr.mxu0 %v1865_v12 }
 0x623   :  { %4161 = vmatpush3.msra.mxu1 %v2023_v13  ;;  %4221 = vmatpush3.msra.mxu0 %v1865_v12  ;;  %v1913_v12 = vld [vmem:[%s5909_s8 + $0x98] sm:$0xff]  ;;  %v3484_v13 = vld [vmem:[%s5909_s8 + $0x160] sm:$0xff] }
 0x624   :  { %4162 = vmatprep.subr.mxu1 %v4140_v43  ;;  %4222 = vmatprep.subr.mxu0 %v4112_v7 }
 0x625   :  { %4163 = vmatpush3.msra.mxu1 %v4140_v43  ;;  %4223 = vmatpush3.msra.mxu0 %v4112_v7  ;;  %v1910_v7 = vld [vmem:[%s5909_s8 + $0x80] sm:$0xff]  ;;  %v3481_v43 = vld [vmem:[%s5909_s8 + $0x148] sm:$0xff] }
 0x626   :  { %4164 = vmatprep.subr.mxu1 %v2013_v10  ;;  %4224 = vmatprep.subr.mxu0 %v1855_v45 }
 0x627   :  { %4165 = vmatpush3.msra.mxu1 %v2013_v10  ;;  %4225 = vmatpush3.msra.mxu0 %v1855_v45  ;;  %v1911_v45 = vld [vmem:[%s5909_s8 + $0x88] sm:$0xff]  ;;  %v3482_v10 = vld [vmem:[%s5909_s8 + $0x150] sm:$0xff] }
 0x628   :  { %4166 = vmatprep.subr.mxu1 %v4137_v4  ;;  %4226 = vmatprep.subr.mxu0 %v4109_v3 }
 0x629   :  { %4167 = vmatpush3.msra.mxu1 %v4137_v4  ;;  %4227 = vmatpush3.msra.mxu0 %v4109_v3  ;;  %v1908_v3 = vld [vmem:[%s5909_s8 + $0x70] sm:$0xff]  ;;  %v3479_v4 = vld [vmem:[%s5909_s8 + $0x138] sm:$0xff] }
 0x62a   :  { %4168 = vmatprep.subr.mxu1 %v2003_v6  ;;  %4228 = vmatprep.subr.mxu0 %v1845_v5 }
 0x62b   :  { %4169 = vmatpush3.msra.mxu1 %v2003_v6  ;;  %4229 = vmatpush3.msra.mxu0 %v1845_v5  ;;  %v1909_v5 = vld [vmem:[%s5909_s8 + $0x78] sm:$0xff]  ;;  %v3480_v6 = vld [vmem:[%s5909_s8 + $0x140] sm:$0xff] }
 0x62c   :  { %4170 = vmatprep.subr.mxu1 %v5346_v53  ;;  %4230 = vmatprep.subr.mxu0 %v5344_v52 }
 0x62d   :  { %4171 = vmatpush3.msra.mxu1 %v5346_v53  ;;  %4231 = vmatpush3.msra.mxu0 %v5344_v52  ;;  %v1906_v52 = vld [vmem:[%s5909_s8 + $0x60] sm:$0xff]  ;;  %v3477_v53 = vld [vmem:[%s5909_s8 + $0x128] sm:$0xff] }
 0x62e   :  { %4172 = vmatprep.subr.mxu1 %v5350_v2  ;;  %4232 = vmatprep.subr.mxu0 %v5348_v55 }
 0x62f   :  { %4173 = vmatpush3.msra.mxu1 %v5350_v2  ;;  %4233 = vmatpush3.msra.mxu0 %v5348_v55  ;;  %v1907_v55 = vld [vmem:[%s5909_s8 + $0x68] sm:$0xff]  ;;  %v3478_v2 = vld [vmem:[%s5909_s8 + $0x130] sm:$0xff] }
 0x630   :  { %4175 = vmatmul.mubr.msk.f32.vlgmr.msra.gmra.mxu1 %vm2077_vm9, %v3465_v20  ;;  %4235 = vmatmul.mubr.msk.f32.vlgmr.msra.gmra.mxu0 %vm2077_vm9, %v1895_v21 }
 0x631   :  { %4177 = vmatprep.mubr.msk.f32.mxu1 %vm2077_vm9, %v3466_v22  ;;  %4237 = vmatprep.mubr.msk.f32.mxu0 %vm2077_vm9, %v1896_v59 }
 0x632   :  { %4270 = vmatprep.subr.msk.mxu1 %vm1765_vm7, %v3540_v60 }
 0x633   :  { %4271 = vmatpush3.msk.msra.mxu1 %vm1765_vm7, %v3540_v60 }
 0x634   :  { %4178 = vmatmul.mubr.msk.f32.gmra.mxu1 %vm2077_vm9, %v3467_v25  ;;  %4238 = vmatmul.mubr.msk.f32.gmra.mxu0 %vm2077_vm9, %v1897_v26 }
 0x635   :  { %4180 = vmatprep.mubr.msk.f32.mxu1 %vm2077_vm9, %v3468_v27  ;;  %4240 = vmatprep.mubr.msk.f32.mxu0 %vm2077_vm9, %v1898_v28 }
 0x636   :  { %4272 = vmatprep.subr.mxu1 %v3539_v29 }
 0x637   :  { %4273 = vmatpush3.msra.mxu1 %v3539_v29 }
 0x638   :  { %4181 = vmatmul.mubr.msk.f32.gmra.mxu1 %vm2077_vm9, %v3469_v30  ;;  %4241 = vmatmul.mubr.msk.f32.gmra.mxu0 %vm2077_vm9, %v1899_v31 }
 0x639   :  { %4183 = vmatprep.mubr.msk.f32.mxu1 %vm2077_vm9, %v3470_v61  ;;  %4243 = vmatprep.mubr.msk.f32.mxu0 %vm2077_vm9, %v1900_v32 }
 0x63a   :  { %4274 = vmatprep.subr.mxu1 %v3538_v33 }
 0x63b   :  { %4275 = vmatpush3.msra.mxu1 %v3538_v33 }
 0x63c   :  { %4184 = vmatmul.mubr.msk.f32.gmra.mxu1 %vm2077_vm9, %v3471_v35  ;;  %4244 = vmatmul.mubr.msk.f32.gmra.mxu0 %vm2077_vm9, %v1901_v36 }
 0x63d   :  { %4186 = vmatprep.mubr.msk.f32.mxu1 %vm2077_vm9, %v3472_v37  ;;  %4246 = vmatprep.mubr.msk.f32.mxu0 %vm2077_vm9, %v1902_v38 }
 0x63e   :  { %4276 = vmatprep.subr.mxu1 %v3537_v39 }
 0x63f   :  { %4277 = vmatpush3.msra.mxu1 %v3537_v39 }
 0x640   :  { %4187 = vmatmul.mubr.msk.f32.gmra.mxu1 %vm2077_vm9, %v3473_v42  ;;  %4247 = vmatmul.mubr.msk.f32.gmra.mxu0 %vm2077_vm9, %v1903_v63 }
 0x641   :  { %4189 = vmatprep.mubr.msk.f32.mxu1 %vm2077_vm9, %v3474_v44  ;;  %4249 = vmatprep.mubr.msk.f32.mxu0 %vm2077_vm9, %v1904_v1 }
 0x642   :  { %4278 = vmatprep.subr.mxu1 %v3536_v46 }
 0x643   :  { %4279 = vmatpush3.msra.mxu1 %v3536_v46  ;;  %v3555_v46 = vld [vmem:[%s5909_s8 + $0x188] sm:$0xff] }
 0x644   :  { %4190 = vmatmul.mubr.msk.f32.gmra.mxu1 %vm2077_vm9, %v3475_v47  ;;  %4250 = vmatmul.mubr.msk.f32.gmra.mxu0 %vm2077_vm9, %v1905_v50  ;;  %v3556_v47 = vld [vmem:[%s5909_s8 + $0x190] sm:$0xff]  ;;  %v3557_v50 = vld [vmem:[%s5909_s8 + $0x198] sm:$0xff] }
 0x645   :  { %4192 = vmatprep.mubr.msk.f32.mxu1 %vm2077_vm9, %v3476_v51  ;;  %4252 = vmatprep.mubr.msk.f32.mxu0 %vm2077_vm9, %v1906_v52  ;;  %v3558_v51 = vld [vmem:[%s5909_s8 + $0x1a0] sm:$0xff]  ;;  %v3559_v52 = vld [vmem:[%s5909_s8 + $0x1a8] sm:$0xff] }
 0x648   :  { %4193 = vmatmul.mubr.msk.f32.gmra.mxu1 %vm2077_vm9, %v3477_v53  ;;  %4253 = vmatmul.mubr.msk.f32.gmra.mxu0 %vm2077_vm9, %v1907_v55  ;;  %v3560_v53 = vld [vmem:[%s5909_s8 + $0x1b0] sm:$0xff]  ;;  %v3561_v55 = vld [vmem:[%s5909_s8 + $0x1b8] sm:$0xff] }
 0x649   :  { %4195 = vmatprep.mubr.msk.f32.mxu1 %vm2077_vm9, %v3478_v2  ;;  %4255 = vmatprep.mubr.msk.f32.mxu0 %vm2077_vm9, %v1908_v3  ;;  %v3562_v2 = vld [vmem:[%s5909_s8 + $0x1c0] sm:$0xff]  ;;  %v3563_v3 = vld [vmem:[%s5909_s8 + $0x1c8] sm:$0xff] }
 0x64c   :  { %4196 = vmatmul.mubr.msk.f32.gmra.mxu1 %vm2077_vm9, %v3479_v4  ;;  %4256 = vmatmul.mubr.msk.f32.gmra.mxu0 %vm2077_vm9, %v1909_v5  ;;  %v3564_v4 = vld [vmem:[%s5909_s8 + $0x1d0] sm:$0xff]  ;;  %v3565_v5 = vld [vmem:[%s5909_s8 + $0x1d8] sm:$0xff] }
 0x64d   :  { %4198 = vmatprep.mubr.msk.f32.mxu1 %vm2077_vm9, %v3480_v6  ;;  %4258 = vmatprep.mubr.msk.f32.mxu0 %vm2077_vm9, %v1910_v7  ;;  %v3566_v6 = vld [vmem:[%s5909_s8 + $0x1e0] sm:$0xff]  ;;  %v3567_v7 = vld [vmem:[%s5909_s8 + $0x1e8] sm:$0xff] }
 0x650   :  { %4199 = vmatmul.mubr.msk.f32.gmra.mxu1 %vm2077_vm9, %v3481_v43  ;;  %4259 = vmatmul.mubr.msk.f32.gmra.mxu0 %vm2077_vm9, %v1911_v45  ;;  %v3568_v43 = vld [vmem:[%s5909_s8 + $0x1f0] sm:$0xff]  ;;  %v3569_v45 = vld [vmem:[%s5909_s8 + $0x1f8] sm:$0xff] }
 0x651   :  { %4201 = vmatprep.mubr.msk.f32.mxu1 %vm2077_vm9, %v3482_v10  ;;  %4261 = vmatprep.mubr.msk.f32.mxu0 %vm2077_vm9, %v1912_v54  ;;  %v3570_v10 = vld [vmem:[%s5909_s8 + $0x200] sm:$0xff]  ;;  %v3571_v54 = vld [vmem:[%s5909_s8 + $0x208] sm:$0xff] }
 0x654   :  { %4202 = vmatmul.mubr.msk.f32.gmra.mxu1 %vm2077_vm9, %v3483_v11  ;;  %4262 = vmatmul.mubr.msk.f32.gmra.mxu0 %vm2077_vm9, %v1913_v12  ;;  %v3572_v11 = vld [vmem:[%s5909_s8 + $0x210] sm:$0xff]  ;;  %v3573_v12 = vld [vmem:[%s5909_s8 + $0x218] sm:$0xff] }
 0x655   :  { %4204 = vmatprep.mubr.msk.f32.mxu1 %vm2077_vm9, %v3484_v13  ;;  %4264 = vmatprep.mubr.msk.f32.mxu0 %vm2077_vm9, %v1914_v56  ;;  %v3574_v13 = vld [vmem:[%s5909_s8 + $0x220] sm:$0xff]  ;;  %v3575_v56 = vld [vmem:[%s5909_s8 + $0x228] sm:$0xff] }
 0x658   :  { %4205 = vmatmul.mubr.msk.f32.gmra.mxu1 %vm2077_vm9, %v3485_v57  ;;  %4265 = vmatmul.mubr.msk.f32.gmra.mxu0 %vm2077_vm9, %v1915_v14  ;;  %v3576_v57 = vld [vmem:[%s5909_s8 + $0x230] sm:$0xff]  ;;  %v3577_v14 = vld [vmem:[%s5909_s8 + $0x238] sm:$0xff] }
 0x659   :  { %4207 = vmatprep.mubr.msk.f32.mxu1 %vm2077_vm9, %v3486_v58  ;;  %4267 = vmatprep.mubr.msk.f32.mxu0 %vm2077_vm9, %v1916_v16 }
 0x65c   :  { %4208 = vmatmul.mubr.msk.f32.gmra.mxu1 %vm2077_vm9, %v3487_v18  ;;  %4268 = vmatmul.mubr.msk.f32.gmra.mxu0 %vm2077_vm9, %v1917_v0 }
 0x65d   :  { %4280 = vmatprep.mubr.msk.f32.mxu1 %vm1728_vm8, %v5255_v8  ;;  %v3554_v8 = vld [vmem:[%s5909_s8 + $0x180] sm:$0xff] }
 0x65e   :  { %4322 = vmatprep.mubr.msk.f32.mxu0 %vm2077_vm9, %v3554_v8 }
 0x660   :  { %4281 = vmatmul.mubr.msk.f32.vlgmr.msra.gmra.mxu1 %vm1728_vm8, %v5257_v9 }
 0x661   :  { %4283 = vmatprep.mubr.msk.f32.mxu1 %vm1728_vm8, %v5269_v15 }
 0x664   :  { %4284 = vmatmul.mubr.msk.f32.gmra.mxu1 %vm1728_vm8, %v5271_v17 }
 0x665   :  { %4286 = vmatprep.mubr.msk.f32.mxu1 %vm1728_vm8, %v5283_v23 }
 0x668   :  { %4287 = vmatmul.mubr.msk.f32.gmra.mxu1 %vm1728_vm8, %v5285_v24 }
 0x669   :  { %4289 = vmatprep.mubr.msk.f32.mxu1 %vm1728_vm8, %v5298_v62 }
 0x66c   :  { %4290 = vmatmul.mubr.msk.f32.gmra.mxu1 %vm1728_vm8, %v5300_v34 }
 0x66d   :  { %4292 = vmatprep.mubr.msk.f32.mxu1 %vm1728_vm8, %v5312_v40 }
 0x670   :  { %4293 = vmatmul.mubr.msk.f32.gmra.mxu1 %vm1728_vm8, %v5314_v41 }
 0x671   :  { %4295 = vmatprep.mubr.msk.f32.mxu1 %vm1728_vm8, %v5324_v48 }
 0x674   :  { %4296 = vmatmul.mubr.msk.f32.gmra.mxu1 %vm1728_vm8, %v5326_v49 }
 0x6f0   :  { %v5589_v9 = vpop.f32.mrf.mxu1  ;;  %v4236_v58 = vpop.f32.mrf.mxu0 }
 0x6f2   :  { %v5591_v15 = vpop.f32.mrf.mxu1  ;;  %v2473_v16 = vpop.f32.mrf.mxu0 }
 0x6f4   :  { %v5593_v17 = vpop.f32.mrf.mxu1  ;;  %v4239_v18 = vpop.f32.mrf.mxu0 }
 0x6f6   :  { %v5595_v23 = vpop.f32.mrf.mxu1  ;;  %v2483_v0 = vpop.f32.mrf.mxu0 }
 0x6f8   :  { %v5597_v24 = vpop.f32.mrf.mxu1  ;;  %v4242_v8 = vpop.f32.mrf.mxu0 }
 0x6fa   :  { %v5599_v62 = vpop.f32.mrf.mxu1 }
 0x6fc   :  { %v5601_v34 = vpop.f32.mrf.mxu1 }
 0x6fe   :  { %v5603_v40 = vpop.f32.mrf.mxu1 }
 0x700   :  { %v5605_v41 = vpop.f32.mrf.mxu1 }
 0x702   :  { %v5607_v48 = vpop.f32.mrf.mxu1 }
 0x704   :  { %v5609_v49 = vpop.f32.mrf.mxu1 }
 0x706   :  { %v5611_v19 = vpop.f32.mrf.mxu1 }
 0x708   :  { %v5613_v20 = vpop.f32.mrf.mxu1 }
 0x70a   :  { %v5615_v21 = vpop.f32.mrf.mxu1 }
 0x70c   :  { %v5617_v22 = vpop.f32.mrf.mxu1 }
 0x70e   :  { %v5619_v59 = vpop.f32.mrf.mxu1 }
 0x710   :  { %v5621_v60 = vpop.f32.mrf.mxu1 }
 0x712   :  { %v5623_v25 = vpop.f32.mrf.mxu1 }
 0x714   :  { %v5625_v26 = vpop.f32.mrf.mxu1 }
 0x716   :  { %v5627_v27 = vpop.f32.mrf.mxu1 }
 0x718   :  { %v5629_v28 = vpop.f32.mrf.mxu1 }
 0x71a   :  { %v5631_v29 = vpop.f32.mrf.mxu1 }
 0x71b   :  { %5911 = vst [vmem:[#allocation2_spill] sm:$0xff] %v5631_v29 }
 0x71c   :  { %v5633_v30 = vpop.f32.mrf.mxu1 }
 0x71d   :  { %5912 = vst [vmem:[#allocation3_spill] sm:$0xff] %v5633_v30 }
 0x71e   :  { %v5635_v31 = vpop.f32.mrf.mxu1 }
 0x71f   :  { %5913 = vst [vmem:[#allocation4_spill] sm:$0xff] %v5635_v31 }
 0x720   :  { %v4282_v61 = vpop.f32.mrf.mxu1 }
 0x722   :  { %v2667_v32 = vpop.f32.mrf.mxu1 }
 0x724   :  { %v4285_v33 = vpop.f32.mrf.mxu1 }
 0x726   :  { %v2677_v35 = vpop.f32.mrf.mxu1 }
 0x728   :  { %v4288_v36 = vpop.f32.mrf.mxu1 }
 0x72a   :  { %v2687_v37 = vpop.f32.mrf.mxu1 }
 0x72c   :  { %v4291_v38 = vpop.f32.mrf.mxu1 }
 0x72e   :  { %v2697_v39 = vpop.f32.mrf.mxu1 }
 0x730   :  { %v4294_v42 = vpop.f32.mrf.mxu1 }
 0x732   :  { %v2707_v63 = vpop.f32.mrf.mxu1 }
 0x734   :  { %v4297_v44 = vpop.f32.mrf.mxu1 }
 0x735   :  { %4298 = vmatprep.subr.mxu0 %v4297_v44 }
 0x736   :  { %v2717_v1 = vpop.f32.mrf.mxu1  ;;  %4299 = vmatpush3.msra.mxu0 %v4297_v44 }
 0x737   :  { %4300 = vmatprep.subr.mxu0 %v2717_v1 }
 0x738   :  { %4301 = vmatpush3.msra.mxu0 %v2717_v1 }
 0x739   :  { %4302 = vmatprep.subr.mxu0 %v4294_v42 }
 0x73a   :  { %4303 = vmatpush3.msra.mxu0 %v4294_v42 }
 0x73b   :  { %4304 = vmatprep.subr.mxu0 %v2707_v63 }
 0x73c   :  { %4305 = vmatpush3.msra.mxu0 %v2707_v63 }
 0x73d   :  { %4306 = vmatprep.subr.mxu0 %v4291_v38 }
 0x73e   :  { %4307 = vmatpush3.msra.mxu0 %v4291_v38 }
 0x73f   :  { %4308 = vmatprep.subr.mxu0 %v2697_v39 }
 0x740   :  { %4309 = vmatpush3.msra.mxu0 %v2697_v39 }
 0x741   :  { %4310 = vmatprep.subr.mxu0 %v4288_v36 }
 0x742   :  { %4311 = vmatpush3.msra.mxu0 %v4288_v36 }
 0x743   :  { %4312 = vmatprep.subr.mxu0 %v2687_v37 }
 0x744   :  { %4313 = vmatpush3.msra.mxu0 %v2687_v37 }
 0x745   :  { %4314 = vmatprep.subr.mxu0 %v4285_v33 }
 0x746   :  { %4315 = vmatpush3.msra.mxu0 %v4285_v33 }
 0x747   :  { %4316 = vmatprep.subr.mxu0 %v2677_v35 }
 0x748   :  { %4317 = vmatpush3.msra.mxu0 %v2677_v35 }
 0x749   :  { %4318 = vmatprep.subr.mxu0 %v4282_v61 }
 0x74a   :  { %4319 = vmatpush3.msra.mxu0 %v4282_v61  ;;  %v2493_v61 = vpop.f32.mrf.mxu0 }
 0x74b   :  { %4320 = vmatprep.subr.mxu0 %v2667_v32 }
 0x74c   :  { %4321 = vmatpush3.msra.mxu0 %v2667_v32  ;;  %v4245_v32 = vpop.f32.mrf.mxu0 }
 0x74d   :  { %4323 = vmatmul.mubr.msk.f32.vlgmr.msra.gmra.mxu0 %vm2077_vm9, %v3555_v46 }
 0x74e   :  { %4325 = vmatprep.mubr.msk.f32.mxu0 %vm2077_vm9, %v3556_v47  ;;  %v5729_v33 = vpop.f32.mrf.mxu0 }
 0x750   :  { %v5731_v35 = vpop.f32.mrf.mxu0 }
 0x751   :  { %4326 = vmatmul.mubr.msk.f32.gmra.mxu0 %vm2077_vm9, %v3557_v50  ;;  %v3064_v50 = vpop.permute.xlu1 %3063 }
 0x752   :  { %4328 = vmatprep.mubr.msk.f32.mxu0 %vm2077_vm9, %v3558_v51  ;;  %v5733_v36 = vpop.f32.mrf.mxu0  ;;  %v3059_v51 = vpop.permute.xlu0 %3058 }
 0x754   :  { %v5735_v37 = vpop.f32.mrf.mxu0 }
 0x755   :  { %4329 = vmatmul.mubr.msk.f32.gmra.mxu0 %vm2077_vm9, %v3559_v52 }
 0x756   :  { %4331 = vmatprep.mubr.msk.f32.mxu0 %vm2077_vm9, %v3560_v53  ;;  %v5737_v38 = vpop.f32.mrf.mxu0  ;;  %v3074_v53 = vpop.permute.xlu1 %3073 }
 0x758   :  { %v5739_v39 = vpop.f32.mrf.mxu0 }
 0x759   :  { %4332 = vmatmul.mubr.msk.f32.gmra.mxu0 %vm2077_vm9, %v3561_v55 }
 0x75a   :  { %4334 = vmatprep.mubr.msk.f32.mxu0 %vm2077_vm9, %v3562_v2  ;;  %v5741_v42 = vpop.f32.mrf.mxu0  ;;  %v3069_v2 = vpop.permute.xlu0 %3068 }
 0x75c   :  { %v5743_v63 = vpop.f32.mrf.mxu0 }
 0x75d   :  { %4335 = vmatmul.mubr.msk.f32.gmra.mxu0 %vm2077_vm9, %v3563_v3 }
 0x75e   :  { %4337 = vmatprep.mubr.msk.f32.mxu0 %vm2077_vm9, %v3564_v4  ;;  %v5745_v44 = vpop.f32.mrf.mxu0  ;;  %v3084_v4 = vpop.permute.xlu1 %3083 }
 0x760   :  { %v5747_v1 = vpop.f32.mrf.mxu0 }
 0x761   :  { %4338 = vmatmul.mubr.msk.f32.gmra.mxu0 %vm2077_vm9, %v3565_v5  ;;  %v3079_v5 = vpop.permute.xlu0 %3078 }
 0x762   :  { %4340 = vmatprep.mubr.msk.f32.mxu0 %vm2077_vm9, %v3566_v6  ;;  %v5749_v46 = vpop.f32.mrf.mxu0 }
 0x764   :  { %v5751_v47 = vpop.f32.mrf.mxu0 }
 0x765   :  { %4341 = vmatmul.mubr.msk.f32.gmra.mxu0 %vm2077_vm9, %v3567_v7  ;;  %v3094_v7 = vpop.permute.xlu1 %3093 }
 0x766   :  { %4343 = vmatprep.mubr.msk.f32.mxu0 %vm2077_vm9, %v3568_v43  ;;  %v5753_v52 = vpop.f32.mrf.mxu0 }
 0x768   :  { %v5755_v55 = vpop.f32.mrf.mxu0 }
 0x769   :  { %4344 = vmatmul.mubr.msk.f32.gmra.mxu0 %vm2077_vm9, %v3569_v45  ;;  %5914 = vst [vmem:[#allocation5_spill] sm:$0xff] %v5755_v55  ;;  %v2479_v45 = vadd.f32 %v4236_v58, %v5589_v9  ;;  %v3104_v31 = vpop.permute.xlu1 %3103  ;;  %v2499_v58 = vadd.f32 %v4242_v8, %v5597_v24 }
 0x76a   :  { %4346 = vmatprep.mubr.msk.f32.mxu0 %vm2077_vm9, %v3570_v10  ;;  %v5757_v3 = vpop.f32.mrf.mxu0  ;;  %v3089_v10 = vpop.permute.xlu0 %3088 }
 0x76b   :  { %5915 = vst [vmem:[#allocation6_spill] sm:$0xff] %v5757_v3 }
 0x76c   :  { %v5759_v6 = vpop.f32.mrf.mxu0 }
 0x76d   :  { %4347 = vmatmul.mubr.msk.f32.gmra.mxu0 %vm2077_vm9, %v3571_v54  ;;  %5916 = vst [vmem:[#allocation7_spill] sm:$0xff] %v5759_v6  ;;  %v2484_v6 = vadd.f32 %v2483_v0, %v5595_v23  ;;  %v3114_v24 = vpop.permute.xlu1 %3113 }
 0x76e   :  { %4349 = vmatprep.mubr.msk.f32.mxu0 %vm2077_vm9, %v3572_v11  ;;  %v5761_v43 = vpop.f32.mrf.mxu0  ;;  %v2474_v11 = vadd.f32 %v2473_v16, %v5591_v15  ;;  %v3099_v55 = vpop.permute.xlu0 %3098 }
 0x76f   :  { %5917 = vst [vmem:[#allocation8_spill] sm:$0xff] %v5761_v43 }
 0x771   :  { %4350 = vmatmul.mubr.msk.f32.gmra.mxu0 %vm2077_vm9, %v3573_v12 }
 0x772   :  { %4352 = vmatprep.mubr.msk.f32.mxu0 %vm2077_vm9, %v3574_v13 }
 0x775   :  { %4353 = vmatmul.mubr.msk.f32.gmra.mxu0 %vm2077_vm9, %v3575_v56  ;;  %v2489_v56 = vadd.f32 %v4239_v18, %v5593_v17 }
 0x776   :  { %4355 = vmatprep.mubr.msk.f32.mxu0 %vm2077_vm9, %v3576_v57 }
 0x779   :  { %4356 = vmatmul.mubr.msk.f32.gmra.mxu0 %vm2077_vm9, %v3577_v14 }
 0x80d   :  { %v4324_v54 = vpop.f32.mrf.mxu0 }
 0x80e   :  { %v3009_v12 = vadd.f32 %v4324_v54, %v2479_v45  ;;  %v2519_v45 = vadd.f32 %v5731_v35, %v5605_v41 }
 0x80f   :  { %v2889_v13 = vpop.f32.mrf.mxu0 }
 0x810   :  { %v3177_v57 = vadd.f32 %v3064_v50, %v3009_v12  ;;  %v3008_v14 = vadd.f32 %v2889_v13, %v2474_v11  ;;  %v2494_v50 = vadd.f32 %v2493_v61, %v5599_v62  ;;  %v3109_v61 = vpop.permute.xlu0 %3108  ;;  %v2514_v12 = vadd.f32 %v5733_v36, %v5607_v48 }
 0x811   :  { %v4327_v30 = vpop.f32.mrf.mxu0 }
 0x812   :  { %v3201_v3 = vmax.f32 %v3177_v57, 0.0  ;;  %v3176_v29 = vadd.f32 %v3059_v51, %v3008_v14  ;;  %v3011_v43 = vadd.f32 %v4327_v30, %v2489_v56  ;;  %v2509_v51 = vadd.f32 %v4245_v32, %v5601_v34 }
 0x813   :  { %v2899_v9 = vpop.f32.mrf.mxu0  ;;  %v2529_v57 = vadd.f32 %v5735_v37, %v5609_v49 }
 0x814   :  { %3226 = vst.msk [vmem:[%s5910_s10 + $0x8] sm:$0xff] %vm3224_vm10, %v3201_v3  ;;  %v3200_v15 = vmax.f32 %v3176_v29, 0.0  ;;  %v3179_v17 = vadd.f32 %v3074_v53, %v3011_v43  ;;  %v3010_v16 = vadd.f32 %v2899_v9, %v2484_v6  ;;  %v2504_v6 = vadd.f32 %v5729_v33, %v5603_v40  ;;  %v3124_v33 = vpop.permute.xlu1 %3123  ;;  %v3119_v13 = vpop.permute.xlu0 %3118 }
 0x815   :  { %v4330_v18 = vpop.f32.mrf.mxu0  ;;  %v2524_v9 = vadd.f32 %v5737_v38, %v5611_v19 }
 0x816   :  { %3225 = vst.msk [vmem:[%s5910_s10] sm:$0xff] %vm3224_vm10, %v3200_v15  ;;  %v3203_v23 = vmax.f32 %v3179_v17, 0.0  ;;  %v3178_v30 = vadd.f32 %v3069_v2, %v3010_v16  ;;  %v3013_v0 = vadd.f32 %v4330_v18, %v2499_v58  ;;  %v2539_v17 = vadd.f32 %v5739_v39, %v5613_v20 }
 0x817   :  { %v2909_v8 = vpop.f32.mrf.mxu0 }
 0x818   :  { %3228 = vst.msk [vmem:[%s5910_s10 + $0x18] sm:$0xff] %vm3224_vm10, %v3203_v23  ;;  %v3202_v29 = vmax.f32 %v3178_v30, 0.0  ;;  %v3181_v53 = vadd.f32 %v3084_v4, %v3013_v0  ;;  %v3012_v62 = vadd.f32 %v2909_v8, %v2494_v50  ;;  %v3134_v37 = vpop.permute.xlu1 %3133  ;;  %v3129_v16 = vpop.permute.xlu0 %3128  ;;  %v2534_v50 = vadd.f32 %v5741_v42, %v5615_v21 }
 0x819   :  { %v4333_v3 = vpop.f32.mrf.mxu0  ;;  %v2549_v30 = vadd.f32 %v5743_v63, %v5617_v22 }
 0x81a   :  { %3227 = vst.msk [vmem:[%s5910_s10 + $0x10] sm:$0xff] %vm3224_vm10, %v3202_v29  ;;  %v3205_v2 = vmax.f32 %v3181_v53, 0.0  ;;  %v3180_v34 = vadd.f32 %v3079_v5, %v3012_v62  ;;  %v3015_v32 = vadd.f32 %v4333_v3, %v2509_v51  ;;  %v2544_v51 = vadd.f32 %v5745_v44, %v5619_v59 }
 0x81b   :  { %v2919_v43 = vpop.f32.mrf.mxu0 }
 0x81c   :  { %3230 = vst.msk [vmem:[%s5910_s10 + $0x28] sm:$0xff] %vm3224_vm10, %v3205_v2  ;;  %v3204_v4 = vmax.f32 %v3180_v34, 0.0  ;;  %v3183_v54 = vadd.f32 %v3094_v7, %v3015_v32  ;;  %v3014_v40 = vadd.f32 %v2919_v43, %v2504_v6  ;;  %v3144_v42 = vpop.permute.xlu1 %3143  ;;  %v3139_v53 = vpop.permute.xlu0 %3138  ;;  %v2554_v2 = vadd.f32 %v5749_v46, %v5623_v25 }
 0x81d   :  { %v4336_v11 = vpop.f32.mrf.mxu0 }
 0x81e   :  { %3229 = vst.msk [vmem:[%s5910_s10 + $0x20] sm:$0xff] %vm3224_vm10, %v3204_v4  ;;  %v3207_v5 = vmax.f32 %v3183_v54, 0.0  ;;  %v3182_v41 = vadd.f32 %v3089_v10, %v3014_v40  ;;  %v3017_v35 = vadd.f32 %v4336_v11, %v2519_v45  ;;  %v2569_v45 = vadd.f32 %v5751_v47, %v5625_v26 }
 0x81f   :  { %v2929_v56 = vpop.f32.mrf.mxu0 }
 0x820   :  { %3232 = vst.msk [vmem:[%s5910_s10 + $0x38] sm:$0xff] %vm3224_vm10, %v3207_v5  ;;  %v3206_v7 = vmax.f32 %v3182_v41, 0.0  ;;  %v3185_v48 = vadd.f32 %v3104_v31, %v3017_v35  ;;  %v3016_v36 = vadd.f32 %v2929_v56, %v2514_v12  ;;  %v3149_v54 = vpop.permute.xlu0 %3148  ;;  %v5918_v5 = vld [vmem:[#allocation5_spill] sm:$0xff] }
 0x821   :  { %v4339_v14 = vpop.f32.mrf.mxu0  ;;  %v2579_v41 = vadd.f32 %v5918_v5, %v5629_v28 }
 0x822   :  { %3231 = vst.msk [vmem:[%s5910_s10 + $0x30] sm:$0xff] %vm3224_vm10, %v3206_v7  ;;  %v3209_v10 = vmax.f32 %v3185_v48, 0.0  ;;  %v3184_v58 = vadd.f32 %v3099_v55, %v3016_v36  ;;  %v3019_v49 = vadd.f32 %v4339_v14, %v2529_v57  ;;  %v5919_v57 = vld [vmem:[#allocation2_spill] sm:$0xff] }
 0x823   :  { %v2939_v15 = vpop.f32.mrf.mxu0  ;;  %v5920_v7 = vld [vmem:[#allocation6_spill] sm:$0xff] }
 0x824   :  { %3234 = vst.msk [vmem:[%s5910_s10 + $0x48] sm:$0xff] %vm3224_vm10, %v3209_v10  ;;  %v3208_v31 = vmax.f32 %v3184_v58, 0.0  ;;  %v3187_v19 = vadd.f32 %v3114_v24, %v3019_v49  ;;  %v3018_v38 = vadd.f32 %v2939_v15, %v2524_v9  ;;  %v2574_v48 = vadd.f32 %v5920_v7, %v5919_v57  ;;  %v3159_v9 = vpop.permute.xlu0 %3158  ;;  %v5921_v58 = vld [vmem:[#allocation3_spill] sm:$0xff] }
 0x825   :  { %v4342_v18 = vpop.f32.mrf.mxu0  ;;  %v5922_v49 = vld [vmem:[#allocation7_spill] sm:$0xff] }
 0x826   :  { %3233 = vst.msk [vmem:[%s5910_s10 + $0x40] sm:$0xff] %vm3224_vm10, %v3208_v31  ;;  %v3211_v55 = vmax.f32 %v3187_v19, 0.0  ;;  %v3186_v20 = vadd.f32 %v3109_v61, %v3018_v38  ;;  %v3021_v39 = vadd.f32 %v4342_v18, %v2539_v17  ;;  %v2559_v61 = vadd.f32 %v5747_v1, %v5621_v60  ;;  %v3154_v1 = vpop.permute.xlu1 %3153  ;;  %v5923_v38 = vld [vmem:[#allocation4_spill] sm:$0xff] }
 0x827   :  { %v2949_v23 = vpop.f32.mrf.mxu0 }
 0x828   :  { %3236 = vst.msk [vmem:[%s5910_s10 + $0x58] sm:$0xff] %vm3224_vm10, %v3211_v55  ;;  %v3210_v0 = vmax.f32 %v3186_v20, 0.0  ;;  %v3189_v24 = vadd.f32 %v3124_v33, %v3021_v39  ;;  %v3020_v21 = vadd.f32 %v2949_v23, %v2534_v50  ;;  %v2564_v33 = vadd.f32 %v5753_v52, %v5627_v27 }
 0x829   :  { %v4345_v8 = vpop.f32.mrf.mxu0 }
 0x82a   :  { %3235 = vst.msk [vmem:[%s5910_s10 + $0x50] sm:$0xff] %vm3224_vm10, %v3210_v0  ;;  %v3213_v29 = vmax.f32 %v3189_v24, 0.0  ;;  %v3188_v22 = vadd.f32 %v3119_v13, %v3020_v21  ;;  %v3023_v63 = vadd.f32 %v4345_v8, %v2549_v30  ;;  %v3164_v52 = vpop.permute.xlu1 %3163  ;;  %v3169_v21 = vpop.permute.xlu0 %3168 }
 0x82b   :  { %v2959_v62 = vpop.f32.mrf.mxu0 }
 0x82c   :  { %3238 = vst.msk [vmem:[%s5910_s10 + $0x68] sm:$0xff] %vm3224_vm10, %v3213_v29  ;;  %v3212_v3 = vmax.f32 %v3188_v22, 0.0  ;;  %v3191_v59 = vadd.f32 %v3134_v37, %v3023_v63  ;;  %v3022_v44 = vadd.f32 %v2959_v62, %v2544_v51  ;;  %v2589_v37 = vadd.f32 %v5922_v49, %v5921_v58 }
 0x82d   :  { %v4348_v6 = vpop.f32.mrf.mxu0 }
 0x82e   :  { %3237 = vst.msk [vmem:[%s5910_s10 + $0x60] sm:$0xff] %vm3224_vm10, %v3212_v3  ;;  %v3215_v34 = vmax.f32 %v3191_v59, 0.0  ;;  %v3190_v32 = vadd.f32 %v3129_v16, %v3022_v44  ;;  %v3025_v60 = vadd.f32 %v4348_v6, %v2559_v61  ;;  %v5924_v16 = vld [vmem:[#allocation8_spill] sm:$0xff]  ;;  %v3174_v39 = vpop.permute.xlu1 %3173 }
 0x82f   :  { %v2969_v43 = vpop.f32.mrf.mxu0  ;;  %v2584_v18 = vadd.f32 %v5924_v16, %v5923_v38 }
 0x830   :  { %3240 = vst.msk [vmem:[%s5910_s10 + $0x78] sm:$0xff] %vm3224_vm10, %v3215_v34  ;;  %v3214_v4 = vmax.f32 %v3190_v32, 0.0  ;;  %v3193_v25 = vadd.f32 %v3144_v42, %v3025_v60  ;;  %v3024_v46 = vadd.f32 %v2969_v43, %v2554_v2 }
 0x831   :  { %v4351_v40 = vpop.f32.mrf.mxu0 }
 0x832   :  { %3239 = vst.msk [vmem:[%s5910_s10 + $0x70] sm:$0xff] %vm3224_vm10, %v3214_v4  ;;  %v3217_v11 = vmax.f32 %v3193_v25, 0.0  ;;  %v3192_v26 = vadd.f32 %v3139_v53, %v3024_v46  ;;  %v3027_v47 = vadd.f32 %v4351_v40, %v2569_v45 }
 0x833   :  { %v2979_v12 = vpop.f32.mrf.mxu0 }
 0x834   :  { %3242 = vst.msk [vmem:[%s5910_s10 + $0x88] sm:$0xff] %vm3224_vm10, %v3217_v11  ;;  %v3216_v35 = vmax.f32 %v3192_v26, 0.0  ;;  %v3195_v13 = vadd.f32 %v3154_v1, %v3027_v47  ;;  %v3026_v27 = vadd.f32 %v2979_v12, %v2564_v33 }
 0x835   :  { %v4354_v56 = vpop.f32.mrf.mxu0 }
 0x836   :  { %3241 = vst.msk [vmem:[%s5910_s10 + $0x80] sm:$0xff] %vm3224_vm10, %v3216_v35  ;;  %v3219_v36 = vmax.f32 %v3195_v13, 0.0  ;;  %v3194_v28 = vadd.f32 %v3149_v54, %v3026_v27  ;;  %v3029_v14 = vadd.f32 %v4354_v56, %v2579_v41 }
 0x837   :  { %v2989_v10 = vpop.f32.mrf.mxu0 }
 0x838   :  { %3244 = vst.msk [vmem:[%s5910_s10 + $0x98] sm:$0xff] %vm3224_vm10, %v3219_v36  ;;  %v3218_v15 = vmax.f32 %v3194_v28, 0.0  ;;  %v3197_v17 = vadd.f32 %v3164_v52, %v3029_v14  ;;  %v3028_v31 = vadd.f32 %v2989_v10, %v2574_v48 }
 0x839   :  { %v4357_v19 = vpop.f32.mrf.mxu0 }
 0x83a   :  { %3243 = vst.msk [vmem:[%s5910_s10 + $0x90] sm:$0xff] %vm3224_vm10, %v3218_v15  ;;  %v3221_v50 = vmax.f32 %v3197_v17, 0.0  ;;  %v3196_v55 = vadd.f32 %v3159_v9, %v3028_v31  ;;  %v3031_v20 = vadd.f32 %v4357_v19, %v2589_v37 }
 0x83b   :  { %v2999_v23 = vpop.f32.mrf.mxu0 }
 0x83c   :  { %3246 = vst.msk [vmem:[%s5910_s10 + $0xa8] sm:$0xff] %vm3224_vm10, %v3221_v50  ;;  %v3220_v30 = vmax.f32 %v3196_v55, 0.0  ;;  %v3199_v0 = vadd.f32 %v3174_v39, %v3031_v20  ;;  %v3030_v24 = vadd.f32 %v2999_v23, %v2584_v18 }
 0x83e   :  { %3245 = vst.msk [vmem:[%s5910_s10 + $0xa0] sm:$0xff] %vm3224_vm10, %v3220_v30  ;;  %v3223_v42 = vmax.f32 %v3199_v0, 0.0  ;;  %v3198_v8 = vadd.f32 %v3169_v21, %v3030_v24 }
 0x840   :  { %3248 = vst.msk [vmem:[%s5910_s10 + $0xb8] sm:$0xff] %vm3224_vm10, %v3223_v42  ;;  %v3222_v51 = vmax.f32 %v3198_v8, 0.0 }
 0x842   :  { %3247 = vst.msk [vmem:[%s5910_s10 + $0xb0] sm:$0xff] %vm3224_vm10, %v3222_v51 }

// kernel: ae_forward.5
= control target key start
LH: loop header
LB: loop body
LE: loop exit
PB: predicated region body
PF: predicated region fallthrough
CT: control target
= control target key end

     0   :  { %v3232_v0 = vmov 0.0   ;;  %vm83_vm0 = vcmask 523264   ;;  %vm475_vm1 = vcmask 1041408   ;;  %vm438_vm2 = vcmask 146432   ;;  %s4484_s0 = inlined_call_operand.vmem [shape: f32[192,18], index: 0, kind: input, shape index: {}]   ;;  %s4485_s1 = inlined_call_operand.vmem [shape: f32[3,96,192], index: 1, kind: input, shape index: {}]   ;;  %s4486_s2 = inlined_call_operand.vmem [shape: f32[3,18,37], index: 2, kind: input, shape index: {}]   ;;  %s4487_s3 = inlined_call_operand.vmem [shape: f32[96,1], index: 3, kind: input, shape index: {}]   ;;  %s4488_s6 = inlined_call_operand.vmem [shape: f32[48,1], index: 6, kind: input, shape index: {}]   ;;  %s4489_s9 = inlined_call_operand.vmem [shape: f32[6,1], index: 9, kind: input, shape index: {}]   ;;  %s4490_s4 = inlined_call_operand.vmem [shape: f32[3,48,96], index: 4, kind: input, shape index: {}]   ;;  %s4491_s5 = inlined_call_operand.vmem [shape: f32[3,37,75], index: 5, kind: input, shape index: {}]   ;;  %s4492_s7 = inlined_call_operand.vmem [shape: f32[3,6,48], index: 7, kind: input, shape index: {}]   ;;  %s4493_s8 = inlined_call_operand.vmem [shape: f32[3,75,151], index: 8, kind: input, shape index: {}]   ;;  %s4494_s10 = inlined_call_operand.vmem [shape: f32[6,151], index: 10, kind: output, shape index: {}]  }
   0x1   :  { %120 = vmatprep.subr.mxu0 %v3232_v0  ;;  %309 = vmatprep.subr.mxu1 %v3232_v0  ;;  %v3295_v1 = vld [vmem:[%s4484_s0 + $0x78] sm:$0xff]  ;;  %v3300_v2 = vld [vmem:[%s4484_s0 + $0x70] sm:$0xff]  ;;  %v3309_v3 = vld [vmem:[%s4484_s0 + $0x68] sm:$0xff]  ;;  %vm1236_vm3 = vcmask 785408   ;;  %vm1500_vm4 = vcmask 1044480   ;;  %vm1481_vm5 = vcmask 302080  }
   0x2   :  { %121 = vmatpush1.msra.mxu0 %v3295_v1  ;;  %310 = vmatpush1.msra.mxu1 %v3295_v1  ;;  %v3318_v4 = vld [vmem:[%s4484_s0 + $0x60] sm:$0xff]  ;;  %v3327_v5 = vld [vmem:[%s4484_s0 + $0x58] sm:$0xff]  ;;  %v3336_v6 = vld [vmem:[%s4484_s0 + $0x50] sm:$0xff]  ;;  %vm3234_vm6 = vmmov 0   ;;  %vm2012_vm7 = vcmask 392192   ;;  %vm2206_vm8 = vcmask 1042432  }
   0x3   :  { %122 = vmatprep.subr.mxu0 %v3232_v0  ;;  %311 = vmatprep.subr.mxu1 %v3232_v0  ;;  %v3345_v7 = vld [vmem:[%s4484_s0 + $0x48] sm:$0xff]  ;;  %v3354_v8 = vld [vmem:[%s4484_s0 + $0x40] sm:$0xff]  ;;  %v3363_v9 = vld [vmem:[%s4484_s0 + $0x38] sm:$0xff]  ;;  %vm2202_vm9 = vcmask 613376   ;;  %vm2551_vm10 = vcmask 185344  }
   0x4   :  { %123 = vmatpush1.msra.mxu0 %v3300_v2  ;;  %312 = vmatpush1.msra.mxu1 %v3300_v2  ;;  %v3372_v10 = vld [vmem:[%s4484_s0 + $0x30] sm:$0xff]  ;;  %v3381_v11 = vld [vmem:[%s4484_s0 + $0x28] sm:$0xff]  ;;  %v3390_v12 = vld [vmem:[%s4484_s0 + $0x20] sm:$0xff] }
   0x5   :  { %124 = vmatprep.subr.mxu0 %v3232_v0  ;;  %313 = vmatprep.subr.mxu1 %v3232_v0  ;;  %v3399_v13 = vld [vmem:[%s4484_s0 + $0x18] sm:$0xff]  ;;  %v3408_v14 = vld [vmem:[%s4484_s0 + $0x10] sm:$0xff]  ;;  %v3417_v15 = vld [vmem:[%s4484_s0 + $0x8] sm:$0xff] }
   0x6   :  { %125 = vmatpush1.msra.mxu0 %v3309_v3  ;;  %314 = vmatpush1.msra.mxu1 %v3309_v3  ;;  %v3426_v16 = vld [vmem:[%s4484_s0] sm:$0xff]  ;;  %v3435_v17 = vld [vmem:[%s4484_s0 + $0xb8] sm:$0xff]  ;;  %v3444_v18 = vld [vmem:[%s4484_s0 + $0xb0] sm:$0xff] }
   0x7   :  { %126 = vmatprep.subr.mxu0 %v3232_v0  ;;  %315 = vmatprep.subr.mxu1 %v3232_v0  ;;  %v3453_v19 = vld [vmem:[%s4484_s0 + $0xa8] sm:$0xff]  ;;  %v3462_v20 = vld [vmem:[%s4484_s0 + $0xa0] sm:$0xff]  ;;  %v3471_v21 = vld [vmem:[%s4484_s0 + $0x98] sm:$0xff] }
   0x8   :  { %127 = vmatpush1.msra.mxu0 %v3318_v4  ;;  %316 = vmatpush1.msra.mxu1 %v3318_v4  ;;  %v3480_v22 = vld [vmem:[%s4484_s0 + $0x90] sm:$0xff]  ;;  %v3489_v23 = vld [vmem:[%s4484_s0 + $0x88] sm:$0xff]  ;;  %v3498_v24 = vld [vmem:[%s4484_s0 + $0x80] sm:$0xff] }
   0x9   :  { %128 = vmatprep.subr.mxu0 %v3232_v0  ;;  %317 = vmatprep.subr.mxu1 %v3232_v0  ;;  %v60_v25 = vld [vmem:[%s4485_s1 + $0x8] sm:$0xff]  ;;  %v59_v27 = vld [vmem:[%s4485_s1] sm:$0xff]  ;;  %v62_v29 = vld [vmem:[%s4485_s1 + $0x18] sm:$0xff] }
   0xa   :  { %129 = vmatpush1.msra.mxu0 %v3327_v5  ;;  %318 = vmatpush1.msra.mxu1 %v3327_v5  ;;  %v2570_v26 = vld [vmem:[%s4485_s1 + $0xc8] sm:$0xff]  ;;  %v2569_v28 = vld [vmem:[%s4485_s1 + $0xc0] sm:$0xff]  ;;  %v2572_v30 = vld [vmem:[%s4485_s1 + $0xd8] sm:$0xff] }
   0xb   :  { %130 = vmatprep.subr.mxu0 %v3232_v0  ;;  %319 = vmatprep.subr.mxu1 %v3232_v0  ;;  %v2607_v31 = vld [vmem:[%s4486_s2 + $0x28] sm:$0x3]  ;;  %v247_v32 = vld [vmem:[%s4486_s2 + $0x10] sm:$0x3]  ;;  %v2606_v37 = vld [vmem:[%s4486_s2 + $0x20] sm:$0xff] }
   0xc   :  { %131 = vmatpush1.msra.mxu0 %v3336_v6  ;;  %320 = vmatpush1.msra.mxu1 %v3336_v6  ;;  %v61_v33 = vld [vmem:[%s4485_s1 + $0x10] sm:$0xff]  ;;  %v64_v35 = vld [vmem:[%s4485_s1 + $0x28] sm:$0xff]  ;;  %v63_v38 = vld [vmem:[%s4485_s1 + $0x20] sm:$0xff] }
   0xd   :  { %132 = vmatprep.subr.mxu0 %v3232_v0  ;;  %321 = vmatprep.subr.mxu1 %v3232_v0  ;;  %v2571_v34 = vld [vmem:[%s4485_s1 + $0xd0] sm:$0xff]  ;;  %v2574_v36 = vld [vmem:[%s4485_s1 + $0xe8] sm:$0xff]  ;;  %v2573_v39 = vld [vmem:[%s4485_s1 + $0xe0] sm:$0xff] }
   0xe   :  { %133 = vmatpush1.msra.mxu0 %v3345_v7  ;;  %322 = vmatpush1.msra.mxu1 %v3345_v7  ;;  %v66_v40 = vld [vmem:[%s4485_s1 + $0x38] sm:$0xff]  ;;  %v65_v43 = vld [vmem:[%s4485_s1 + $0x30] sm:$0xff]  ;;  %v68_v45 = vld [vmem:[%s4485_s1 + $0x48] sm:$0xff] }
   0xf   :  { %134 = vmatprep.subr.mxu0 %v3232_v0  ;;  %323 = vmatprep.subr.mxu1 %v3232_v0  ;;  %v2576_v41 = vld [vmem:[%s4485_s1 + $0xf8] sm:$0xff]  ;;  %v2575_v44 = vld [vmem:[%s4485_s1 + $0xf0] sm:$0xff]  ;;  %v2578_v46 = vld [vmem:[%s4485_s1 + $0x108] sm:$0xff] }
  0x10   :  { %135 = vmatpush1.msra.mxu0 %v3354_v8  ;;  %324 = vmatpush1.msra.mxu1 %v3354_v8  ;;  %v2605_v42 = vld [vmem:[%s4486_s2 + $0x18] sm:$0xff]  ;;  %v67_v47 = vld [vmem:[%s4485_s1 + $0x40] sm:$0xff]  ;;  %v69_v51 = vld [vmem:[%s4485_s1 + $0x50] sm:$0xff] }
  0x11   :  { %136 = vmatprep.subr.mxu0 %v3232_v0  ;;  %325 = vmatprep.subr.mxu1 %v3232_v0  ;;  %v2577_v48 = vld [vmem:[%s4485_s1 + $0x100] sm:$0xff]  ;;  %v70_v49 = vld [vmem:[%s4485_s1 + $0x58] sm:$0xff]  ;;  %v2579_v52 = vld [vmem:[%s4485_s1 + $0x110] sm:$0xff] }
  0x12   :  { %137 = vmatpush1.msra.mxu0 %v3363_v9  ;;  %326 = vmatpush1.msra.mxu1 %v3363_v9  ;;  %v2580_v50 = vld [vmem:[%s4485_s1 + $0x118] sm:$0xff]  ;;  %v72_v53 = vld [vmem:[%s4485_s1 + $0x68] sm:$0xff]  ;;  %v71_v55 = vld [vmem:[%s4485_s1 + $0x60] sm:$0xff] }
  0x13   :  { %138 = vmatprep.subr.mxu0 %v3232_v0  ;;  %327 = vmatprep.subr.mxu1 %v3232_v0  ;;  %v2582_v54 = vld [vmem:[%s4485_s1 + $0x128] sm:$0xff]  ;;  %v2581_v56 = vld [vmem:[%s4485_s1 + $0x120] sm:$0xff]  ;;  %v74_v57 = vld [vmem:[%s4485_s1 + $0x78] sm:$0xff] }
  0x14   :  { %139 = vmatpush1.msra.mxu0 %v3372_v10  ;;  %328 = vmatpush1.msra.mxu1 %v3372_v10  ;;  %v2584_v58 = vld [vmem:[%s4485_s1 + $0x138] sm:$0xff]  ;;  %v73_v59 = vld [vmem:[%s4485_s1 + $0x70] sm:$0xff]  ;;  %v76_v61 = vld [vmem:[%s4485_s1 + $0x88] sm:$0xff] }
  0x15   :  { %140 = vmatprep.subr.mxu0 %v3232_v0  ;;  %329 = vmatprep.subr.mxu1 %v3232_v0  ;;  %v2583_v60 = vld [vmem:[%s4485_s1 + $0x130] sm:$0xff]  ;;  %v2586_v62 = vld [vmem:[%s4485_s1 + $0x148] sm:$0xff]  ;;  %v75_v63 = vld [vmem:[%s4485_s1 + $0x80] sm:$0xff] }
  0x16   :  { %141 = vmatpush1.msra.mxu0 %v3381_v11  ;;  %330 = vmatpush1.msra.mxu1 %v3381_v11 }
  0x17   :  { %142 = vmatprep.subr.mxu0 %v3232_v0  ;;  %331 = vmatprep.subr.mxu1 %v3232_v0 }
  0x18   :  { %143 = vmatpush1.msra.mxu0 %v3390_v12  ;;  %332 = vmatpush1.msra.mxu1 %v3390_v12 }
  0x19   :  { %144 = vmatprep.subr.mxu0 %v3232_v0  ;;  %333 = vmatprep.subr.mxu1 %v3232_v0 }
  0x1a   :  { %145 = vmatpush1.msra.mxu0 %v3399_v13  ;;  %334 = vmatpush1.msra.mxu1 %v3399_v13 }
  0x1b   :  { %146 = vmatprep.subr.mxu0 %v3232_v0  ;;  %335 = vmatprep.subr.mxu1 %v3232_v0 }
  0x1c   :  { %147 = vmatpush1.msra.mxu0 %v3408_v14  ;;  %336 = vmatpush1.msra.mxu1 %v3408_v14 }
  0x1d   :  { %148 = vmatprep.subr.mxu0 %v3232_v0  ;;  %337 = vmatprep.subr.mxu1 %v3232_v0 }
  0x1e   :  { %149 = vmatpush1.msra.mxu0 %v3417_v15  ;;  %338 = vmatpush1.msra.mxu1 %v3417_v15 }
  0x1f   :  { %150 = vmatprep.subr.mxu0 %v3232_v0  ;;  %339 = vmatprep.subr.mxu1 %v3232_v0 }
  0x20   :  { %151 = vmatpush1.msra.mxu0 %v3426_v16  ;;  %340 = vmatpush1.msra.mxu1 %v3426_v16 }
  0x21   :  { %168 = vmatprep.subr.mxu0 %v3232_v0  ;;  %357 = vmatprep.subr.mxu1 %v3232_v0 }
  0x22   :  { %169 = vmatpush2.msra.mxu0 %v3435_v17  ;;  %358 = vmatpush2.msra.mxu1 %v3435_v17 }
  0x23   :  { %170 = vmatprep.subr.mxu0 %v3232_v0  ;;  %359 = vmatprep.subr.mxu1 %v3232_v0 }
  0x24   :  { %171 = vmatpush2.msra.mxu0 %v3444_v18  ;;  %360 = vmatpush2.msra.mxu1 %v3444_v18 }
  0x25   :  { %172 = vmatprep.subr.mxu0 %v3232_v0  ;;  %361 = vmatprep.subr.mxu1 %v3232_v0 }
  0x26   :  { %173 = vmatpush2.msra.mxu0 %v3453_v19  ;;  %362 = vmatpush2.msra.mxu1 %v3453_v19 }
  0x27   :  { %174 = vmatprep.subr.mxu0 %v3232_v0  ;;  %363 = vmatprep.subr.mxu1 %v3232_v0 }
  0x28   :  { %175 = vmatpush2.msra.mxu0 %v3462_v20  ;;  %364 = vmatpush2.msra.mxu1 %v3462_v20 }
  0x29   :  { %176 = vmatprep.subr.mxu0 %v3232_v0  ;;  %365 = vmatprep.subr.mxu1 %v3232_v0 }
  0x2a   :  { %177 = vmatpush2.msra.mxu0 %v3471_v21  ;;  %366 = vmatpush2.msra.mxu1 %v3471_v21 }
  0x2b   :  { %178 = vmatprep.subr.mxu0 %v3232_v0  ;;  %367 = vmatprep.subr.mxu1 %v3232_v0 }
  0x2c   :  { %179 = vmatpush2.msra.mxu0 %v3480_v22  ;;  %368 = vmatpush2.msra.mxu1 %v3480_v22 }
  0x2d   :  { %180 = vmatprep.subr.mxu0 %v3232_v0  ;;  %369 = vmatprep.subr.mxu1 %v3232_v0 }
  0x2e   :  { %181 = vmatpush2.msra.mxu0 %v3489_v23  ;;  %370 = vmatpush2.msra.mxu1 %v3489_v23 }
  0x2f   :  { %182 = vmatprep.subr.mxu0 %v3232_v0  ;;  %371 = vmatprep.subr.mxu1 %v3232_v0 }
  0x30   :  { %183 = vmatpush2.msra.mxu0 %v3498_v24  ;;  %2557 = vmatprep.mubr.msk.f32.mxu0 %vm83_vm0, %v60_v25  ;;  %v2585_v25 = vld [vmem:[%s4485_s1 + $0x140] sm:$0xff] }
  0x31   :  { %372 = vmatpush2.msra.mxu1 %v3498_v24  ;;  %2593 = vmatprep.mubr.msk.f32.mxu1 %vm83_vm0, %v2570_v26  ;;  %v78_v26 = vld [vmem:[%s4485_s1 + $0x98] sm:$0xff] }
  0x32   :  { %185 = vmatmul.mubr.f32.vlgmr.msra.gmra.mxu0 %v59_v27  ;;  %374 = vmatmul.mubr.f32.vlgmr.msra.gmra.mxu1 %v2569_v28  ;;  %v2588_v27 = vld [vmem:[%s4485_s1 + $0x158] sm:$0xff]  ;;  %v77_v28 = vld [vmem:[%s4485_s1 + $0x90] sm:$0xff] }
  0x33   :  { %2558 = vmatprep.mubr.msk.f32.mxu0 %vm83_vm0, %v62_v29  ;;  %2594 = vmatprep.mubr.msk.f32.mxu1 %vm83_vm0, %v2572_v30  ;;  %v2587_v29 = vld [vmem:[%s4485_s1 + $0x150] sm:$0xff]  ;;  %v80_v30 = vld [vmem:[%s4485_s1 + $0xa8] sm:$0xff] }
  0x34   :  { %2954 = vmatprep.subr.msk.mxu0 %vm475_vm1, %v2607_v31  ;;  %2978 = vmatprep.subr.msk.mxu1 %vm475_vm1, %v247_v32 }
  0x35   :  { %2955 = vmatpush3.msk.msra.mxu0 %vm475_vm1, %v2607_v31  ;;  %2979 = vmatpush3.msk.msra.mxu1 %vm475_vm1, %v247_v32  ;;  %v2590_v31 = vld [vmem:[%s4485_s1 + $0x168] sm:$0xff]  ;;  %v79_v32 = vld [vmem:[%s4485_s1 + $0xa0] sm:$0xff] }
  0x36   :  { %190 = vmatmul.mubr.f32.gmra.mxu0 %v61_v33  ;;  %379 = vmatmul.mubr.f32.gmra.mxu1 %v2571_v34  ;;  %v2589_v33 = vld [vmem:[%s4485_s1 + $0x160] sm:$0xff]  ;;  %v82_v34 = vld [vmem:[%s4485_s1 + $0xb8] sm:$0xff] }
  0x37   :  { %2559 = vmatprep.mubr.msk.f32.mxu0 %vm83_vm0, %v64_v35  ;;  %2595 = vmatprep.mubr.msk.f32.mxu1 %vm83_vm0, %v2574_v36  ;;  %v2592_v35 = vld [vmem:[%s4485_s1 + $0x178] sm:$0xff]  ;;  %v81_v36 = vld [vmem:[%s4485_s1 + $0xb0] sm:$0xff] }
  0x38   :  { %2956 = vmatprep.subr.mxu0 %v2606_v37 }
  0x39   :  { %2957 = vmatpush3.msra.mxu0 %v2606_v37  ;;  %v2591_v37 = vld [vmem:[%s4485_s1 + $0x170] sm:$0xff] }
  0x3a   :  { %195 = vmatmul.mubr.f32.gmra.mxu0 %v63_v38  ;;  %384 = vmatmul.mubr.f32.gmra.mxu1 %v2573_v39  ;;  %v246_v38 = vld [vmem:[%s4486_s2 + $0x8] sm:$0xff]  ;;  %v245_v39 = vld [vmem:[%s4486_s2] sm:$0xff] }
  0x3b   :  { %2560 = vmatprep.mubr.msk.f32.mxu0 %vm83_vm0, %v66_v40  ;;  %2596 = vmatprep.mubr.msk.f32.mxu1 %vm83_vm0, %v2576_v41 }
  0x3c   :  { %2958 = vmatprep.subr.mxu0 %v2605_v42  ;;  %2980 = vmatprep.subr.mxu1 %v246_v38 }
  0x3d   :  { %2959 = vmatpush3.msra.mxu0 %v2605_v42  ;;  %2981 = vmatpush3.msra.mxu1 %v246_v38  ;;  %v2646_v38 = vld [vmem:[%s4485_s1 + $0x1e0] sm:$0xff] }
  0x3e   :  { %200 = vmatmul.mubr.f32.gmra.mxu0 %v65_v43  ;;  %389 = vmatmul.mubr.f32.gmra.mxu1 %v2575_v44 }
  0x3f   :  { %2561 = vmatprep.mubr.msk.f32.mxu0 %vm83_vm0, %v68_v45  ;;  %2597 = vmatprep.mubr.msk.f32.mxu1 %vm83_vm0, %v2578_v46 }
  0x40   :  { %829 = vmatprep.subr.mxu0 %v3232_v0  ;;  %2982 = vmatprep.subr.mxu1 %v245_v39 }
  0x41   :  { %2983 = vmatpush3.msra.mxu1 %v245_v39  ;;  %v2649_v39 = vld [vmem:[%s4485_s1 + $0x1f8] sm:$0xff] }
  0x42   :  { %205 = vmatmul.mubr.f32.gmra.mxu0 %v67_v47  ;;  %394 = vmatmul.mubr.f32.gmra.mxu1 %v2577_v48 }
  0x43   :  { %2562 = vmatprep.mubr.msk.f32.mxu0 %vm83_vm0, %v70_v49  ;;  %2598 = vmatprep.mubr.msk.f32.mxu1 %vm83_vm0, %v2580_v50 }
  0x46   :  { %210 = vmatmul.mubr.f32.gmra.mxu0 %v69_v51  ;;  %399 = vmatmul.mubr.f32.gmra.mxu1 %v2579_v52 }
  0x47   :  { %2563 = vmatprep.mubr.msk.f32.mxu0 %vm83_vm0, %v72_v53  ;;  %2599 = vmatprep.mubr.msk.f32.mxu1 %vm83_vm0, %v2582_v54 }
  0x4a   :  { %215 = vmatmul.mubr.f32.gmra.mxu0 %v71_v55  ;;  %404 = vmatmul.mubr.f32.gmra.mxu1 %v2581_v56 }
  0x4b   :  { %2564 = vmatprep.mubr.msk.f32.mxu0 %vm83_vm0, %v74_v57  ;;  %2600 = vmatprep.mubr.msk.f32.mxu1 %vm83_vm0, %v2584_v58 }
  0x4e   :  { %220 = vmatmul.mubr.f32.gmra.mxu0 %v73_v59  ;;  %409 = vmatmul.mubr.f32.gmra.mxu1 %v2583_v60 }
  0x4f   :  { %2565 = vmatprep.mubr.msk.f32.mxu0 %vm83_vm0, %v76_v61  ;;  %2601 = vmatprep.mubr.msk.f32.mxu1 %vm83_vm0, %v2586_v62 }
  0x52   :  { %225 = vmatmul.mubr.f32.gmra.mxu0 %v75_v63  ;;  %414 = vmatmul.mubr.f32.gmra.mxu1 %v2585_v25 }
  0x53   :  { %2566 = vmatprep.mubr.msk.f32.mxu0 %vm83_vm0, %v78_v26  ;;  %2602 = vmatprep.mubr.msk.f32.mxu1 %vm83_vm0, %v2588_v27 }
  0x56   :  { %230 = vmatmul.mubr.f32.gmra.mxu0 %v77_v28  ;;  %419 = vmatmul.mubr.f32.gmra.mxu1 %v2587_v29 }
  0x57   :  { %2567 = vmatprep.mubr.msk.f32.mxu0 %vm83_vm0, %v80_v30  ;;  %2603 = vmatprep.mubr.msk.f32.mxu1 %vm83_vm0, %v2590_v31  ;;  %v2638_v31 = vld [vmem:[%s4485_s1 + $0x1a0] sm:$0xff] }
  0x5a   :  { %235 = vmatmul.mubr.f32.gmra.mxu0 %v79_v32  ;;  %424 = vmatmul.mubr.f32.gmra.mxu1 %v2589_v33  ;;  %v2640_v32 = vld [vmem:[%s4485_s1 + $0x1b0] sm:$0xff]  ;;  %v2643_v33 = vld [vmem:[%s4485_s1 + $0x1c8] sm:$0xff] }
  0x5b   :  { %2568 = vmatprep.mubr.msk.f32.mxu0 %vm83_vm0, %v82_v34  ;;  %2604 = vmatprep.mubr.msk.f32.mxu1 %vm83_vm0, %v2592_v35  ;;  %v2642_v34 = vld [vmem:[%s4485_s1 + $0x1c0] sm:$0xff]  ;;  %v2645_v35 = vld [vmem:[%s4485_s1 + $0x1d8] sm:$0xff] }
  0x5e   :  { %240 = vmatmul.mubr.f32.gmra.mxu0 %v81_v36  ;;  %429 = vmatmul.mubr.f32.gmra.mxu1 %v2591_v37  ;;  %v2644_v36 = vld [vmem:[%s4485_s1 + $0x1d0] sm:$0xff]  ;;  %v2647_v37 = vld [vmem:[%s4485_s1 + $0x1e8] sm:$0xff] }
  0xf2   :  { %v186_v40 = vpop.f32.mrf.mxu0  ;;  %v375_v41 = vpop.f32.mrf.mxu1 }
  0xf3   :  { %2960 = vmatprep.mubr.msk.f32.mxu0 %vm438_vm2, %v375_v41  ;;  %2984 = vmatprep.mubr.msk.f32.mxu1 %vm438_vm2, %v186_v40  ;;  %v2648_v40 = vld [vmem:[%s4485_s1 + $0x1f0] sm:$0xff]  ;;  %v2651_v41 = vld [vmem:[%s4485_s1 + $0x208] sm:$0xff] }
  0xf4   :  { %v188_v42 = vpop.f32.mrf.mxu0  ;;  %v377_v43 = vpop.f32.mrf.mxu1 }
  0xf5   :  { %v2650_v42 = vld [vmem:[%s4485_s1 + $0x200] sm:$0xff]  ;;  %v2653_v43 = vld [vmem:[%s4485_s1 + $0x218] sm:$0xff] }
  0xf6   :  { %v191_v44 = vpop.f32.mrf.mxu0  ;;  %v380_v45 = vpop.f32.mrf.mxu1 }
  0xf7   :  { %2961 = vmatmul.mubr.msk.f32.vlgmr.msra.gmra.mxu0 %vm438_vm2, %v380_v45  ;;  %2985 = vmatmul.mubr.msk.f32.vlgmr.msra.gmra.mxu1 %vm438_vm2, %v191_v44  ;;  %v2652_v44 = vld [vmem:[%s4485_s1 + $0x210] sm:$0xff]  ;;  %v2655_v45 = vld [vmem:[%s4485_s1 + $0x228] sm:$0xff] }
  0xf8   :  { %830 = vmatpush1.msra.mxu0 %v3295_v1  ;;  %v382_v46 = vpop.f32.mrf.mxu1  ;;  %v193_v47 = vpop.f32.mrf.mxu0 }
  0xf9   :  { %831 = vmatprep.subr.mxu0 %v3232_v0  ;;  %v2654_v46 = vld [vmem:[%s4485_s1 + $0x220] sm:$0xff]  ;;  %v2657_v47 = vld [vmem:[%s4485_s1 + $0x238] sm:$0xff] }
  0xfa   :  { %832 = vmatpush1.msra.mxu0 %v3300_v2  ;;  %v196_v48 = vpop.f32.mrf.mxu0  ;;  %v385_v49 = vpop.f32.mrf.mxu1 }
  0xfb   :  { %833 = vmatprep.subr.mxu0 %v3232_v0  ;;  %2963 = vmatprep.mubr.msk.f32.mxu0 %vm438_vm2, %v385_v49  ;;  %v2672_v49 = vld [vmem:[%s4486_s2 + $0x40] sm:$0x3] }
  0xfc   :  { %834 = vmatpush1.msra.mxu0 %v3309_v3  ;;  %v198_v50 = vpop.f32.mrf.mxu0  ;;  %v387_v51 = vpop.f32.mrf.mxu1  ;;  %2987 = vmatprep.mubr.msk.f32.mxu1 %vm438_vm2, %v196_v48  ;;  %v2656_v48 = vld [vmem:[%s4485_s1 + $0x230] sm:$0xff] }
  0xfd   :  { %835 = vmatprep.subr.mxu0 %v3232_v0  ;;  %3002 = vmatprep.subr.msk.mxu1 %vm475_vm1, %v2672_v49  ;;  %v2671_v50 = vld [vmem:[%s4486_s2 + $0x38] sm:$0xff]  ;;  %v2670_v51 = vld [vmem:[%s4486_s2 + $0x30] sm:$0xff] }
  0xfe   :  { %836 = vmatpush1.msra.mxu0 %v3318_v4  ;;  %v201_v1 = vpop.f32.mrf.mxu0  ;;  %v390_v52 = vpop.f32.mrf.mxu1  ;;  %3003 = vmatpush3.msk.msra.mxu1 %vm475_vm1, %v2672_v49 }
  0xff   :  { %837 = vmatprep.subr.mxu0 %v3232_v0  ;;  %2964 = vmatmul.mubr.msk.f32.gmra.mxu0 %vm438_vm2, %v390_v52  ;;  %v1145_v52 = vld [vmem:[%s4487_s3 + $0x58] sm:$0xff] }
 0x100   :  { %838 = vmatpush1.msra.mxu0 %v3327_v5  ;;  %2988 = vmatmul.mubr.msk.f32.gmra.mxu1 %vm438_vm2, %v201_v1  ;;  %v203_v2 = vpop.f32.mrf.mxu0  ;;  %v392_v3 = vpop.f32.mrf.mxu1  ;;  %v3233_v1 = vmov 0  }
 0x101   :  { %839 = vmatprep.subr.mxu0 %v3232_v0  ;;  %3004 = vmatprep.subr.mxu1 %v2671_v50  ;;  %v1143_v2 = vld [vmem:[%s4487_s3 + $0x48] sm:$0xff]  ;;  %v1144_v3 = vld [vmem:[%s4487_s3 + $0x50] sm:$0xff] }
 0x102   :  { %840 = vmatpush1.msra.mxu0 %v3336_v6  ;;  %v206_v53 = vpop.f32.mrf.mxu0  ;;  %v395_v54 = vpop.f32.mrf.mxu1  ;;  %3005 = vmatpush3.msra.mxu1 %v2671_v50  ;;  %v1352_v50 = vld [vmem:[%s4491_s5 + $0x10] sm:$0xff] }
 0x103   :  { %841 = vmatprep.subr.mxu0 %v3232_v0  ;;  %2966 = vmatprep.mubr.msk.f32.mxu0 %vm438_vm2, %v395_v54  ;;  %v1141_v54 = vld [vmem:[%s4487_s3 + $0x38] sm:$0xff] }
 0x104   :  { %842 = vmatpush1.msra.mxu0 %v3345_v7  ;;  %v208_v4 = vpop.f32.mrf.mxu0  ;;  %v397_v55 = vpop.f32.mrf.mxu1  ;;  %2990 = vmatprep.mubr.msk.f32.mxu1 %vm438_vm2, %v206_v53  ;;  %v1142_v53 = vld [vmem:[%s4487_s3 + $0x40] sm:$0xff] }
 0x105   :  { %843 = vmatprep.subr.mxu0 %v3232_v0  ;;  %3006 = vmatprep.subr.mxu1 %v2670_v51  ;;  %v1140_v4 = vld [vmem:[%s4487_s3 + $0x30] sm:$0xff]  ;;  %v1139_v55 = vld [vmem:[%s4487_s3 + $0x28] sm:$0xff] }
 0x106   :  { %844 = vmatpush1.msra.mxu0 %v3354_v8  ;;  %v211_v5 = vpop.f32.mrf.mxu0  ;;  %v400_v56 = vpop.f32.mrf.mxu1  ;;  %3007 = vmatpush3.msra.mxu1 %v2670_v51 }
 0x107   :  { %845 = vmatprep.subr.mxu0 %v3232_v0  ;;  %2967 = vmatmul.mubr.msk.f32.gmra.mxu0 %vm438_vm2, %v400_v56  ;;  %v1137_v56 = vld [vmem:[%s4487_s3 + $0x18] sm:$0xff] }
 0x108   :  { %846 = vmatpush1.msra.mxu0 %v3363_v9  ;;  %2991 = vmatmul.mubr.msk.f32.gmra.mxu1 %vm438_vm2, %v211_v5  ;;  %v213_v6 = vpop.f32.mrf.mxu0  ;;  %v402_v7 = vpop.f32.mrf.mxu1  ;;  %v1138_v5 = vld [vmem:[%s4487_s3 + $0x20] sm:$0xff] }
 0x109   :  { %847 = vmatprep.subr.mxu0 %v3232_v0  ;;  %3230 = vset.pattern.permute.xlu0 %v3233_v1  ;;  %v1136_v6 = vld [vmem:[%s4487_s3 + $0x10] sm:$0xff]  ;;  %v1135_v7 = vld [vmem:[%s4487_s3 + $0x8] sm:$0xff] }
 0x10a   :  { %848 = vmatpush1.msra.mxu0 %v3372_v10  ;;  %v216_v57 = vpop.f32.mrf.mxu0  ;;  %v405_v58 = vpop.f32.mrf.mxu1  ;;  %3231 = vset.pattern.permute.xlu1 %v3233_v1 }
 0x10b   :  { %849 = vmatprep.subr.mxu0 %v3232_v0  ;;  %2969 = vmatprep.mubr.msk.f32.mxu0 %vm438_vm2, %v405_v58  ;;  %v1968_v58 = vld [vmem:[%s4488_s6 + $0x28] sm:$0xff] }
 0x10c   :  { %850 = vmatpush1.msra.mxu0 %v3381_v11  ;;  %v218_v8 = vpop.f32.mrf.mxu0  ;;  %v407_v59 = vpop.f32.mrf.mxu1  ;;  %2993 = vmatprep.mubr.msk.f32.mxu1 %vm438_vm2, %v216_v57  ;;  %v1134_v57 = vld [vmem:[%s4487_s3] sm:$0xff] }
 0x10d   :  { %851 = vmatprep.subr.mxu0 %v3232_v0  ;;  %1203 = vperm.xlu0 %3230, %v1145_v52   ;;  %v1967_v8 = vld [vmem:[%s4488_s6 + $0x20] sm:$0xff]  ;;  %v1966_v59 = vld [vmem:[%s4488_s6 + $0x18] sm:$0xff] }
 0x10e   :  { %852 = vmatpush1.msra.mxu0 %v3390_v12  ;;  %v221_v9 = vpop.f32.mrf.mxu0  ;;  %v410_v60 = vpop.f32.mrf.mxu1  ;;  %1193 = vperm.xlu1 %3231, %v1143_v2  }
 0x10f   :  { %853 = vmatprep.subr.mxu0 %v3232_v0  ;;  %2970 = vmatmul.mubr.msk.f32.gmra.mxu0 %vm438_vm2, %v410_v60  ;;  %v1964_v60 = vld [vmem:[%s4488_s6 + $0x8] sm:$0xff] }
 0x110   :  { %854 = vmatpush1.msra.mxu0 %v3399_v13  ;;  %2994 = vmatmul.mubr.msk.f32.gmra.mxu1 %vm438_vm2, %v221_v9  ;;  %v223_v10 = vpop.f32.mrf.mxu0  ;;  %v412_v11 = vpop.f32.mrf.mxu1  ;;  %v1965_v9 = vld [vmem:[%s4488_s6 + $0x10] sm:$0xff] }
 0x111   :  { %855 = vmatprep.subr.mxu0 %v3232_v0  ;;  %1198 = vperm.xlu0 %3230, %v1144_v3   ;;  %v1963_v10 = vld [vmem:[%s4488_s6] sm:$0xff] }
 0x112   :  { %856 = vmatpush1.msra.mxu0 %v3408_v14  ;;  %v226_v61 = vpop.f32.mrf.mxu0  ;;  %v415_v62 = vpop.f32.mrf.mxu1  ;;  %1188 = vperm.xlu1 %3231, %v1142_v53   ;;  %v2542_v11 = vld [vmem:[%s4489_s9] sm:$0x3f] }
 0x113   :  { %857 = vmatprep.subr.mxu0 %v3232_v0  ;;  %2972 = vmatprep.mubr.msk.f32.mxu0 %vm438_vm2, %v415_v62 }
 0x114   :  { %858 = vmatpush1.msra.mxu0 %v3417_v15  ;;  %v228_v12 = vpop.f32.mrf.mxu0  ;;  %v417_v63 = vpop.f32.mrf.mxu1  ;;  %2996 = vmatprep.mubr.msk.f32.mxu1 %vm438_vm2, %v226_v61 }
 0x115   :  { %859 = vmatprep.subr.mxu0 %v3232_v0  ;;  %1183 = vperm.xlu0 %3230, %v1141_v54  }
 0x116   :  { %860 = vmatpush1.msra.mxu0 %v3426_v16  ;;  %v231_v13 = vpop.f32.mrf.mxu0  ;;  %v420_v25 = vpop.f32.mrf.mxu1  ;;  %1178 = vperm.xlu1 %3231, %v1140_v4  }
 0x117   :  { %877 = vmatprep.subr.mxu0 %v3232_v0  ;;  %2973 = vmatmul.mubr.msk.f32.gmra.mxu0 %vm438_vm2, %v420_v25 }
 0x118   :  { %878 = vmatpush2.msra.mxu0 %v3435_v17  ;;  %2997 = vmatmul.mubr.msk.f32.gmra.mxu1 %vm438_vm2, %v231_v13  ;;  %v233_v14 = vpop.f32.mrf.mxu0  ;;  %v422_v15 = vpop.f32.mrf.mxu1 }
 0x119   :  { %879 = vmatprep.subr.mxu0 %v3232_v0  ;;  %1173 = vperm.xlu0 %3230, %v1139_v55  }
 0x11a   :  { %880 = vmatpush2.msra.mxu0 %v3444_v18  ;;  %v236_v26 = vpop.f32.mrf.mxu0  ;;  %v425_v27 = vpop.f32.mrf.mxu1  ;;  %v2635_v18 = vld [vmem:[%s4485_s1 + $0x188] sm:$0xff]  ;;  %1168 = vperm.xlu1 %3231, %v1138_v5  }
 0x11b   :  { %881 = vmatprep.subr.mxu0 %v3232_v0  ;;  %2975 = vmatprep.mubr.msk.f32.mxu0 %vm438_vm2, %v425_v27 }
 0x11c   :  { %882 = vmatpush2.msra.mxu0 %v3453_v19  ;;  %v238_v16 = vpop.f32.mrf.mxu0  ;;  %v427_v28 = vpop.f32.mrf.mxu1  ;;  %2999 = vmatprep.mubr.msk.f32.mxu1 %vm438_vm2, %v236_v26 }
 0x11d   :  { %883 = vmatprep.subr.mxu0 %v3232_v0  ;;  %1163 = vperm.xlu0 %3230, %v1137_v56  }
 0x11e   :  { %884 = vmatpush2.msra.mxu0 %v3462_v20  ;;  %v241_v17 = vpop.f32.mrf.mxu0  ;;  %v430_v29 = vpop.f32.mrf.mxu1  ;;  %v2634_v20 = vld [vmem:[%s4485_s1 + $0x180] sm:$0xff]  ;;  %1158 = vperm.xlu1 %3231, %v1136_v6  }
 0x11f   :  { %885 = vmatprep.subr.mxu0 %v3232_v0  ;;  %2976 = vmatmul.mubr.msk.f32.gmra.mxu0 %vm438_vm2, %v430_v29 }
 0x120   :  { %886 = vmatpush2.msra.mxu0 %v3471_v21  ;;  %3000 = vmatmul.mubr.msk.f32.gmra.mxu1 %vm438_vm2, %v241_v17  ;;  %v432_v19 = vpop.f32.mrf.mxu1  ;;  %v243_v30 = vpop.f32.mrf.mxu0  ;;  %v2637_v21 = vld [vmem:[%s4485_s1 + $0x198] sm:$0xff] }
 0x121   :  { %887 = vmatprep.subr.mxu0 %v3232_v0  ;;  %2658 = vmatprep.mubr.msk.f32.mxu0 %vm83_vm0, %v2635_v18 }
 0x122   :  { %888 = vmatpush2.msra.mxu0 %v3480_v22  ;;  %v2636_v22 = vld [vmem:[%s4485_s1 + $0x190] sm:$0xff]  ;;  %1153 = vperm.xlu0 %3230, %v1135_v7  }
 0x123   :  { %889 = vmatprep.subr.mxu0 %v3232_v0  ;;  %1148 = vperm.xlu1 %3231, %v1134_v57  }
 0x124   :  { %890 = vmatpush2.msra.mxu0 %v3489_v23  ;;  %v2639_v23 = vld [vmem:[%s4485_s1 + $0x1a8] sm:$0xff] }
 0x125   :  { %891 = vmatprep.subr.mxu0 %v3232_v0 }
 0x126   :  { %892 = vmatpush2.msra.mxu0 %v3498_v24  ;;  %v2641_v24 = vld [vmem:[%s4485_s1 + $0x1b8] sm:$0xff]  ;;  %1996 = vperm.xlu0 %3230, %v1968_v58  }
 0x127   :  { %894 = vmatmul.mubr.f32.vlgmr.msra.gmra.mxu0 %v2634_v20  ;;  %1991 = vperm.xlu1 %3231, %v1967_v8  }
 0x128   :  { %2659 = vmatprep.mubr.msk.f32.mxu0 %vm83_vm0, %v2637_v21 }
 0x12a   :  { %1986 = vperm.xlu0 %3230, %v1966_v59  }
 0x12b   :  { %899 = vmatmul.mubr.f32.gmra.mxu0 %v2636_v22  ;;  %1981 = vperm.xlu1 %3231, %v1965_v9  }
 0x12c   :  { %2660 = vmatprep.mubr.msk.f32.mxu0 %vm83_vm0, %v2639_v23 }
 0x12e   :  { %1976 = vperm.xlu0 %3230, %v1964_v60  }
 0x12f   :  { %904 = vmatmul.mubr.f32.gmra.mxu0 %v2638_v31  ;;  %1971 = vperm.xlu1 %3231, %v1963_v10  }
 0x130   :  { %2661 = vmatprep.mubr.msk.f32.mxu0 %vm83_vm0, %v2641_v24 }
 0x132   :  { %2545 = vperm.xlu0 %3230, %v2542_v11  }
 0x133   :  { %909 = vmatmul.mubr.f32.gmra.mxu0 %v2640_v32 }
 0x134   :  { %2662 = vmatprep.mubr.msk.f32.mxu0 %vm83_vm0, %v2643_v33 }
 0x137   :  { %914 = vmatmul.mubr.f32.gmra.mxu0 %v2642_v34 }
 0x138   :  { %2663 = vmatprep.mubr.msk.f32.mxu0 %vm83_vm0, %v2645_v35 }
 0x13b   :  { %919 = vmatmul.mubr.f32.gmra.mxu0 %v2644_v36 }
 0x13c   :  { %2664 = vmatprep.mubr.msk.f32.mxu0 %vm83_vm0, %v2647_v37 }
 0x13f   :  { %924 = vmatmul.mubr.f32.gmra.mxu0 %v2646_v38 }
 0x140   :  { %2665 = vmatprep.mubr.msk.f32.mxu0 %vm83_vm0, %v2649_v39 }
 0x143   :  { %929 = vmatmul.mubr.f32.gmra.mxu0 %v2648_v40 }
 0x144   :  { %2666 = vmatprep.mubr.msk.f32.mxu0 %vm83_vm0, %v2651_v41 }
 0x147   :  { %934 = vmatmul.mubr.f32.gmra.mxu0 %v2650_v42 }
 0x148   :  { %2667 = vmatprep.mubr.msk.f32.mxu0 %vm83_vm0, %v2653_v43 }
 0x14b   :  { %939 = vmatmul.mubr.f32.gmra.mxu0 %v2652_v44 }
 0x14c   :  { %2668 = vmatprep.mubr.msk.f32.mxu0 %vm83_vm0, %v2655_v45  ;;  %v1230_v45 = vld [vmem:[%s4490_s4] sm:$0xff] }
 0x14f   :  { %944 = vmatmul.mubr.f32.gmra.mxu0 %v2654_v46 }
 0x150   :  { %2669 = vmatprep.mubr.msk.f32.mxu0 %vm83_vm0, %v2657_v47  ;;  %v1354_v47 = vld [vmem:[%s4491_s5 + $0x20] sm:$0x1f] }
 0x151   :  { %3111 = vmatprep.subr.msk.mxu0 %vm1500_vm4, %v1354_v47 }
 0x152   :  { %3112 = vmatpush3.msk.msra.mxu0 %vm1500_vm4, %v1354_v47 }
 0x153   :  { %949 = vmatmul.mubr.f32.gmra.mxu0 %v2656_v48  ;;  %v1353_v48 = vld [vmem:[%s4491_s5 + $0x18] sm:$0xff] }
 0x154   :  { %3113 = vmatprep.subr.mxu0 %v1353_v48 }
 0x155   :  { %3114 = vmatpush3.msra.mxu0 %v1353_v48 }
 0x156   :  { %3115 = vmatprep.subr.mxu0 %v1352_v50 }
 0x157   :  { %3116 = vmatpush3.msra.mxu0 %v1352_v50 }
 0x188   :  { %v1204_v59 = vpop.permute.xlu0 %1203 }
 0x189   :  { %v1194_v60 = vpop.permute.xlu1 %1193 }
 0x18c   :  { %v1199_v11 = vpop.permute.xlu0 %1198 }
 0x1b7   :  { %v3920_v61 = vpop.f32.mrf.mxu0  ;;  %v3960_v46 = vpop.f32.mrf.mxu1 }
 0x1b9   :  { %v3922_v62 = vpop.f32.mrf.mxu0  ;;  %v3968_v49 = vpop.f32.mrf.mxu1 }
 0x1bf   :  { %v3924_v12 = vpop.f32.mrf.mxu0 }
 0x1c0   :  { %v2989_v51 = vpop.f32.mrf.mxu1 }
 0x1c1   :  { %v3926_v63 = vpop.f32.mrf.mxu0 }
 0x1c2   :  { %v3975_v1 = vpop.f32.mrf.mxu1 }
 0x1c7   :  { %v3928_v13 = vpop.f32.mrf.mxu0 }
 0x1c8   :  { %v2992_v52 = vpop.f32.mrf.mxu1 }
 0x1c9   :  { %v3930_v25 = vpop.f32.mrf.mxu0 }
 0x1ca   :  { %v729_v2 = vpop.f32.mrf.mxu1 }
 0x1cf   :  { %v3932_v14 = vpop.f32.mrf.mxu0 }
 0x1d0   :  { %v2995_v3 = vpop.f32.mrf.mxu1 }
 0x1d1   :  { %v3934_v15 = vpop.f32.mrf.mxu0 }
 0x1d2   :  { %v739_v53 = vpop.f32.mrf.mxu1 }
 0x1d7   :  { %v3936_v26 = vpop.f32.mrf.mxu0 }
 0x1d8   :  { %v2998_v54 = vpop.f32.mrf.mxu1 }
 0x1d9   :  { %v3938_v27 = vpop.f32.mrf.mxu0 }
 0x1da   :  { %v749_v4 = vpop.f32.mrf.mxu1 }
 0x1df   :  { %v3940_v16 = vpop.f32.mrf.mxu0 }
 0x1e0   :  { %v3001_v55 = vpop.f32.mrf.mxu1 }
 0x1e1   :  { %v3942_v28 = vpop.f32.mrf.mxu0 }
 0x1e2   :  { %v759_v5 = vpop.f32.mrf.mxu1 }
 0x1e7   :  { %v895_v17 = vpop.f32.mrf.mxu0 }
 0x1e8   :  { %3008 = vmatprep.mubr.msk.f32.mxu1 %vm438_vm2, %v895_v17 }
 0x1e9   :  { %v897_v29 = vpop.f32.mrf.mxu0 }
 0x1ea   :  { %v1189_v29 = vpop.permute.xlu1 %1188 }
 0x1eb   :  { %v900_v18 = vpop.f32.mrf.mxu0 }
 0x1ec   :  { %3009 = vmatmul.mubr.msk.f32.vlgmr.msra.gmra.mxu1 %vm438_vm2, %v900_v18 }
 0x1ed   :  { %v902_v19 = vpop.f32.mrf.mxu0 }
 0x1ee   :  { %v755_v19 = vadd.f32 %v2998_v54, %v3936_v26 }
 0x1ef   :  { %v905_v30 = vpop.f32.mrf.mxu0 }
 0x1f0   :  { %3011 = vmatprep.mubr.msk.f32.mxu1 %vm438_vm2, %v905_v30  ;;  %v765_v30 = vadd.f32 %v3001_v55, %v3940_v16 }
 0x1f1   :  { %v907_v20 = vpop.f32.mrf.mxu0 }
 0x1f2   :  { %v1184_v20 = vpop.permute.xlu0 %1183 }
 0x1f3   :  { %v910_v21 = vpop.f32.mrf.mxu0 }
 0x1f4   :  { %3012 = vmatmul.mubr.msk.f32.gmra.mxu1 %vm438_vm2, %v910_v21 }
 0x1f5   :  { %v912_v22 = vpop.f32.mrf.mxu0 }
 0x1f6   :  { %v750_v22 = vadd.f32 %v749_v4, %v3938_v27  ;;  %v735_v27 = vadd.f32 %v2992_v52, %v3928_v13  ;;  %v725_v13 = vadd.f32 %v2989_v51, %v3924_v12  ;;  %v715_v12 = vadd.f32 %v3960_v46, %v3920_v61 }
 0x1f7   :  { %v915_v23 = vpop.f32.mrf.mxu0 }
 0x1f8   :  { %3014 = vmatprep.mubr.msk.f32.mxu1 %vm438_vm2, %v915_v23  ;;  %v760_v23 = vadd.f32 %v759_v5, %v3942_v28 }
 0x1f9   :  { %v917_v31 = vpop.f32.mrf.mxu0 }
 0x1fb   :  { %v920_v24 = vpop.f32.mrf.mxu0 }
 0x1fc   :  { %3015 = vmatmul.mubr.msk.f32.gmra.mxu1 %vm438_vm2, %v920_v24 }
 0x1fd   :  { %v922_v32 = vpop.f32.mrf.mxu0 }
 0x1fe   :  { %v1179_v32 = vpop.permute.xlu1 %1178 }
 0x1ff   :  { %v925_v33 = vpop.f32.mrf.mxu0 }
 0x200   :  { %3017 = vmatprep.mubr.msk.f32.mxu1 %vm438_vm2, %v925_v33 }
 0x201   :  { %v927_v34 = vpop.f32.mrf.mxu0 }
 0x202   :  { %v745_v34 = vadd.f32 %v2995_v3, %v3932_v14  ;;  %v1169_v14 = vpop.permute.xlu1 %1168 }
 0x203   :  { %v930_v35 = vpop.f32.mrf.mxu0 }
 0x204   :  { %3018 = vmatmul.mubr.msk.f32.gmra.mxu1 %vm438_vm2, %v930_v35 }
 0x205   :  { %v932_v36 = vpop.f32.mrf.mxu0 }
 0x206   :  { %v1159_v4 = vpop.permute.xlu1 %1158 }
 0x207   :  { %v935_v37 = vpop.f32.mrf.mxu0 }
 0x208   :  { %3020 = vmatprep.mubr.msk.f32.mxu1 %vm438_vm2, %v935_v37 }
 0x209   :  { %v937_v38 = vpop.f32.mrf.mxu0 }
 0x20a   :  { %v740_v38 = vadd.f32 %v739_v53, %v3934_v15 }
 0x20b   :  { %v940_v39 = vpop.f32.mrf.mxu0 }
 0x20c   :  { %3021 = vmatmul.mubr.msk.f32.gmra.mxu1 %vm438_vm2, %v940_v39 }
 0x20d   :  { %v942_v40 = vpop.f32.mrf.mxu0 }
 0x20f   :  { %v945_v41 = vpop.f32.mrf.mxu0 }
 0x210   :  { %3023 = vmatprep.mubr.msk.f32.mxu1 %vm438_vm2, %v945_v41  ;;  %v1174_v41 = vpop.permute.xlu0 %1173 }
 0x211   :  { %v947_v42 = vpop.f32.mrf.mxu0 }
 0x213   :  { %v950_v43 = vpop.f32.mrf.mxu0 }
 0x214   :  { %3024 = vmatmul.mubr.msk.f32.gmra.mxu1 %vm438_vm2, %v950_v43  ;;  %v1164_v3 = vpop.permute.xlu0 %1163 }
 0x215   :  { %v952_v44 = vpop.f32.mrf.mxu0  ;;  %3050 = vmatprep.mubr.msk.f32.mxu1 %vm1236_vm3, %v1230_v45 }
 0x216   :  { %v730_v44 = vadd.f32 %v729_v2, %v3930_v25  ;;  %v720_v25 = vadd.f32 %v3975_v1, %v3926_v63  ;;  %v710_v63 = vadd.f32 %v3968_v49, %v3922_v62 }
 0x2ac   :  { %v3977_v56 = vpop.f32.mrf.mxu1 }
 0x2ad   :  { %v1123_v1 = vadd.f32 %v3977_v56, %v715_v12 }
 0x2ae   :  { %v3979_v6 = vpop.f32.mrf.mxu1 }
 0x2af   :  { %v1122_v61 = vadd.f32 %v3979_v6, %v710_v63 }
 0x2b4   :  { %v3013_v7 = vpop.f32.mrf.mxu1 }
 0x2b5   :  { %v1125_v2 = vadd.f32 %v3013_v7, %v725_v13  ;;  %v2727_v13 = vld [vmem:[%s4490_s4 + $0x80] sm:$0xff] }
 0x2b6   :  { %v1073_v57 = vpop.f32.mrf.mxu1 }
 0x2b7   :  { %v1124_v51 = vadd.f32 %v1073_v57, %v720_v25  ;;  %v1209_v7 = vadd.f32 %v1164_v3, %v1125_v2  ;;  %v2737_v3 = vld [vmem:[%s4491_s5 + $0x60] sm:$0xff]  ;;  %v2736_v25 = vld [vmem:[%s4491_s5 + $0x58] sm:$0xff]  ;;  %v2735_v2 = vld [vmem:[%s4491_s5 + $0x50] sm:$0xff] }
 0x2b9   :  { %v1208_v46 = vadd.f32 %v1159_v4, %v1124_v51  ;;  %v4028_v49 = vmax.f32 %v1209_v7, 0.0 }
 0x2bc   :  { %v3016_v58 = vpop.f32.mrf.mxu1 }
 0x2bd   :  { %v1127_v15 = vadd.f32 %v3016_v58, %v735_v27 }
 0x2be   :  { %v1083_v8 = vpop.f32.mrf.mxu1 }
 0x2bf   :  { %v1126_v48 = vadd.f32 %v1083_v8, %v730_v44  ;;  %v1211_v53 = vadd.f32 %v1174_v41, %v1127_v15  ;;  %v1154_v8 = vpop.permute.xlu0 %1153 }
 0x2c0   :  { %v1207_v62 = vadd.f32 %v1154_v8, %v1123_v1 }
 0x2c1   :  { %v1210_v55 = vadd.f32 %v1169_v14, %v1126_v48  ;;  %v4019_v58 = vmax.f32 %v1211_v53, 0.0  ;;  %v2728_v48 = vld [vmem:[%s4490_s4 + $0x88] sm:$0xff] }
 0x2c2   :  { %v4036_v6 = vmax.f32 %v1207_v62, 0.0 }
 0x2c3   :  { %v4024_v57 = vmax.f32 %v1210_v55, 0.0 }
 0x2c4   :  { %v3019_v9 = vpop.f32.mrf.mxu1 }
 0x2c5   :  { %v1129_v26 = vadd.f32 %v3019_v9, %v745_v34  ;;  %v4032_v9 = vmax.f32 %v1208_v46, 0.0  ;;  %v2704_v34 = vld [vmem:[%s4491_s5 + $0x28] sm:$0xff] }
 0x2c6   :  { %v1093_v10 = vpop.f32.mrf.mxu1 }
 0x2c7   :  { %v1128_v28 = vadd.f32 %v1093_v10, %v740_v38  ;;  %v1213_v45 = vadd.f32 %v1184_v20, %v1129_v26  ;;  %v1231_v10 = vld [vmem:[%s4490_s4 + $0x8] sm:$0xff] }
 0x2c8   :  { %v2708_v20 = vld [vmem:[%s4491_s5 + $0x48] sm:$0x1f] }
 0x2c9   :  { %v1212_v50 = vadd.f32 %v1179_v32, %v1128_v28  ;;  %v4006_v54 = vmax.f32 %v1213_v45, 0.0  ;;  %v2705_v32 = vld [vmem:[%s4491_s5 + $0x30] sm:$0xff] }
 0x2ca   :  { %v2725_v45 = vld [vmem:[%s4490_s4 + $0x70] sm:$0xff] }
 0x2cb   :  { %v4012_v5 = vmax.f32 %v1212_v50, 0.0  ;;  %v2739_v50 = vld [vmem:[%s4491_s5 + $0x70] sm:$0x1f] }
 0x2cc   :  { %v3022_v17 = vpop.f32.mrf.mxu1 }
 0x2cd   :  { %v1131_v31 = vadd.f32 %v3022_v17, %v755_v19  ;;  %v1233_v17 = vld [vmem:[%s4490_s4 + $0x18] sm:$0xff]  ;;  %v2692_v19 = vld [vmem:[%s4490_s4 + $0x30] sm:$0xff] }
 0x2ce   :  { %v1103_v18 = vpop.f32.mrf.mxu1 }
 0x2cf   :  { %v1130_v35 = vadd.f32 %v1103_v18, %v750_v22  ;;  %v1215_v39 = vadd.f32 %v1194_v60, %v1131_v31  ;;  %v1235_v18 = vld [vmem:[%s4490_s4 + $0x28] sm:$0xff]  ;;  %v2707_v22 = vld [vmem:[%s4491_s5 + $0x40] sm:$0xff]  ;;  %v2706_v31 = vld [vmem:[%s4491_s5 + $0x38] sm:$0xff] }
 0x2d1   :  { %v1214_v42 = vadd.f32 %v1189_v29, %v1130_v35  ;;  %v3995_v47 = vmax.f32 %v1215_v39, 0.0  ;;  %v1234_v29 = vld [vmem:[%s4490_s4 + $0x20] sm:$0xff]  ;;  %v1351_v35 = vld [vmem:[%s4491_s5 + $0x8] sm:$0xff] }
 0x2d2   :  { %3117 = vmatprep.subr.mxu0 %v1351_v35 }
 0x2d3   :  { %v4000_v52 = vmax.f32 %v1214_v42, 0.0  ;;  %3118 = vmatpush3.msra.mxu0 %v1351_v35 }
 0x2d4   :  { %v3025_v21 = vpop.f32.mrf.mxu1 }
 0x2d5   :  { %v1133_v24 = vadd.f32 %v3025_v21, %v765_v30  ;;  %v2693_v30 = vld [vmem:[%s4490_s4 + $0x38] sm:$0xff]  ;;  %v2694_v21 = vld [vmem:[%s4490_s4 + $0x40] sm:$0xff] }
 0x2d6   :  { %v1113_v33 = vpop.f32.mrf.mxu1 }
 0x2d7   :  { %v1217_v36 = vadd.f32 %v1204_v59, %v1133_v24  ;;  %v1132_v37 = vadd.f32 %v1113_v33, %v760_v23  ;;  %v1149_v59 = vpop.permute.xlu1 %1148  ;;  %v2695_v23 = vld [vmem:[%s4490_s4 + $0x48] sm:$0xff]  ;;  %v2696_v24 = vld [vmem:[%s4490_s4 + $0x50] sm:$0xff]  ;;  %v2697_v33 = vld [vmem:[%s4490_s4 + $0x58] sm:$0xff] }
 0x2d8   :  { %v1206_v56 = vadd.f32 %v1149_v59, %v1122_v61 }
 0x2d9   :  { %v3987_v16 = vmax.f32 %v1217_v36, 0.0  ;;  %v1216_v40 = vadd.f32 %v1199_v11, %v1132_v37  ;;  %v1232_v11 = vld [vmem:[%s4490_s4 + $0x10] sm:$0xff]  ;;  %v1350_v36 = vld [vmem:[%s4491_s5] sm:$0xff] }
 0x2da   :  { %v4040_v60 = vmax.f32 %v1206_v56, 0.0  ;;  %3119 = vmatprep.subr.mxu0 %v1350_v36 }
 0x2db   :  { %v3990_v43 = vmax.f32 %v1216_v40, 0.0  ;;  %3026 = vmatprep.subr.mxu1 %v3987_v16  ;;  %3120 = vmatpush3.msra.mxu0 %v1350_v36 }
 0x2dc   :  { %3027 = vmatpush3.msra.mxu1 %v3987_v16  ;;  %3163 = vmatprep.subr.msk.mxu0 %vm1500_vm4, %v2739_v50 }
 0x2dd   :  { %3028 = vmatprep.subr.mxu1 %v3990_v43 }
 0x2de   :  { %3029 = vmatpush3.msra.mxu1 %v3990_v43 }
 0x2df   :  { %3030 = vmatprep.subr.mxu1 %v3995_v47 }
 0x2e0   :  { %3031 = vmatpush3.msra.mxu1 %v3995_v47 }
 0x2e1   :  { %3032 = vmatprep.subr.mxu1 %v4000_v52 }
 0x2e2   :  { %3033 = vmatpush3.msra.mxu1 %v4000_v52 }
 0x2e3   :  { %3034 = vmatprep.subr.mxu1 %v4006_v54 }
 0x2e4   :  { %3035 = vmatpush3.msra.mxu1 %v4006_v54 }
 0x2e5   :  { %3036 = vmatprep.subr.mxu1 %v4012_v5 }
 0x2e6   :  { %3037 = vmatpush3.msra.mxu1 %v4012_v5 }
 0x2e7   :  { %3038 = vmatprep.subr.mxu1 %v4019_v58 }
 0x2e8   :  { %3039 = vmatpush3.msra.mxu1 %v4019_v58 }
 0x2e9   :  { %3040 = vmatprep.subr.mxu1 %v4024_v57 }
 0x2ea   :  { %3041 = vmatpush3.msra.mxu1 %v4024_v57 }
 0x2eb   :  { %3042 = vmatprep.subr.mxu1 %v4028_v49 }
 0x2ec   :  { %3043 = vmatpush3.msra.mxu1 %v4028_v49 }
 0x2ed   :  { %3044 = vmatprep.subr.mxu1 %v4032_v9 }
 0x2ee   :  { %3045 = vmatpush3.msra.mxu1 %v4032_v9 }
 0x2ef   :  { %3046 = vmatprep.subr.mxu1 %v4036_v6 }
 0x2f0   :  { %3047 = vmatpush3.msra.mxu1 %v4036_v6 }
 0x2f1   :  { %3048 = vmatprep.subr.mxu1 %v4040_v60 }
 0x2f2   :  { %3049 = vmatpush3.msra.mxu1 %v4040_v60 }
 0x2f3   :  { %3051 = vmatmul.mubr.msk.f32.vlgmr.msra.gmra.mxu1 %vm1236_vm3, %v1231_v10  ;;  %3059 = vmatprep.subr.mxu1 %v3987_v16  ;;  %v1992_v10 = vpop.permute.xlu1 %1991 }
 0x2f4   :  { %3060 = vmatpush3.msra.mxu1 %v3987_v16  ;;  %3053 = vmatprep.mubr.msk.f32.mxu1 %vm1236_vm3, %v1232_v11 }
 0x2f5   :  { %3061 = vmatprep.subr.mxu1 %v3990_v43 }
 0x2f6   :  { %3062 = vmatpush3.msra.mxu1 %v3990_v43 }
 0x2f7   :  { %3063 = vmatprep.subr.mxu1 %v3995_v47  ;;  %3054 = vmatmul.mubr.msk.f32.gmra.mxu1 %vm1236_vm3, %v1233_v17 }
 0x2f8   :  { %3064 = vmatpush3.msra.mxu1 %v3995_v47  ;;  %3056 = vmatprep.mubr.msk.f32.mxu1 %vm1236_vm3, %v1234_v29 }
 0x2f9   :  { %3065 = vmatprep.subr.mxu1 %v4000_v52 }
 0x2fa   :  { %3066 = vmatpush3.msra.mxu1 %v4000_v52 }
 0x2fb   :  { %3067 = vmatprep.subr.mxu1 %v4006_v54  ;;  %3057 = vmatmul.mubr.msk.f32.gmra.mxu1 %vm1236_vm3, %v1235_v18 }
 0x2fc   :  { %3068 = vmatpush3.msra.mxu1 %v4006_v54  ;;  %3083 = vmatprep.mubr.msk.f32.mxu1 %vm1236_vm3, %v2692_v19 }
 0x2fd   :  { %3069 = vmatprep.subr.mxu1 %v4012_v5 }
 0x2fe   :  { %3070 = vmatpush3.msra.mxu1 %v4012_v5 }
 0x2ff   :  { %3071 = vmatprep.subr.mxu1 %v4019_v58 }
 0x300   :  { %3072 = vmatpush3.msra.mxu1 %v4019_v58 }
 0x301   :  { %3073 = vmatprep.subr.mxu1 %v4024_v57 }
 0x302   :  { %3074 = vmatpush3.msra.mxu1 %v4024_v57 }
 0x303   :  { %3075 = vmatprep.subr.mxu1 %v4028_v49 }
 0x304   :  { %3076 = vmatpush3.msra.mxu1 %v4028_v49 }
 0x305   :  { %3077 = vmatprep.subr.mxu1 %v4032_v9 }
 0x306   :  { %3078 = vmatpush3.msra.mxu1 %v4032_v9 }
 0x307   :  { %3079 = vmatprep.subr.mxu1 %v4036_v6 }
 0x308   :  { %3080 = vmatpush3.msra.mxu1 %v4036_v6 }
 0x309   :  { %3081 = vmatprep.subr.mxu1 %v4040_v60 }
 0x30a   :  { %3082 = vmatpush3.msra.mxu1 %v4040_v60 }
 0x30b   :  { %3084 = vmatmul.mubr.msk.f32.vlgmr.msra.gmra.mxu1 %vm1236_vm3, %v2693_v30  ;;  %3092 = vmatprep.subr.msk.mxu1 %vm1500_vm4, %v2708_v20 }
 0x30c   :  { %3093 = vmatpush3.msk.msra.mxu1 %vm1500_vm4, %v2708_v20  ;;  %3086 = vmatprep.mubr.msk.f32.mxu1 %vm1236_vm3, %v2694_v21 }
 0x30d   :  { %3094 = vmatprep.subr.mxu1 %v2707_v22 }
 0x30e   :  { %3095 = vmatpush3.msra.mxu1 %v2707_v22 }
 0x30f   :  { %3087 = vmatmul.mubr.msk.f32.gmra.mxu1 %vm1236_vm3, %v2695_v23  ;;  %3096 = vmatprep.subr.mxu1 %v2706_v31 }
 0x310   :  { %3097 = vmatpush3.msra.mxu1 %v2706_v31  ;;  %3089 = vmatprep.mubr.msk.f32.mxu1 %vm1236_vm3, %v2696_v24 }
 0x311   :  { %3098 = vmatprep.subr.mxu1 %v2705_v32 }
 0x312   :  { %3099 = vmatpush3.msra.mxu1 %v2705_v32 }
 0x313   :  { %3090 = vmatmul.mubr.msk.f32.gmra.mxu1 %vm1236_vm3, %v2697_v33  ;;  %3100 = vmatprep.subr.mxu1 %v2704_v34 }
 0x314   :  { %3101 = vmatpush3.msra.mxu1 %v2704_v34  ;;  %v1982_v34 = vpop.permute.xlu1 %1981 }
 0x315   :  { %3130 = vmatprep.subr.mxu1 %v3987_v16 }
 0x3b3   :  { %v3052_v37 = vpop.f32.mrf.mxu1 }
 0x3b5   :  { %v1321_v38 = vpop.f32.mrf.mxu1 }
 0x3b6   :  { %3121 = vmatprep.mubr.msk.f32.mxu0 %vm1481_vm5, %v1321_v38 }
 0x3b7   :  { %3122 = vmatmul.mubr.msk.f32.vlgmr.msra.gmra.mxu0 %vm1481_vm5, %v3052_v37  ;;  %v3055_v26 = vpop.f32.mrf.mxu1 }
 0x3b8   :  { %3164 = vmatpush3.msk.msra.mxu0 %vm1500_vm4, %v2739_v50  ;;  %v2768_v50 = vld [vmem:[%s4493_s8 + $0x130] sm:$0x7] }
 0x3b9   :  { %v1331_v39 = vpop.f32.mrf.mxu1 }
 0x3ba   :  { %3124 = vmatprep.mubr.msk.f32.mxu0 %vm1481_vm5, %v1331_v39 }
 0x3bb   :  { %v3058_v40 = vpop.f32.mrf.mxu1  ;;  %3125 = vmatmul.mubr.msk.f32.gmra.mxu0 %vm1481_vm5, %v3055_v26 }
 0x3bd   :  { %v1341_v41 = vpop.f32.mrf.mxu1 }
 0x3be   :  { %3127 = vmatprep.mubr.msk.f32.mxu0 %vm1481_vm5, %v1341_v41 }
 0x3bf   :  { %3128 = vmatmul.mubr.msk.f32.gmra.mxu0 %vm1481_vm5, %v3058_v40 }
 0x3cb   :  { %v3085_v27 = vpop.f32.mrf.mxu1 }
 0x3cd   :  { %v1446_v28 = vpop.f32.mrf.mxu1 }
 0x3ce   :  { %3102 = vmatprep.mubr.msk.f32.mxu1 %vm1481_vm5, %v1446_v28 }
 0x3cf   :  { %v3088_v42 = vpop.f32.mrf.mxu1  ;;  %3103 = vmatmul.mubr.msk.f32.vlgmr.msra.gmra.mxu1 %vm1481_vm5, %v3085_v27 }
 0x3d0   :  { %3131 = vmatpush3.msra.mxu1 %v3987_v16  ;;  %v2723_v16 = vld [vmem:[%s4490_s4 + $0x60] sm:$0xff] }
 0x3d1   :  { %3132 = vmatprep.subr.mxu1 %v3990_v43  ;;  %v1456_v14 = vpop.f32.mrf.mxu1 }
 0x3d2   :  { %3133 = vmatpush3.msra.mxu1 %v3990_v43  ;;  %3105 = vmatprep.mubr.msk.f32.mxu1 %vm1481_vm5, %v1456_v14  ;;  %v2724_v43 = vld [vmem:[%s4490_s4 + $0x68] sm:$0xff]  ;;  %v1972_v14 = vpop.permute.xlu1 %1971 }
 0x3d3   :  { %3134 = vmatprep.subr.mxu1 %v3995_v47  ;;  %v3091_v44 = vpop.f32.mrf.mxu1  ;;  %3106 = vmatmul.mubr.msk.f32.gmra.mxu1 %vm1481_vm5, %v3088_v42 }
 0x3d4   :  { %3135 = vmatpush3.msra.mxu1 %v3995_v47  ;;  %v2726_v47 = vld [vmem:[%s4490_s4 + $0x78] sm:$0xff] }
 0x3d5   :  { %3136 = vmatprep.subr.mxu1 %v4000_v52  ;;  %v1466_v15 = vpop.f32.mrf.mxu1 }
 0x3d6   :  { %3137 = vmatpush3.msra.mxu1 %v4000_v52  ;;  %3108 = vmatprep.mubr.msk.f32.mxu1 %vm1481_vm5, %v1466_v15  ;;  %v2738_v52 = vld [vmem:[%s4491_s5 + $0x68] sm:$0xff] }
 0x3d7   :  { %3138 = vmatprep.subr.mxu1 %v4006_v54  ;;  %3109 = vmatmul.mubr.msk.f32.gmra.mxu1 %vm1481_vm5, %v3091_v44 }
 0x3d8   :  { %3139 = vmatpush3.msra.mxu1 %v4006_v54  ;;  %3154 = vmatprep.mubr.msk.f32.mxu1 %vm1236_vm3, %v2723_v16 }
 0x3d9   :  { %3140 = vmatprep.subr.mxu1 %v4012_v5  ;;  %3165 = vmatprep.subr.mxu0 %v2738_v52 }
 0x3da   :  { %3141 = vmatpush3.msra.mxu1 %v4012_v5  ;;  %3166 = vmatpush3.msra.mxu0 %v2738_v52  ;;  %v2104_v52 = vld [vmem:[%s4493_s8 + $0x90] sm:$0x7] }
 0x3db   :  { %3142 = vmatprep.subr.mxu1 %v4019_v58  ;;  %3167 = vmatprep.subr.mxu0 %v2737_v3 }
 0x3dc   :  { %3143 = vmatpush3.msra.mxu1 %v4019_v58  ;;  %3168 = vmatpush3.msra.mxu0 %v2737_v3  ;;  %v2767_v3 = vld [vmem:[%s4493_s8 + $0x128] sm:$0xff] }
 0x3dd   :  { %3144 = vmatprep.subr.mxu1 %v4024_v57  ;;  %3169 = vmatprep.subr.mxu0 %v2736_v25 }
 0x3de   :  { %3145 = vmatpush3.msra.mxu1 %v4024_v57  ;;  %3170 = vmatpush3.msra.mxu0 %v2736_v25  ;;  %v2103_v25 = vld [vmem:[%s4493_s8 + $0x88] sm:$0xff] }
 0x3df   :  { %3146 = vmatprep.subr.mxu1 %v4028_v49  ;;  %3171 = vmatprep.subr.mxu0 %v2735_v2 }
 0x3e0   :  { %3147 = vmatpush3.msra.mxu1 %v4028_v49  ;;  %3172 = vmatpush3.msra.mxu0 %v2735_v2  ;;  %v2766_v2 = vld [vmem:[%s4493_s8 + $0x120] sm:$0xff] }
 0x3e1   :  { %3148 = vmatprep.subr.mxu1 %v4032_v9  ;;  %3182 = vmatprep.subr.mxu0 %v3232_v0 }
 0x3e2   :  { %3149 = vmatpush3.msra.mxu1 %v4032_v9 }
 0x3e3   :  { %3150 = vmatprep.subr.mxu1 %v4036_v6 }
 0x3e4   :  { %3151 = vmatpush3.msra.mxu1 %v4036_v6  ;;  %v1997_v6 = vpop.permute.xlu0 %1996 }
 0x3e5   :  { %3152 = vmatprep.subr.mxu1 %v4040_v60 }
 0x3e6   :  { %3153 = vmatpush3.msra.mxu1 %v4040_v60 }
 0x3e7   :  { %3155 = vmatmul.mubr.msk.f32.vlgmr.msra.gmra.mxu1 %vm1236_vm3, %v2724_v43  ;;  %3197 = vmatprep.subr.mxu1 %v3232_v0 }
 0x3e8   :  { %3157 = vmatprep.mubr.msk.f32.mxu1 %vm1236_vm3, %v2725_v45  ;;  %v1987_v22 = vpop.permute.xlu0 %1986  ;;  %v2011_v45 = vld [vmem:[%s4492_s7] sm:$0x3f] }
 0x3eb   :  { %3158 = vmatmul.mubr.msk.f32.gmra.mxu1 %vm1236_vm3, %v2726_v47  ;;  %v2748_v47 = vld [vmem:[%s4492_s7 + $0x8] sm:$0x3f] }
 0x3ec   :  { %3160 = vmatprep.mubr.msk.f32.mxu1 %vm1236_vm3, %v2727_v13  ;;  %v1977_v27 = vpop.permute.xlu0 %1976  ;;  %v2769_v13 = vld [vmem:[%s4493_s8 + $0x138] sm:$0x7] }
 0x3ef   :  { %3161 = vmatmul.mubr.msk.f32.gmra.mxu1 %vm1236_vm3, %v2728_v48  ;;  %v2105_v48 = vld [vmem:[%s4493_s8 + $0x98] sm:$0x7] }
 0x3f0   :  { %3209 = vmatprep.mubr.msk.f32.mxu1 %vm3234_vm6, %v3232_v0 }
 0x477   :  { %v3123_v61 = vpop.f32.mrf.mxu0 }
 0x479   :  { %v1686_v46 = vpop.f32.mrf.mxu0 }
 0x47b   :  { %v3126_v57 = vpop.f32.mrf.mxu0 }
 0x47d   :  { %v1696_v59 = vpop.f32.mrf.mxu0 }
 0x47f   :  { %v3129_v62 = vpop.f32.mrf.mxu0 }
 0x481   :  { %v1706_v49 = vpop.f32.mrf.mxu0 }
 0x48f   :  { %v3104_v53 = vpop.f32.mrf.mxu1 }
 0x490   :  { %v1692_v31 = vadd.f32 %v3123_v61, %v3104_v53  ;;  %v2102_v53 = vld [vmem:[%s4493_s8 + $0x80] sm:$0xff]  ;;  %v2096_v61 = vld [vmem:[%s4493_s8 + $0x50] sm:$0xff] }
 0x491   :  { %v1570_v54 = vpop.f32.mrf.mxu1 }
 0x492   :  { %v1687_v35 = vadd.f32 %v1686_v46, %v1570_v54  ;;  %v2765_v54 = vld [vmem:[%s4493_s8 + $0x118] sm:$0xff]  ;;  %v2759_v46 = vld [vmem:[%s4493_s8 + $0xe8] sm:$0xff] }
 0x493   :  { %v3107_v4 = vpop.f32.mrf.mxu1 }
 0x494   :  { %v1702_v17 = vadd.f32 %v3126_v57, %v3107_v4  ;;  %v2101_v4 = vld [vmem:[%s4493_s8 + $0x78] sm:$0xff]  ;;  %v2095_v57 = vld [vmem:[%s4493_s8 + $0x48] sm:$0xff] }
 0x495   :  { %v1580_v12 = vpop.f32.mrf.mxu1 }
 0x496   :  { %v1697_v19 = vadd.f32 %v1696_v59, %v1580_v12  ;;  %v2764_v12 = vld [vmem:[%s4493_s8 + $0x110] sm:$0xff]  ;;  %v2758_v59 = vld [vmem:[%s4493_s8 + $0xe0] sm:$0xff] }
 0x497   :  { %v3110_v51 = vpop.f32.mrf.mxu1 }
 0x498   :  { %v1712_v29 = vadd.f32 %v3129_v62, %v3110_v51  ;;  %v2100_v51 = vld [vmem:[%s4493_s8 + $0x70] sm:$0xff]  ;;  %v2094_v62 = vld [vmem:[%s4493_s8 + $0x40] sm:$0xff] }
 0x499   :  { %v1590_v55 = vpop.f32.mrf.mxu1 }
 0x49a   :  { %v1707_v30 = vadd.f32 %v1706_v49, %v1590_v55  ;;  %v2763_v55 = vld [vmem:[%s4493_s8 + $0x108] sm:$0xff]  ;;  %v2757_v49 = vld [vmem:[%s4493_s8 + $0xd8] sm:$0xff] }
 0x4a7   :  { %v3156_v5 = vpop.f32.mrf.mxu1 }
 0x4a9   :  { %v1806_v63 = vpop.f32.mrf.mxu1 }
 0x4aa   :  { %3173 = vmatprep.mubr.msk.f32.mxu0 %vm1481_vm5, %v1806_v63  ;;  %v2762_v63 = vld [vmem:[%s4493_s8 + $0x100] sm:$0xff] }
 0x4ab   :  { %v3159_v1 = vpop.f32.mrf.mxu1  ;;  %3174 = vmatmul.mubr.msk.f32.vlgmr.msra.gmra.mxu0 %vm1481_vm5, %v3156_v5  ;;  %v2099_v5 = vld [vmem:[%s4493_s8 + $0x68] sm:$0xff] }
 0x4ad   :  { %v1816_v7 = vpop.f32.mrf.mxu1 }
 0x4ae   :  { %3176 = vmatprep.mubr.msk.f32.mxu0 %vm1481_vm5, %v1816_v7  ;;  %v2761_v7 = vld [vmem:[%s4493_s8 + $0xf8] sm:$0xff] }
 0x4af   :  { %v3162_v58 = vpop.f32.mrf.mxu1  ;;  %3177 = vmatmul.mubr.msk.f32.gmra.mxu0 %vm1481_vm5, %v3159_v1  ;;  %v2098_v1 = vld [vmem:[%s4493_s8 + $0x60] sm:$0xff] }
 0x4b1   :  { %v1826_v8 = vpop.f32.mrf.mxu1 }
 0x4b2   :  { %3179 = vmatprep.mubr.msk.f32.mxu0 %vm1481_vm5, %v1826_v8  ;;  %v2760_v8 = vld [vmem:[%s4493_s8 + $0xf0] sm:$0xff] }
 0x4b3   :  { %3180 = vmatmul.mubr.msk.f32.gmra.mxu0 %vm1481_vm5, %v3162_v58  ;;  %v2097_v58 = vld [vmem:[%s4493_s8 + $0x58] sm:$0xff] }
 0x4b4   :  { %3194 = vmatprep.mubr.msk.f32.mxu0 %vm3234_vm6, %v3232_v0 }
 0x56b   :  { %v3175_v56 = vpop.f32.mrf.mxu0 }
 0x56c   :  { %v1958_v36 = vadd.f32 %v3175_v56, %v1692_v31  ;;  %v2093_v56 = vld [vmem:[%s4493_s8 + $0x38] sm:$0xff] }
 0x56d   :  { %v1928_v9 = vpop.f32.mrf.mxu0  ;;  %v2797_v31 = vld [vmem:[%s4493_s8 + $0x1d8] sm:$0x7] }
 0x56e   :  { %v1957_v39 = vadd.f32 %v1928_v9, %v1687_v35  ;;  %v2000_v28 = vadd.f32 %v1977_v27, %v1958_v36  ;;  %v2756_v9 = vld [vmem:[%s4493_s8 + $0xd0] sm:$0xff]  ;;  %v2789_v27 = vld [vmem:[%s4493_s8 + $0x198] sm:$0xff] }
 0x56f   :  { %v3178_v60 = vpop.f32.mrf.mxu0 }
 0x570   :  { %v1960_v20 = vadd.f32 %v3178_v60, %v1702_v17  ;;  %v1999_v44 = vadd.f32 %v1972_v14, %v1957_v39  ;;  %v4246_v16 = vmax.f32 %v2000_v28, 0.0  ;;  %v2755_v60 = vld [vmem:[%s4493_s8 + $0xc8] sm:$0xff]  ;;  %v2090_v17 = vld [vmem:[%s4493_s8 + $0x20] sm:$0xff]  ;;  %v2788_v28 = vld [vmem:[%s4493_s8 + $0x190] sm:$0xff] }
 0x571   :  { %v1938_v11 = vpop.f32.mrf.mxu0  ;;  %v2791_v39 = vld [vmem:[%s4493_s8 + $0x1a8] sm:$0xff]  ;;  %v2785_v14 = vld [vmem:[%s4493_s8 + $0x178] sm:$0xff] }
 0x572   :  { %v1959_v24 = vadd.f32 %v1938_v11, %v1697_v19  ;;  %v2002_v37 = vadd.f32 %v1987_v22, %v1960_v20  ;;  %v4252_v43 = vmax.f32 %v1999_v44, 0.0  ;;  %v2754_v11 = vld [vmem:[%s4493_s8 + $0xc0] sm:$0xff]  ;;  %v2752_v19 = vld [vmem:[%s4493_s8 + $0xb0] sm:$0xff]  ;;  %v2751_v20 = vld [vmem:[%s4493_s8 + $0xa8] sm:$0xff] }
 0x573   :  { %v3181_v18 = vpop.f32.mrf.mxu0  ;;  %v2750_v22 = vld [vmem:[%s4493_s8 + $0xa0] sm:$0xff]  ;;  %v2784_v44 = vld [vmem:[%s4493_s8 + $0x170] sm:$0xff] }
 0x574   :  { %v1962_v21 = vadd.f32 %v3181_v18, %v1712_v29  ;;  %v2001_v40 = vadd.f32 %v1982_v34, %v1959_v24  ;;  %v4234_v42 = vmax.f32 %v2002_v37, 0.0  ;;  %v2753_v29 = vld [vmem:[%s4493_s8 + $0xb8] sm:$0xff]  ;;  %v2795_v34 = vld [vmem:[%s4493_s8 + $0x1c8] sm:$0xff]  ;;  %v2794_v37 = vld [vmem:[%s4493_s8 + $0x1c0] sm:$0xff] }
 0x575   :  { %v1948_v23 = vpop.f32.mrf.mxu0  ;;  %v2089_v18 = vld [vmem:[%s4493_s8 + $0x18] sm:$0xff] }
 0x576   :  { %v2004_v32 = vadd.f32 %v1997_v6, %v1962_v21  ;;  %v1961_v33 = vadd.f32 %v1948_v23, %v1707_v30  ;;  %v4240_v15 = vmax.f32 %v2001_v40, 0.0  ;;  %v2092_v6 = vld [vmem:[%s4493_s8 + $0x30] sm:$0xff]  ;;  %v2087_v21 = vld [vmem:[%s4493_s8 + $0x8] sm:$0xff]  ;;  %v2086_v23 = vld [vmem:[%s4493_s8] sm:$0xff] }
 0x577   :  { %v2088_v30 = vld [vmem:[%s4493_s8 + $0x10] sm:$0xff]  ;;  %v2790_v40 = vld [vmem:[%s4493_s8 + $0x1a0] sm:$0xff] }
 0x578   :  { %v4226_v38 = vmax.f32 %v2004_v32, 0.0  ;;  %v2003_v26 = vadd.f32 %v1992_v10, %v1961_v33  ;;  %v2091_v10 = vld [vmem:[%s4493_s8 + $0x28] sm:$0xff]  ;;  %v2796_v33 = vld [vmem:[%s4493_s8 + $0x1d0] sm:$0x7] }
 0x57a   :  { %v4228_v41 = vmax.f32 %v2003_v26, 0.0  ;;  %3183 = vmatpush3.msra.mxu0 %v4226_v38  ;;  %3198 = vmatpush3.msra.mxu1 %v4226_v38  ;;  %v2793_v26 = vld [vmem:[%s4493_s8 + $0x1b8] sm:$0xff] }
 0x57b   :  { %3184 = vmatprep.subr.mxu0 %v3232_v0  ;;  %3199 = vmatprep.subr.mxu1 %v3232_v0 }
 0x57c   :  { %3185 = vmatpush3.msra.mxu0 %v4228_v41  ;;  %3200 = vmatpush3.msra.mxu1 %v4228_v41 }
 0x57d   :  { %3186 = vmatprep.subr.mxu0 %v3232_v0  ;;  %3201 = vmatprep.subr.mxu1 %v3232_v0 }
 0x57e   :  { %3187 = vmatpush3.msra.mxu0 %v4234_v42  ;;  %3202 = vmatpush3.msra.mxu1 %v4234_v42 }
 0x57f   :  { %3188 = vmatprep.subr.mxu0 %v3232_v0  ;;  %3203 = vmatprep.subr.mxu1 %v3232_v0 }
 0x580   :  { %3189 = vmatpush3.msra.mxu0 %v4240_v15  ;;  %3204 = vmatpush3.msra.mxu1 %v4240_v15 }
 0x581   :  { %3190 = vmatprep.subr.mxu0 %v3232_v0  ;;  %3205 = vmatprep.subr.mxu1 %v3232_v0 }
 0x582   :  { %3191 = vmatpush3.msra.mxu0 %v4246_v16  ;;  %3206 = vmatpush3.msra.mxu1 %v4246_v16 }
 0x583   :  { %3192 = vmatprep.subr.mxu0 %v3232_v0  ;;  %3207 = vmatprep.subr.mxu1 %v3232_v0 }
 0x584   :  { %3193 = vmatpush3.msra.mxu0 %v4252_v43  ;;  %3208 = vmatpush3.msra.mxu1 %v4252_v43 }
 0x585   :  { %3195 = vmatmul.mubr.msk.f32.vlgmr.msra.gmra.mxu0 %vm2012_vm7, %v2011_v45  ;;  %3210 = vmatmul.mubr.msk.f32.vlgmr.msra.gmra.mxu1 %vm2012_vm7, %v2748_v47  ;;  %v2780_v45 = vld [vmem:[%s4493_s8 + $0x150] sm:$0xff]  ;;  %v2779_v47 = vld [vmem:[%s4493_s8 + $0x148] sm:$0xff] }
 0x586   :  { %2770 = vmatprep.subr.msk.mxu0 %vm2206_vm8, %v2769_v13  ;;  %2773 = vmatprep.subr.msk.mxu1 %vm2206_vm8, %v2105_v48  ;;  %v2778_v13 = vld [vmem:[%s4493_s8 + $0x140] sm:$0xff] }
 0x587   :  { %2771 = vmatpush1.msk.msra.mxu0 %vm2206_vm8, %v2768_v50  ;;  %2774 = vmatpush1.msk.msra.mxu1 %vm2206_vm8, %v2104_v52 }
 0x588   :  { %2227 = vmatprep.subr.mxu0 %v2767_v3  ;;  %2307 = vmatprep.subr.mxu1 %v2103_v25 }
 0x589   :  { %2228 = vmatpush1.msra.mxu0 %v2766_v2  ;;  %2308 = vmatpush1.msra.mxu1 %v2102_v53 }
 0x58a   :  { %2229 = vmatprep.subr.mxu0 %v2765_v54  ;;  %2309 = vmatprep.subr.mxu1 %v2101_v4 }
 0x58b   :  { %2230 = vmatpush1.msra.mxu0 %v2764_v12  ;;  %2310 = vmatpush1.msra.mxu1 %v2100_v51  ;;  %v2546_v51 = vpop.permute.xlu0 %2545 }
 0x58c   :  { %2231 = vmatprep.subr.mxu0 %v2763_v55  ;;  %2311 = vmatprep.subr.mxu1 %v2099_v5 }
 0x58d   :  { %2232 = vmatpush1.msra.mxu0 %v2762_v63  ;;  %2312 = vmatpush1.msra.mxu1 %v2098_v1 }
 0x58e   :  { %2233 = vmatprep.subr.mxu0 %v2761_v7  ;;  %2313 = vmatprep.subr.mxu1 %v2097_v58 }
 0x58f   :  { %2234 = vmatpush1.msra.mxu0 %v2760_v8  ;;  %2314 = vmatpush1.msra.mxu1 %v2096_v61 }
 0x590   :  { %2235 = vmatprep.subr.mxu0 %v2759_v46  ;;  %2315 = vmatprep.subr.mxu1 %v2095_v57 }
 0x591   :  { %2236 = vmatpush1.msra.mxu0 %v2758_v59  ;;  %2316 = vmatpush1.msra.mxu1 %v2094_v62 }
 0x592   :  { %2237 = vmatprep.subr.mxu0 %v2757_v49  ;;  %2317 = vmatprep.subr.mxu1 %v2093_v56 }
 0x593   :  { %2238 = vmatpush1.msra.mxu0 %v2756_v9  ;;  %2318 = vmatpush1.msra.mxu1 %v2092_v6 }
 0x594   :  { %2239 = vmatprep.subr.mxu0 %v2755_v60  ;;  %2319 = vmatprep.subr.mxu1 %v2091_v10 }
 0x595   :  { %2240 = vmatpush1.msra.mxu0 %v2754_v11  ;;  %2320 = vmatpush1.msra.mxu1 %v2090_v17 }
 0x596   :  { %2241 = vmatprep.subr.mxu0 %v2753_v29  ;;  %2321 = vmatprep.subr.mxu1 %v2089_v18 }
 0x597   :  { %2242 = vmatpush1.msra.mxu0 %v2752_v19  ;;  %2322 = vmatpush1.msra.mxu1 %v2088_v30 }
 0x598   :  { %2243 = vmatprep.subr.mxu0 %v2751_v20  ;;  %2323 = vmatprep.subr.mxu1 %v2087_v21 }
 0x599   :  { %2244 = vmatpush1.msra.mxu0 %v2750_v22  ;;  %2277 = vmatprep.mubr.f32.mxu0 %v3232_v0 }
 0x59a   :  { %2357 = vmatprep.mubr.f32.mxu1 %v3232_v0  ;;  %3212 = vmatprep.subr.mxu0 %v3232_v0 }
 0x59b   :  { %2324 = vmatpush1.msra.mxu1 %v2086_v23 }
 0x59c   :  { %2798 = vmatprep.subr.msk.mxu1 %vm2206_vm8, %v2797_v31 }
 0x645   :  { %v2082_v24 = vpop.f32.mrf.mxu0  ;;  %v2177_v32 = vpop.f32.mrf.mxu1 }
 0x646   :  { %2772 = vmatmul.mubr.msk.f32.vlgmr.msra.gmra.mxu0 %vm2202_vm9, %v2177_v32  ;;  %2775 = vmatmul.mubr.msk.f32.vlgmr.msra.gmra.mxu1 %vm2202_vm9, %v2082_v24 }
 0x647   :  { %3213 = vmatpush3.msra.mxu0 %v4226_v38  ;;  %v3211_v35 = vpop.f32.mrf.mxu1  ;;  %3224 = vmatprep.mubr.msk.f32.mxu0 %vm3234_vm6, %v3232_v0  ;;  %v3196_v36 = vpop.f32.mrf.mxu0  ;;  %v2792_v38 = vld [vmem:[%s4493_s8 + $0x1b0] sm:$0xff] }
 0x648   :  { %3214 = vmatprep.subr.mxu0 %v3232_v0  ;;  %2799 = vmatpush1.msk.msra.mxu1 %vm2206_vm8, %v2796_v33 }
 0x649   :  { %3215 = vmatpush3.msra.mxu0 %v4228_v41  ;;  %2483 = vmatprep.subr.mxu1 %v2795_v34  ;;  %v2776_v41 = vld [vmem:[%s4492_s7 + $0x10] sm:$0x3f] }
 0x64a   :  { %3216 = vmatprep.subr.mxu0 %v3232_v0  ;;  %2484 = vmatpush1.msra.mxu1 %v2794_v37 }
 0x64b   :  { %3217 = vmatpush3.msra.mxu0 %v4234_v42  ;;  %2485 = vmatprep.subr.mxu1 %v2793_v26  ;;  %v2787_v42 = vld [vmem:[%s4493_s8 + $0x188] sm:$0xff] }
 0x64c   :  { %3218 = vmatprep.subr.mxu0 %v3232_v0  ;;  %2486 = vmatpush1.msra.mxu1 %v2792_v38 }
 0x64d   :  { %3219 = vmatpush3.msra.mxu0 %v4240_v15  ;;  %2487 = vmatprep.subr.mxu1 %v2791_v39  ;;  %v2783_v15 = vld [vmem:[%s4493_s8 + $0x168] sm:$0xff] }
 0x64e   :  { %3220 = vmatprep.subr.mxu0 %v3232_v0  ;;  %2488 = vmatpush1.msra.mxu1 %v2790_v40 }
 0x64f   :  { %3221 = vmatpush3.msra.mxu0 %v4246_v16  ;;  %2533 = vmatprep.mubr.f32.mxu1 %v3232_v0  ;;  %v2782_v16 = vld [vmem:[%s4493_s8 + $0x160] sm:$0xff] }
 0x650   :  { %3222 = vmatprep.subr.mxu0 %v3232_v0  ;;  %2489 = vmatprep.subr.mxu1 %v2789_v27  ;;  %v2786_v0 = vld [vmem:[%s4493_s8 + $0x180] sm:$0xff] }
 0x651   :  { %3223 = vmatpush3.msra.mxu0 %v4252_v43  ;;  %2490 = vmatpush1.msra.mxu1 %v2788_v28  ;;  %v2781_v43 = vld [vmem:[%s4493_s8 + $0x158] sm:$0xff] }
 0x652   :  { %3225 = vmatmul.mubr.msk.f32.vlgmr.msra.gmra.mxu0 %vm2012_vm7, %v2776_v41  ;;  %2491 = vmatprep.subr.mxu1 %v2787_v42 }
 0x653   :  { %2492 = vmatpush1.msra.mxu1 %v2786_v0 }
 0x654   :  { %2493 = vmatprep.subr.mxu1 %v2785_v14 }
 0x655   :  { %2494 = vmatpush1.msra.mxu1 %v2784_v44 }
 0x656   :  { %2495 = vmatprep.subr.mxu1 %v2783_v15 }
 0x657   :  { %2496 = vmatpush1.msra.mxu1 %v2782_v16 }
 0x658   :  { %2497 = vmatprep.subr.mxu1 %v2781_v43 }
 0x659   :  { %2498 = vmatpush1.msra.mxu1 %v2780_v45 }
 0x65a   :  { %2499 = vmatprep.subr.mxu1 %v2779_v47 }
 0x65b   :  { %2500 = vmatpush1.msra.mxu1 %v2778_v13 }
 0x706   :  { %v2279_v48 = vpop.f32.mrf.mxu0  ;;  %v2359_v25 = vpop.f32.mrf.mxu1 }
 0x707   :  { %v2360_v53 = vadd.f32 %v2359_v25, %v2279_v48 }
 0x708   :  { %v2281_v50 = vpop.f32.mrf.mxu0  ;;  %v2361_v2 = vpop.f32.mrf.mxu1 }
 0x709   :  { %v2362_v4 = vadd.f32 %v2361_v2, %v2281_v50 }
 0x712   :  { %v2435_v52 = vpop.f32.mrf.mxu0 }
 0x713   :  { %2800 = vmatmul.mubr.msk.f32.vlgmr.msra.gmra.mxu1 %vm2202_vm9, %v2435_v52 }
 0x714   :  { %v3226_v3 = vpop.f32.mrf.mxu0 }
 0x7d3   :  { %v2535_v54 = vpop.f32.mrf.mxu1 }
 0x7d4   :  { %v2540_v12 = vadd.f32 %v2535_v54, %v2360_v53 }
 0x7d5   :  { %v2537_v55 = vpop.f32.mrf.mxu1 }
 0x7d6   :  { %v2548_v5 = vadd.f32 %v2546_v51, %v2540_v12  ;;  %v2541_v63 = vadd.f32 %v2537_v55, %v2362_v4 }
 0x7d8   :  { %2550 = vst [vmem:[%s4494_s10] sm:$0x3f] %v2548_v5  ;;  %v2549_v1 = vadd.f32 %v2546_v51, %v2541_v63 }
 0x7da   :  { %2552 = vst.msk [vmem:[%s4494_s10 + $0x8] sm:$0x3f] %vm2551_vm10, %v2549_v1 }

</bundles_post_ra>
